<compile_context>
chip_gen: v7x
topology: tpu7x:2x2x1
jax: 0.10.0
libtpu: 0.0.40
codegen_flags: <defaults>
</compile_context>

<pallas_src>
import jax
import jax.numpy as jnp
from jax import lax
from jax.experimental import pallas as pl
from jax.experimental.pallas import tpu as pltpu


def _question_lstm_kernel(ids_ref, idx_ref, tab0_ref, w_hh0_ref, w_cat1_ref,
                          b1_ref, out_ref):
    """Fused question-LSTM hot path (single invocation, no grid).

    ids_ref   : (T*N, 1) i32   token ids, time-major (row = t*N + n)
    idx_ref   : (N, 1)   i32   index of last non-pad token per row
    tab0_ref  : (V, 4*HP)      embed @ W_ih0 + b0, gate-padded to HP lanes
    w_hh0_ref : (HP, 4*HP)     layer-0 recurrent weights (rows/cols padded)
    w_cat1_ref: (2*HP, 4*HP)   [W_ih1 ; W_hh1] fused, rows/cols padded
    b1_ref    : (1, 4*HP) f32  layer-1 combined bias, gate-padded
    out_ref   : (N, H)   f32   layer-2 hidden state at time idx[n]
    """
    N, H = out_ref.shape
    HP = w_hh0_ref.shape[0]          # padded hidden width (128 lanes)
    G = 4 * HP
    V = tab0_ref.shape[0]
    T = ids_ref.shape[0] // N
    f32 = jnp.float32
    mxu_dt = w_hh0_ref.dtype         # f32 here; bf16 if weights were prepared so

    # ---------------- hoisted off the recurrent critical path ----------------
    # In-kernel embedding gather fused with the layer-0 input projection and
    # bias: one-hot(ids) @ (embed @ W_ih0 + b0) — one pre-loop MXU op.
    iota_v = lax.broadcasted_iota(jnp.int32, (T * N, V), 1)
    one_hot = jnp.where(ids_ref[...] == iota_v, 1.0, 0.0).astype(mxu_dt)
    gx0 = jnp.dot(one_hot, tab0_ref[...], preferred_element_type=f32)  # (T*N, G)
    b1 = jnp.broadcast_to(b1_ref[...].astype(f32), (N, G))  # broadcast once
    idx = idx_ref[...]                                       # (N, 1)

    def gate_math(gates, c_prev):
        # 128-lane-aligned slices: no cross-vreg shuffles.  Gate order [i,f,g,o]
        # matches PyTorch nn.LSTM.
        i = jax.nn.sigmoid(gates[:, 0 * HP:1 * HP])
        f = jax.nn.sigmoid(gates[:, 1 * HP:2 * HP])
        g = jnp.tanh(gates[:, 2 * HP:3 * HP])
        o = jax.nn.sigmoid(gates[:, 3 * HP:4 * HP])
        c_new = f * c_prev + i * g
        h_new = o * jnp.tanh(c_new)
        return h_new, c_new

    h0 = jnp.zeros((N, HP), f32)
    c0 = jnp.zeros((N, HP), f32)
    h1 = jnp.zeros((N, HP), f32)
    c1 = jnp.zeros((N, HP), f32)
    out_acc = jnp.zeros((N, HP), f32)

    # Fully unrolled recurrence (T is small & static): removes per-iteration
    # loop overhead and lets the scheduler overlap independent work.
    for t in range(T):
        # layer 0: input projection precomputed -> only h @ W_hh on the chain.
        g0 = gx0[t * N:(t + 1) * N, :] + jnp.dot(
            h0.astype(mxu_dt), w_hh0_ref[...], preferred_element_type=f32)
        h0, c0 = gate_math(g0, c0)
        # layer 1: single fused matmul over [h0 | h1].
        xh = jnp.concatenate([h0, h1], axis=1).astype(mxu_dt)      # (N, 2*HP)
        g1 = b1 + jnp.dot(xh, w_cat1_ref[...], preferred_element_type=f32)
        h1, c1 = gate_math(g1, c1)
        # equivalent of hs.gather(1, idx): keep h1 where t == idx[n].
        out_acc = jnp.where(idx == t, h1, out_acc)

    out_ref[...] = out_acc[:, :H]    # single store (real lanes only)


def prepare_question_lstm_params(params, *, lane_pad=128,
                                 mxu_dtype=jnp.float32):
    """One-time, weight-only preparation of the fused/padded kernel operands.

    * tab0   = embed @ W_ih0 + b0  (fuses the embedding lookup with the
               layer-0 input projection and its bias),
    * w_cat1 = [W_ih1 ; W_hh1]     (single fused matmul per step for layer 1),
    * every gate block is zero-padded from H to `lane_pad` lanes so in-kernel
      gate slices are 128-lane aligned; zero rows/cols keep padded lanes at 0.
    On v6e/v7x, `mxu_dtype=jnp.bfloat16` halves weight VMEM/DMA (keep the
    elementwise math f32; loosen the reference tolerance to ~1e-3).
    """
    H = params["w_hh0"].shape[0]
    hp = lane_pad
    highest = jax.lax.Precision.HIGHEST

    def pad_gates(w):                      # (..., 4H) -> (..., 4*hp)
        blocks = jnp.split(w, 4, axis=-1)
        cfg = [(0, 0)] * (w.ndim - 1) + [(0, hp - H)]
        return jnp.concatenate([jnp.pad(b, cfg) for b in blocks], axis=-1)

    def pad_rows(w):                       # (H, 4*hp) -> (hp, 4*hp)
        return jnp.pad(w, ((0, hp - H), (0, 0)))

    tab0 = pad_gates(
        jnp.dot(params["embed"], params["w_ih0"], precision=highest)
        + params["b0"])
    w_hh0 = pad_rows(pad_gates(params["w_hh0"]))
    w_cat1 = jnp.concatenate(
        [pad_rows(pad_gates(params["w_ih1"])),
         pad_rows(pad_gates(params["w_hh1"]))], axis=0)
    b1 = pad_gates(params["b1"]).astype(jnp.float32)

    return {
        "tab0": tab0.astype(mxu_dtype),
        "w_hh0": w_hh0.astype(mxu_dtype),
        "w_cat1": w_cat1.astype(mxu_dtype),
        "b1": b1,
        "H": H,
        "HP": hp,
    }


def question_lstm_encoder(x, kparams, null_idx):
    """Forward pass matching QuestionLstmEncoder.forward (eval mode)."""
    N, T = x.shape
    H = kparams["H"]

    # tiny glue: time-major token-id column + last-non-pad index per row.
    ids_tm = jnp.transpose(x, (1, 0)).reshape(T * N, 1).astype(jnp.int32)
    idx = (jnp.sum((x != null_idx).astype(jnp.int32), axis=-1) - 1)
    idx = idx.astype(jnp.int32).reshape(N, 1)

    vmem = pl.BlockSpec(memory_space=pltpu.MemorySpace.VMEM)
    out = pl.pallas_call(
        _question_lstm_kernel,
        out_shape=jax.ShapeDtypeStruct((N, H), jnp.float32),
        in_specs=[vmem] * 6,
        out_specs=vmem,
        compiler_params=pltpu.CompilerParams(
            vmem_limit_bytes=32 * 1024 * 1024),
    )(ids_tm, idx, kparams["tab0"], kparams["w_hh0"],
      kparams["w_cat1"], kparams["b1"])
    return out


def reference_forward(x, params, null_idx):
    """Pure-JAX reference (PyTorch LSTM semantics, f32) for verification."""
    highest = jax.lax.Precision.HIGHEST
    embed_w = params["embed"]
    emb = embed_w[x].astype(jnp.float32)                  # (N, T, D)
    N, T, _ = emb.shape
    H = params["w_hh0"].shape[0]

    def cell(h, c, x_t, w_ih, w_hh, b):
        gates = (jnp.dot(x_t, w_ih, precision=highest)
                 + jnp.dot(h, w_hh, precision=highest) + b)
        i = jax.nn.sigmoid(gates[:, :H])
        f = jax.nn.sigmoid(gates[:, H:2 * H])
        g = jnp.tanh(gates[:, 2 * H:3 * H])
        o = jax.nn.sigmoid(gates[:, 3 * H:4 * H])
        c = f * c + i * g
        h = o * jnp.tanh(c)
        return h, c

    def scan_layer(inputs, w_ih, w_hh, b):
        def step(carry, x_t):
            h, c = carry
            h, c = cell(h, c, x_t, w_ih, w_hh, b)
            return (h, c), h
        init = (jnp.zeros((N, H), jnp.float32), jnp.zeros((N, H), jnp.float32))
        _, hs = lax.scan(step, init, jnp.transpose(inputs, (1, 0, 2)))
        return jnp.transpose(hs, (1, 0, 2))               # (N, T, H)

    hs0 = scan_layer(emb, params["w_ih0"], params["w_hh0"], params["b0"][0])
    hs1 = scan_layer(hs0, params["w_ih1"], params["w_hh1"], params["b1"][0])
    idx = jnp.sum((x != null_idx).astype(jnp.int32), axis=-1) - 1
    return hs1[jnp.arange(N), idx]


if __name__ == "__main__":
    # vocab from token_to_idx (PAD/START/END + filler words)
    token_to_idx = {"<pad>": 0, "<s>": 1, "</s>": 2}
    for i in range(13):
        token_to_idx[f"w{i}"] = 3 + i
    V = len(token_to_idx)                  # 16
    NULL = token_to_idx["<pad>"]

    N, T, D, H = 2, 8, 64, 64              # batch, seq, wordvec_dim, rnn_dim

    key = jax.random.PRNGKey(0)
    ks = jax.random.split(key, 12)
    k = 1.0 / (H ** 0.5)                   # PyTorch LSTM default init range

    def unif(kk, shape, lo, hi):
        return jax.random.uniform(kk, shape, jnp.float32, lo, hi)

    params = {
        # nn.Embedding weight, init_weights(): uniform(-0.1, 0.1)
        "embed": unif(ks[0], (V, D), -0.1, 0.1),
        # layer 0: W_ih (4H, D) / W_hh (4H, H) stored transposed; biases combined
        "w_ih0": unif(ks[1], (D, 4 * H), -k, k),
        "w_hh0": unif(ks[2], (H, 4 * H), -k, k),
        "b0": (unif(ks[3], (1, 4 * H), -k, k) + unif(ks[4], (1, 4 * H), -k, k)),
        # layer 1 (input size = H)
        "w_ih1": unif(ks[5], (H, 4 * H), -k, k),
        "w_hh1": unif(ks[6], (H, 4 * H), -k, k),
        "b1": (unif(ks[7], (1, 4 * H), -k, k) + unif(ks[8], (1, 4 * H), -k, k)),
    }

    # deterministic token ids with trailing padding.  No fully padded rows:
    # a fully padded row gives idx = -1 -> zero output here, while PyTorch's
    # hs.gather(1, -1) is not a defined/valid case.
    tok = jax.random.randint(ks[9], (N, T), 1, V)         # non-pad ids
    lengths = jnp.array([5, 8], dtype=jnp.int32)
    mask = jnp.arange(T)[None, :] < lengths[:, None]
    x = jnp.where(mask, tok, NULL).astype(jnp.int32)      # (N, T)

    # one-time weight preparation (fused / gate-padded kernel operands).
    kparams = prepare_question_lstm_params(params, mxu_dtype=jnp.float32)

    out = question_lstm_encoder(x, kparams, NULL)
    out = jax.block_until_ready(out)

    ref = reference_forward(x, params, NULL)
    assert out.shape == (N, H)
    assert jnp.allclose(out, ref, atol=1e-4, rtol=1e-4), "mismatch vs reference"

    print("KERNEL_OK")
</pallas_src>

<mosaic_0001>
module attributes {stable_mosaic.version = 11 : i64} {
  func.func @_question_lstm_kernel(%arg0: memref<16x1xi32, #tpu.memory_space<vmem>>, %arg1: memref<2x1xi32, #tpu.memory_space<vmem>>, %arg2: memref<16x512xf32, #tpu.memory_space<vmem>>, %arg3: memref<128x512xf32, #tpu.memory_space<vmem>>, %arg4: memref<256x512xf32, #tpu.memory_space<vmem>>, %arg5: memref<1x512xf32, #tpu.memory_space<vmem>>, %arg6: memref<2x64xf32, #tpu.memory_space<vmem>>) attributes {dimension_semantics = [], scalar_prefetch = 0 : i64, scratch_operands = 0 : i64, tpu.core_type = #tpu.core_type<tc>} {
    %0 = tpu.iota {dimensions = array<i32: 1>} : vector<16x16xi32>
    %c0 = arith.constant 0 : index
    %c0_0 = arith.constant 0 : index
    %1 = vector.load %arg0[%c0, %c0_0] : memref<16x1xi32, #tpu.memory_space<vmem>>, vector<16x1xi32>
    %2 = vector.broadcast %1 : vector<16x1xi32> to vector<16x16xi32>
    %3 = arith.cmpi eq, %2, %0 : vector<16x16xi32>
    %cst = arith.constant 1.000000e+00 : f32
    %cst_1 = arith.constant 0.000000e+00 : f32
    %4 = vector.broadcast %cst : f32 to vector<16x16xf32>
    %5 = vector.broadcast %cst_1 : f32 to vector<16x16xf32>
    %6 = arith.select %3, %4, %5 : vector<16x16xi1>, vector<16x16xf32>
    %c0_2 = arith.constant 0 : index
    %c0_3 = arith.constant 0 : index
    %7 = vector.load %arg2[%c0_2, %c0_3] : memref<16x512xf32, #tpu.memory_space<vmem>>, vector<16x512xf32>
    %cst_4 = arith.constant dense<0.000000e+00> : vector<16x512xf32>
    %8 = tpu.matmul %6, %7, %cst_4 {dimension_numbers = #tpu.dot_dimension_numbers<[1], [0], [0], [1], [0, 0, 1, 1], [], []>} : vector<16x16xf32>, vector<16x512xf32>, vector<16x512xf32> -> vector<16x512xf32>
    %c0_5 = arith.constant 0 : index
    %c0_6 = arith.constant 0 : index
    %9 = vector.load %arg5[%c0_5, %c0_6] : memref<1x512xf32, #tpu.memory_space<vmem>>, vector<1x512xf32>
    %10 = vector.shape_cast %9 : vector<1x512xf32> to vector<1x512xf32>
    %11 = vector.broadcast %10 : vector<1x512xf32> to vector<2x512xf32>
    %c0_7 = arith.constant 0 : index
    %c0_8 = arith.constant 0 : index
    %12 = vector.load %arg1[%c0_7, %c0_8] : memref<2x1xi32, #tpu.memory_space<vmem>>, vector<2x1xi32>
    %cst_9 = arith.constant 0.000000e+00 : f32
    %13 = vector.broadcast %cst_9 : f32 to vector<2x128xf32>
    %cst_10 = arith.constant 0.000000e+00 : f32
    %14 = vector.broadcast %cst_10 : f32 to vector<2x128xf32>
    %cst_11 = arith.constant 0.000000e+00 : f32
    %15 = vector.broadcast %cst_11 : f32 to vector<2x128xf32>
    %cst_12 = arith.constant 0.000000e+00 : f32
    %16 = vector.broadcast %cst_12 : f32 to vector<2x128xf32>
    %cst_13 = arith.constant 0.000000e+00 : f32
    %17 = vector.broadcast %cst_13 : f32 to vector<2x128xf32>
    %18 = vector.extract_strided_slice %8 {offsets = [0, 0], sizes = [2, 512], strides = [1, 1]} : vector<16x512xf32> to vector<2x512xf32>
    %c0_14 = arith.constant 0 : index
    %c0_15 = arith.constant 0 : index
    %19 = vector.load %arg3[%c0_14, %c0_15] : memref<128x512xf32, #tpu.memory_space<vmem>>, vector<128x512xf32>
    %cst_16 = arith.constant dense<0.000000e+00> : vector<2x512xf32>
    %20 = tpu.matmul %13, %19, %cst_16 {dimension_numbers = #tpu.dot_dimension_numbers<[1], [0], [0], [1], [0, 0, 1, 1], [], []>} : vector<2x128xf32>, vector<128x512xf32>, vector<2x512xf32> -> vector<2x512xf32>
    %21 = arith.addf %18, %20 : vector<2x512xf32>
    %22 = vector.extract_strided_slice %21 {offsets = [0, 0], sizes = [2, 128], strides = [1, 1]} : vector<2x512xf32> to vector<2x128xf32>
    %23 = arith.negf %22 : vector<2x128xf32>
    %24 = math.exp %23 : vector<2x128xf32>
    %cst_17 = arith.constant 1.000000e+00 : f32
    %25 = vector.broadcast %cst_17 : f32 to vector<2x128xf32>
    %26 = arith.addf %25, %24 : vector<2x128xf32>
    %27 = arith.divf %25, %26 : vector<2x128xf32>
    %28 = vector.extract_strided_slice %21 {offsets = [0, 128], sizes = [2, 128], strides = [1, 1]} : vector<2x512xf32> to vector<2x128xf32>
    %29 = arith.negf %28 : vector<2x128xf32>
    %30 = math.exp %29 : vector<2x128xf32>
    %cst_18 = arith.constant 1.000000e+00 : f32
    %31 = vector.broadcast %cst_18 : f32 to vector<2x128xf32>
    %32 = arith.addf %31, %30 : vector<2x128xf32>
    %33 = arith.divf %31, %32 : vector<2x128xf32>
    %34 = vector.extract_strided_slice %21 {offsets = [0, 256], sizes = [2, 128], strides = [1, 1]} : vector<2x512xf32> to vector<2x128xf32>
    %35 = math.tanh %34 : vector<2x128xf32>
    %36 = vector.extract_strided_slice %21 {offsets = [0, 384], sizes = [2, 128], strides = [1, 1]} : vector<2x512xf32> to vector<2x128xf32>
    %37 = arith.negf %36 : vector<2x128xf32>
    %38 = math.exp %37 : vector<2x128xf32>
    %cst_19 = arith.constant 1.000000e+00 : f32
    %39 = vector.broadcast %cst_19 : f32 to vector<2x128xf32>
    %40 = arith.addf %39, %38 : vector<2x128xf32>
    %41 = arith.divf %39, %40 : vector<2x128xf32>
    %42 = arith.mulf %33, %14 : vector<2x128xf32>
    %43 = arith.mulf %27, %35 : vector<2x128xf32>
    %44 = arith.addf %42, %43 : vector<2x128xf32>
    %45 = math.tanh %44 : vector<2x128xf32>
    %46 = arith.mulf %41, %45 : vector<2x128xf32>
    %47 = tpu.concatenate %46, %15 in 1 : vector<2x128xf32>, vector<2x128xf32> -> vector<2x256xf32>
    %c0_20 = arith.constant 0 : index
    %c0_21 = arith.constant 0 : index
    %48 = vector.load %arg4[%c0_20, %c0_21] : memref<256x512xf32, #tpu.memory_space<vmem>>, vector<256x512xf32>
    %cst_22 = arith.constant dense<0.000000e+00> : vector<2x512xf32>
    %49 = tpu.matmul %47, %48, %cst_22 {dimension_numbers = #tpu.dot_dimension_numbers<[1], [0], [0], [1], [0, 0, 1, 1], [], []>} : vector<2x256xf32>, vector<256x512xf32>, vector<2x512xf32> -> vector<2x512xf32>
    %50 = arith.addf %11, %49 : vector<2x512xf32>
    %51 = vector.extract_strided_slice %50 {offsets = [0, 0], sizes = [2, 128], strides = [1, 1]} : vector<2x512xf32> to vector<2x128xf32>
    %52 = arith.negf %51 : vector<2x128xf32>
    %53 = math.exp %52 : vector<2x128xf32>
    %cst_23 = arith.constant 1.000000e+00 : f32
    %54 = vector.broadcast %cst_23 : f32 to vector<2x128xf32>
    %55 = arith.addf %54, %53 : vector<2x128xf32>
    %56 = arith.divf %54, %55 : vector<2x128xf32>
    %57 = vector.extract_strided_slice %50 {offsets = [0, 128], sizes = [2, 128], strides = [1, 1]} : vector<2x512xf32> to vector<2x128xf32>
    %58 = arith.negf %57 : vector<2x128xf32>
    %59 = math.exp %58 : vector<2x128xf32>
    %cst_24 = arith.constant 1.000000e+00 : f32
    %60 = vector.broadcast %cst_24 : f32 to vector<2x128xf32>
    %61 = arith.addf %60, %59 : vector<2x128xf32>
    %62 = arith.divf %60, %61 : vector<2x128xf32>
    %63 = vector.extract_strided_slice %50 {offsets = [0, 256], sizes = [2, 128], strides = [1, 1]} : vector<2x512xf32> to vector<2x128xf32>
    %64 = math.tanh %63 : vector<2x128xf32>
    %65 = vector.extract_strided_slice %50 {offsets = [0, 384], sizes = [2, 128], strides = [1, 1]} : vector<2x512xf32> to vector<2x128xf32>
    %66 = arith.negf %65 : vector<2x128xf32>
    %67 = math.exp %66 : vector<2x128xf32>
    %cst_25 = arith.constant 1.000000e+00 : f32
    %68 = vector.broadcast %cst_25 : f32 to vector<2x128xf32>
    %69 = arith.addf %68, %67 : vector<2x128xf32>
    %70 = arith.divf %68, %69 : vector<2x128xf32>
    %71 = arith.mulf %62, %16 : vector<2x128xf32>
    %72 = arith.mulf %56, %64 : vector<2x128xf32>
    %73 = arith.addf %71, %72 : vector<2x128xf32>
    %74 = math.tanh %73 : vector<2x128xf32>
    %75 = arith.mulf %70, %74 : vector<2x128xf32>
    %c0_i32 = arith.constant 0 : i32
    %76 = vector.broadcast %c0_i32 : i32 to vector<2x1xi32>
    %77 = arith.cmpi eq, %12, %76 : vector<2x1xi32>
    %78 = vector.shape_cast %77 : vector<2x1xi1> to vector<2x1xi1>
    %79 = vector.broadcast %78 : vector<2x1xi1> to vector<2x128xi1>
    %80 = arith.select %79, %75, %17 : vector<2x128xi1>, vector<2x128xf32>
    %81 = vector.extract_strided_slice %8 {offsets = [2, 0], sizes = [2, 512], strides = [1, 1]} : vector<16x512xf32> to vector<2x512xf32>
    %c0_26 = arith.constant 0 : index
    %c0_27 = arith.constant 0 : index
    %82 = vector.load %arg3[%c0_26, %c0_27] : memref<128x512xf32, #tpu.memory_space<vmem>>, vector<128x512xf32>
    %cst_28 = arith.constant dense<0.000000e+00> : vector<2x512xf32>
    %83 = tpu.matmul %46, %82, %cst_28 {dimension_numbers = #tpu.dot_dimension_numbers<[1], [0], [0], [1], [0, 0, 1, 1], [], []>} : vector<2x128xf32>, vector<128x512xf32>, vector<2x512xf32> -> vector<2x512xf32>
    %84 = arith.addf %81, %83 : vector<2x512xf32>
    %85 = vector.extract_strided_slice %84 {offsets = [0, 0], sizes = [2, 128], strides = [1, 1]} : vector<2x512xf32> to vector<2x128xf32>
    %86 = arith.negf %85 : vector<2x128xf32>
    %87 = math.exp %86 : vector<2x128xf32>
    %cst_29 = arith.constant 1.000000e+00 : f32
    %88 = vector.broadcast %cst_29 : f32 to vector<2x128xf32>
    %89 = arith.addf %88, %87 : vector<2x128xf32>
    %90 = arith.divf %88, %89 : vector<2x128xf32>
    %91 = vector.extract_strided_slice %84 {offsets = [0, 128], sizes = [2, 128], strides = [1, 1]} : vector<2x512xf32> to vector<2x128xf32>
    %92 = arith.negf %91 : vector<2x128xf32>
    %93 = math.exp %92 : vector<2x128xf32>
    %cst_30 = arith.constant 1.000000e+00 : f32
    %94 = vector.broadcast %cst_30 : f32 to vector<2x128xf32>
    %95 = arith.addf %94, %93 : vector<2x128xf32>
    %96 = arith.divf %94, %95 : vector<2x128xf32>
    %97 = vector.extract_strided_slice %84 {offsets = [0, 256], sizes = [2, 128], strides = [1, 1]} : vector<2x512xf32> to vector<2x128xf32>
    %98 = math.tanh %97 : vector<2x128xf32>
    %99 = vector.extract_strided_slice %84 {offsets = [0, 384], sizes = [2, 128], strides = [1, 1]} : vector<2x512xf32> to vector<2x128xf32>
    %100 = arith.negf %99 : vector<2x128xf32>
    %101 = math.exp %100 : vector<2x128xf32>
    %cst_31 = arith.constant 1.000000e+00 : f32
    %102 = vector.broadcast %cst_31 : f32 to vector<2x128xf32>
    %103 = arith.addf %102, %101 : vector<2x128xf32>
    %104 = arith.divf %102, %103 : vector<2x128xf32>
    %105 = arith.mulf %96, %44 : vector<2x128xf32>
    %106 = arith.mulf %90, %98 : vector<2x128xf32>
    %107 = arith.addf %105, %106 : vector<2x128xf32>
    %108 = math.tanh %107 : vector<2x128xf32>
    %109 = arith.mulf %104, %108 : vector<2x128xf32>
    %110 = tpu.concatenate %109, %75 in 1 : vector<2x128xf32>, vector<2x128xf32> -> vector<2x256xf32>
    %c0_32 = arith.constant 0 : index
    %c0_33 = arith.constant 0 : index
    %111 = vector.load %arg4[%c0_32, %c0_33] : memref<256x512xf32, #tpu.memory_space<vmem>>, vector<256x512xf32>
    %cst_34 = arith.constant dense<0.000000e+00> : vector<2x512xf32>
    %112 = tpu.matmul %110, %111, %cst_34 {dimension_numbers = #tpu.dot_dimension_numbers<[1], [0], [0], [1], [0, 0, 1, 1], [], []>} : vector<2x256xf32>, vector<256x512xf32>, vector<2x512xf32> -> vector<2x512xf32>
    %113 = arith.addf %11, %112 : vector<2x512xf32>
    %114 = vector.extract_strided_slice %113 {offsets = [0, 0], sizes = [2, 128], strides = [1, 1]} : vector<2x512xf32> to vector<2x128xf32>
    %115 = arith.negf %114 : vector<2x128xf32>
    %116 = math.exp %115 : vector<2x128xf32>
    %cst_35 = arith.constant 1.000000e+00 : f32
    %117 = vector.broadcast %cst_35 : f32 to vector<2x128xf32>
    %118 = arith.addf %117, %116 : vector<2x128xf32>
    %119 = arith.divf %117, %118 : vector<2x128xf32>
    %120 = vector.extract_strided_slice %113 {offsets = [0, 128], sizes = [2, 128], strides = [1, 1]} : vector<2x512xf32> to vector<2x128xf32>
    %121 = arith.negf %120 : vector<2x128xf32>
    %122 = math.exp %121 : vector<2x128xf32>
    %cst_36 = arith.constant 1.000000e+00 : f32
    %123 = vector.broadcast %cst_36 : f32 to vector<2x128xf32>
    %124 = arith.addf %123, %122 : vector<2x128xf32>
    %125 = arith.divf %123, %124 : vector<2x128xf32>
    %126 = vector.extract_strided_slice %113 {offsets = [0, 256], sizes = [2, 128], strides = [1, 1]} : vector<2x512xf32> to vector<2x128xf32>
    %127 = math.tanh %126 : vector<2x128xf32>
    %128 = vector.extract_strided_slice %113 {offsets = [0, 384], sizes = [2, 128], strides = [1, 1]} : vector<2x512xf32> to vector<2x128xf32>
    %129 = arith.negf %128 : vector<2x128xf32>
    %130 = math.exp %129 : vector<2x128xf32>
    %cst_37 = arith.constant 1.000000e+00 : f32
    %131 = vector.broadcast %cst_37 : f32 to vector<2x128xf32>
    %132 = arith.addf %131, %130 : vector<2x128xf32>
    %133 = arith.divf %131, %132 : vector<2x128xf32>
    %134 = arith.mulf %125, %73 : vector<2x128xf32>
    %135 = arith.mulf %119, %127 : vector<2x128xf32>
    %136 = arith.addf %134, %135 : vector<2x128xf32>
    %137 = math.tanh %136 : vector<2x128xf32>
    %138 = arith.mulf %133, %137 : vector<2x128xf32>
    %c1_i32 = arith.constant 1 : i32
    %139 = vector.broadcast %c1_i32 : i32 to vector<2x1xi32>
    %140 = arith.cmpi eq, %12, %139 : vector<2x1xi32>
    %141 = vector.shape_cast %140 : vector<2x1xi1> to vector<2x1xi1>
    %142 = vector.broadcast %141 : vector<2x1xi1> to vector<2x128xi1>
    %143 = arith.select %142, %138, %80 : vector<2x128xi1>, vector<2x128xf32>
    %144 = vector.extract_strided_slice %8 {offsets = [4, 0], sizes = [2, 512], strides = [1, 1]} : vector<16x512xf32> to vector<2x512xf32>
    %c0_38 = arith.constant 0 : index
    %c0_39 = arith.constant 0 : index
    %145 = vector.load %arg3[%c0_38, %c0_39] : memref<128x512xf32, #tpu.memory_space<vmem>>, vector<128x512xf32>
    %cst_40 = arith.constant dense<0.000000e+00> : vector<2x512xf32>
    %146 = tpu.matmul %109, %145, %cst_40 {dimension_numbers = #tpu.dot_dimension_numbers<[1], [0], [0], [1], [0, 0, 1, 1], [], []>} : vector<2x128xf32>, vector<128x512xf32>, vector<2x512xf32> -> vector<2x512xf32>
    %147 = arith.addf %144, %146 : vector<2x512xf32>
    %148 = vector.extract_strided_slice %147 {offsets = [0, 0], sizes = [2, 128], strides = [1, 1]} : vector<2x512xf32> to vector<2x128xf32>
    %149 = arith.negf %148 : vector<2x128xf32>
    %150 = math.exp %149 : vector<2x128xf32>
    %cst_41 = arith.constant 1.000000e+00 : f32
    %151 = vector.broadcast %cst_41 : f32 to vector<2x128xf32>
    %152 = arith.addf %151, %150 : vector<2x128xf32>
    %153 = arith.divf %151, %152 : vector<2x128xf32>
    %154 = vector.extract_strided_slice %147 {offsets = [0, 128], sizes = [2, 128], strides = [1, 1]} : vector<2x512xf32> to vector<2x128xf32>
    %155 = arith.negf %154 : vector<2x128xf32>
    %156 = math.exp %155 : vector<2x128xf32>
    %cst_42 = arith.constant 1.000000e+00 : f32
    %157 = vector.broadcast %cst_42 : f32 to vector<2x128xf32>
    %158 = arith.addf %157, %156 : vector<2x128xf32>
    %159 = arith.divf %157, %158 : vector<2x128xf32>
    %160 = vector.extract_strided_slice %147 {offsets = [0, 256], sizes = [2, 128], strides = [1, 1]} : vector<2x512xf32> to vector<2x128xf32>
    %161 = math.tanh %160 : vector<2x128xf32>
    %162 = vector.extract_strided_slice %147 {offsets = [0, 384], sizes = [2, 128], strides = [1, 1]} : vector<2x512xf32> to vector<2x128xf32>
    %163 = arith.negf %162 : vector<2x128xf32>
    %164 = math.exp %163 : vector<2x128xf32>
    %cst_43 = arith.constant 1.000000e+00 : f32
    %165 = vector.broadcast %cst_43 : f32 to vector<2x128xf32>
    %166 = arith.addf %165, %164 : vector<2x128xf32>
    %167 = arith.divf %165, %166 : vector<2x128xf32>
    %168 = arith.mulf %159, %107 : vector<2x128xf32>
    %169 = arith.mulf %153, %161 : vector<2x128xf32>
    %170 = arith.addf %168, %169 : vector<2x128xf32>
    %171 = math.tanh %170 : vector<2x128xf32>
    %172 = arith.mulf %167, %171 : vector<2x128xf32>
    %173 = tpu.concatenate %172, %138 in 1 : vector<2x128xf32>, vector<2x128xf32> -> vector<2x256xf32>
    %c0_44 = arith.constant 0 : index
    %c0_45 = arith.constant 0 : index
    %174 = vector.load %arg4[%c0_44, %c0_45] : memref<256x512xf32, #tpu.memory_space<vmem>>, vector<256x512xf32>
    %cst_46 = arith.constant dense<0.000000e+00> : vector<2x512xf32>
    %175 = tpu.matmul %173, %174, %cst_46 {dimension_numbers = #tpu.dot_dimension_numbers<[1], [0], [0], [1], [0, 0, 1, 1], [], []>} : vector<2x256xf32>, vector<256x512xf32>, vector<2x512xf32> -> vector<2x512xf32>
    %176 = arith.addf %11, %175 : vector<2x512xf32>
    %177 = vector.extract_strided_slice %176 {offsets = [0, 0], sizes = [2, 128], strides = [1, 1]} : vector<2x512xf32> to vector<2x128xf32>
    %178 = arith.negf %177 : vector<2x128xf32>
    %179 = math.exp %178 : vector<2x128xf32>
    %cst_47 = arith.constant 1.000000e+00 : f32
    %180 = vector.broadcast %cst_47 : f32 to vector<2x128xf32>
    %181 = arith.addf %180, %179 : vector<2x128xf32>
    %182 = arith.divf %180, %181 : vector<2x128xf32>
    %183 = vector.extract_strided_slice %176 {offsets = [0, 128], sizes = [2, 128], strides = [1, 1]} : vector<2x512xf32> to vector<2x128xf32>
    %184 = arith.negf %183 : vector<2x128xf32>
    %185 = math.exp %184 : vector<2x128xf32>
    %cst_48 = arith.constant 1.000000e+00 : f32
    %186 = vector.broadcast %cst_48 : f32 to vector<2x128xf32>
    %187 = arith.addf %186, %185 : vector<2x128xf32>
    %188 = arith.divf %186, %187 : vector<2x128xf32>
    %189 = vector.extract_strided_slice %176 {offsets = [0, 256], sizes = [2, 128], strides = [1, 1]} : vector<2x512xf32> to vector<2x128xf32>
    %190 = math.tanh %189 : vector<2x128xf32>
    %191 = vector.extract_strided_slice %176 {offsets = [0, 384], sizes = [2, 128], strides = [1, 1]} : vector<2x512xf32> to vector<2x128xf32>
    %192 = arith.negf %191 : vector<2x128xf32>
    %193 = math.exp %192 : vector<2x128xf32>
    %cst_49 = arith.constant 1.000000e+00 : f32
    %194 = vector.broadcast %cst_49 : f32 to vector<2x128xf32>
    %195 = arith.addf %194, %193 : vector<2x128xf32>
    %196 = arith.divf %194, %195 : vector<2x128xf32>
    %197 = arith.mulf %188, %136 : vector<2x128xf32>
    %198 = arith.mulf %182, %190 : vector<2x128xf32>
    %199 = arith.addf %197, %198 : vector<2x128xf32>
    %200 = math.tanh %199 : vector<2x128xf32>
    %201 = arith.mulf %196, %200 : vector<2x128xf32>
    %c2_i32 = arith.constant 2 : i32
    %202 = vector.broadcast %c2_i32 : i32 to vector<2x1xi32>
    %203 = arith.cmpi eq, %12, %202 : vector<2x1xi32>
    %204 = vector.shape_cast %203 : vector<2x1xi1> to vector<2x1xi1>
    %205 = vector.broadcast %204 : vector<2x1xi1> to vector<2x128xi1>
    %206 = arith.select %205, %201, %143 : vector<2x128xi1>, vector<2x128xf32>
    %207 = vector.extract_strided_slice %8 {offsets = [6, 0], sizes = [2, 512], strides = [1, 1]} : vector<16x512xf32> to vector<2x512xf32>
    %c0_50 = arith.constant 0 : index
    %c0_51 = arith.constant 0 : index
    %208 = vector.load %arg3[%c0_50, %c0_51] : memref<128x512xf32, #tpu.memory_space<vmem>>, vector<128x512xf32>
    %cst_52 = arith.constant dense<0.000000e+00> : vector<2x512xf32>
    %209 = tpu.matmul %172, %208, %cst_52 {dimension_numbers = #tpu.dot_dimension_numbers<[1], [0], [0], [1], [0, 0, 1, 1], [], []>} : vector<2x128xf32>, vector<128x512xf32>, vector<2x512xf32> -> vector<2x512xf32>
    %210 = arith.addf %207, %209 : vector<2x512xf32>
    %211 = vector.extract_strided_slice %210 {offsets = [0, 0], sizes = [2, 128], strides = [1, 1]} : vector<2x512xf32> to vector<2x128xf32>
    %212 = arith.negf %211 : vector<2x128xf32>
    %213 = math.exp %212 : vector<2x128xf32>
    %cst_53 = arith.constant 1.000000e+00 : f32
    %214 = vector.broadcast %cst_53 : f32 to vector<2x128xf32>
    %215 = arith.addf %214, %213 : vector<2x128xf32>
    %216 = arith.divf %214, %215 : vector<2x128xf32>
    %217 = vector.extract_strided_slice %210 {offsets = [0, 128], sizes = [2, 128], strides = [1, 1]} : vector<2x512xf32> to vector<2x128xf32>
    %218 = arith.negf %217 : vector<2x128xf32>
    %219 = math.exp %218 : vector<2x128xf32>
    %cst_54 = arith.constant 1.000000e+00 : f32
    %220 = vector.broadcast %cst_54 : f32 to vector<2x128xf32>
    %221 = arith.addf %220, %219 : vector<2x128xf32>
    %222 = arith.divf %220, %221 : vector<2x128xf32>
    %223 = vector.extract_strided_slice %210 {offsets = [0, 256], sizes = [2, 128], strides = [1, 1]} : vector<2x512xf32> to vector<2x128xf32>
    %224 = math.tanh %223 : vector<2x128xf32>
    %225 = vector.extract_strided_slice %210 {offsets = [0, 384], sizes = [2, 128], strides = [1, 1]} : vector<2x512xf32> to vector<2x128xf32>
    %226 = arith.negf %225 : vector<2x128xf32>
    %227 = math.exp %226 : vector<2x128xf32>
    %cst_55 = arith.constant 1.000000e+00 : f32
    %228 = vector.broadcast %cst_55 : f32 to vector<2x128xf32>
    %229 = arith.addf %228, %227 : vector<2x128xf32>
    %230 = arith.divf %228, %229 : vector<2x128xf32>
    %231 = arith.mulf %222, %170 : vector<2x128xf32>
    %232 = arith.mulf %216, %224 : vector<2x128xf32>
    %233 = arith.addf %231, %232 : vector<2x128xf32>
    %234 = math.tanh %233 : vector<2x128xf32>
    %235 = arith.mulf %230, %234 : vector<2x128xf32>
    %236 = tpu.concatenate %235, %201 in 1 : vector<2x128xf32>, vector<2x128xf32> -> vector<2x256xf32>
    %c0_56 = arith.constant 0 : index
    %c0_57 = arith.constant 0 : index
    %237 = vector.load %arg4[%c0_56, %c0_57] : memref<256x512xf32, #tpu.memory_space<vmem>>, vector<256x512xf32>
    %cst_58 = arith.constant dense<0.000000e+00> : vector<2x512xf32>
    %238 = tpu.matmul %236, %237, %cst_58 {dimension_numbers = #tpu.dot_dimension_numbers<[1], [0], [0], [1], [0, 0, 1, 1], [], []>} : vector<2x256xf32>, vector<256x512xf32>, vector<2x512xf32> -> vector<2x512xf32>
    %239 = arith.addf %11, %238 : vector<2x512xf32>
    %240 = vector.extract_strided_slice %239 {offsets = [0, 0], sizes = [2, 128], strides = [1, 1]} : vector<2x512xf32> to vector<2x128xf32>
    %241 = arith.negf %240 : vector<2x128xf32>
    %242 = math.exp %241 : vector<2x128xf32>
    %cst_59 = arith.constant 1.000000e+00 : f32
    %243 = vector.broadcast %cst_59 : f32 to vector<2x128xf32>
    %244 = arith.addf %243, %242 : vector<2x128xf32>
    %245 = arith.divf %243, %244 : vector<2x128xf32>
    %246 = vector.extract_strided_slice %239 {offsets = [0, 128], sizes = [2, 128], strides = [1, 1]} : vector<2x512xf32> to vector<2x128xf32>
    %247 = arith.negf %246 : vector<2x128xf32>
    %248 = math.exp %247 : vector<2x128xf32>
    %cst_60 = arith.constant 1.000000e+00 : f32
    %249 = vector.broadcast %cst_60 : f32 to vector<2x128xf32>
    %250 = arith.addf %249, %248 : vector<2x128xf32>
    %251 = arith.divf %249, %250 : vector<2x128xf32>
    %252 = vector.extract_strided_slice %239 {offsets = [0, 256], sizes = [2, 128], strides = [1, 1]} : vector<2x512xf32> to vector<2x128xf32>
    %253 = math.tanh %252 : vector<2x128xf32>
    %254 = vector.extract_strided_slice %239 {offsets = [0, 384], sizes = [2, 128], strides = [1, 1]} : vector<2x512xf32> to vector<2x128xf32>
    %255 = arith.negf %254 : vector<2x128xf32>
    %256 = math.exp %255 : vector<2x128xf32>
    %cst_61 = arith.constant 1.000000e+00 : f32
    %257 = vector.broadcast %cst_61 : f32 to vector<2x128xf32>
    %258 = arith.addf %257, %256 : vector<2x128xf32>
    %259 = arith.divf %257, %258 : vector<2x128xf32>
    %260 = arith.mulf %251, %199 : vector<2x128xf32>
    %261 = arith.mulf %245, %253 : vector<2x128xf32>
    %262 = arith.addf %260, %261 : vector<2x128xf32>
    %263 = math.tanh %262 : vector<2x128xf32>
    %264 = arith.mulf %259, %263 : vector<2x128xf32>
    %c3_i32 = arith.constant 3 : i32
    %265 = vector.broadcast %c3_i32 : i32 to vector<2x1xi32>
    %266 = arith.cmpi eq, %12, %265 : vector<2x1xi32>
    %267 = vector.shape_cast %266 : vector<2x1xi1> to vector<2x1xi1>
    %268 = vector.broadcast %267 : vector<2x1xi1> to vector<2x128xi1>
    %269 = arith.select %268, %264, %206 : vector<2x128xi1>, vector<2x128xf32>
    %270 = vector.extract_strided_slice %8 {offsets = [8, 0], sizes = [2, 512], strides = [1, 1]} : vector<16x512xf32> to vector<2x512xf32>
    %c0_62 = arith.constant 0 : index
    %c0_63 = arith.constant 0 : index
    %271 = vector.load %arg3[%c0_62, %c0_63] : memref<128x512xf32, #tpu.memory_space<vmem>>, vector<128x512xf32>
    %cst_64 = arith.constant dense<0.000000e+00> : vector<2x512xf32>
    %272 = tpu.matmul %235, %271, %cst_64 {dimension_numbers = #tpu.dot_dimension_numbers<[1], [0], [0], [1], [0, 0, 1, 1], [], []>} : vector<2x128xf32>, vector<128x512xf32>, vector<2x512xf32> -> vector<2x512xf32>
    %273 = arith.addf %270, %272 : vector<2x512xf32>
    %274 = vector.extract_strided_slice %273 {offsets = [0, 0], sizes = [2, 128], strides = [1, 1]} : vector<2x512xf32> to vector<2x128xf32>
    %275 = arith.negf %274 : vector<2x128xf32>
    %276 = math.exp %275 : vector<2x128xf32>
    %cst_65 = arith.constant 1.000000e+00 : f32
    %277 = vector.broadcast %cst_65 : f32 to vector<2x128xf32>
    %278 = arith.addf %277, %276 : vector<2x128xf32>
    %279 = arith.divf %277, %278 : vector<2x128xf32>
    %280 = vector.extract_strided_slice %273 {offsets = [0, 128], sizes = [2, 128], strides = [1, 1]} : vector<2x512xf32> to vector<2x128xf32>
    %281 = arith.negf %280 : vector<2x128xf32>
    %282 = math.exp %281 : vector<2x128xf32>
    %cst_66 = arith.constant 1.000000e+00 : f32
    %283 = vector.broadcast %cst_66 : f32 to vector<2x128xf32>
    %284 = arith.addf %283, %282 : vector<2x128xf32>
    %285 = arith.divf %283, %284 : vector<2x128xf32>
    %286 = vector.extract_strided_slice %273 {offsets = [0, 256], sizes = [2, 128], strides = [1, 1]} : vector<2x512xf32> to vector<2x128xf32>
    %287 = math.tanh %286 : vector<2x128xf32>
    %288 = vector.extract_strided_slice %273 {offsets = [0, 384], sizes = [2, 128], strides = [1, 1]} : vector<2x512xf32> to vector<2x128xf32>
    %289 = arith.negf %288 : vector<2x128xf32>
    %290 = math.exp %289 : vector<2x128xf32>
    %cst_67 = arith.constant 1.000000e+00 : f32
    %291 = vector.broadcast %cst_67 : f32 to vector<2x128xf32>
    %292 = arith.addf %291, %290 : vector<2x128xf32>
    %293 = arith.divf %291, %292 : vector<2x128xf32>
    %294 = arith.mulf %285, %233 : vector<2x128xf32>
    %295 = arith.mulf %279, %287 : vector<2x128xf32>
    %296 = arith.addf %294, %295 : vector<2x128xf32>
    %297 = math.tanh %296 : vector<2x128xf32>
    %298 = arith.mulf %293, %297 : vector<2x128xf32>
    %299 = tpu.concatenate %298, %264 in 1 : vector<2x128xf32>, vector<2x128xf32> -> vector<2x256xf32>
    %c0_68 = arith.constant 0 : index
    %c0_69 = arith.constant 0 : index
    %300 = vector.load %arg4[%c0_68, %c0_69] : memref<256x512xf32, #tpu.memory_space<vmem>>, vector<256x512xf32>
    %cst_70 = arith.constant dense<0.000000e+00> : vector<2x512xf32>
    %301 = tpu.matmul %299, %300, %cst_70 {dimension_numbers = #tpu.dot_dimension_numbers<[1], [0], [0], [1], [0, 0, 1, 1], [], []>} : vector<2x256xf32>, vector<256x512xf32>, vector<2x512xf32> -> vector<2x512xf32>
    %302 = arith.addf %11, %301 : vector<2x512xf32>
    %303 = vector.extract_strided_slice %302 {offsets = [0, 0], sizes = [2, 128], strides = [1, 1]} : vector<2x512xf32> to vector<2x128xf32>
    %304 = arith.negf %303 : vector<2x128xf32>
    %305 = math.exp %304 : vector<2x128xf32>
    %cst_71 = arith.constant 1.000000e+00 : f32
    %306 = vector.broadcast %cst_71 : f32 to vector<2x128xf32>
    %307 = arith.addf %306, %305 : vector<2x128xf32>
    %308 = arith.divf %306, %307 : vector<2x128xf32>
    %309 = vector.extract_strided_slice %302 {offsets = [0, 128], sizes = [2, 128], strides = [1, 1]} : vector<2x512xf32> to vector<2x128xf32>
    %310 = arith.negf %309 : vector<2x128xf32>
    %311 = math.exp %310 : vector<2x128xf32>
    %cst_72 = arith.constant 1.000000e+00 : f32
    %312 = vector.broadcast %cst_72 : f32 to vector<2x128xf32>
    %313 = arith.addf %312, %311 : vector<2x128xf32>
    %314 = arith.divf %312, %313 : vector<2x128xf32>
    %315 = vector.extract_strided_slice %302 {offsets = [0, 256], sizes = [2, 128], strides = [1, 1]} : vector<2x512xf32> to vector<2x128xf32>
    %316 = math.tanh %315 : vector<2x128xf32>
    %317 = vector.extract_strided_slice %302 {offsets = [0, 384], sizes = [2, 128], strides = [1, 1]} : vector<2x512xf32> to vector<2x128xf32>
    %318 = arith.negf %317 : vector<2x128xf32>
    %319 = math.exp %318 : vector<2x128xf32>
    %cst_73 = arith.constant 1.000000e+00 : f32
    %320 = vector.broadcast %cst_73 : f32 to vector<2x128xf32>
    %321 = arith.addf %320, %319 : vector<2x128xf32>
    %322 = arith.divf %320, %321 : vector<2x128xf32>
    %323 = arith.mulf %314, %262 : vector<2x128xf32>
    %324 = arith.mulf %308, %316 : vector<2x128xf32>
    %325 = arith.addf %323, %324 : vector<2x128xf32>
    %326 = math.tanh %325 : vector<2x128xf32>
    %327 = arith.mulf %322, %326 : vector<2x128xf32>
    %c4_i32 = arith.constant 4 : i32
    %328 = vector.broadcast %c4_i32 : i32 to vector<2x1xi32>
    %329 = arith.cmpi eq, %12, %328 : vector<2x1xi32>
    %330 = vector.shape_cast %329 : vector<2x1xi1> to vector<2x1xi1>
    %331 = vector.broadcast %330 : vector<2x1xi1> to vector<2x128xi1>
    %332 = arith.select %331, %327, %269 : vector<2x128xi1>, vector<2x128xf32>
    %333 = vector.extract_strided_slice %8 {offsets = [10, 0], sizes = [2, 512], strides = [1, 1]} : vector<16x512xf32> to vector<2x512xf32>
    %c0_74 = arith.constant 0 : index
    %c0_75 = arith.constant 0 : index
    %334 = vector.load %arg3[%c0_74, %c0_75] : memref<128x512xf32, #tpu.memory_space<vmem>>, vector<128x512xf32>
    %cst_76 = arith.constant dense<0.000000e+00> : vector<2x512xf32>
    %335 = tpu.matmul %298, %334, %cst_76 {dimension_numbers = #tpu.dot_dimension_numbers<[1], [0], [0], [1], [0, 0, 1, 1], [], []>} : vector<2x128xf32>, vector<128x512xf32>, vector<2x512xf32> -> vector<2x512xf32>
    %336 = arith.addf %333, %335 : vector<2x512xf32>
    %337 = vector.extract_strided_slice %336 {offsets = [0, 0], sizes = [2, 128], strides = [1, 1]} : vector<2x512xf32> to vector<2x128xf32>
    %338 = arith.negf %337 : vector<2x128xf32>
    %339 = math.exp %338 : vector<2x128xf32>
    %cst_77 = arith.constant 1.000000e+00 : f32
    %340 = vector.broadcast %cst_77 : f32 to vector<2x128xf32>
    %341 = arith.addf %340, %339 : vector<2x128xf32>
    %342 = arith.divf %340, %341 : vector<2x128xf32>
    %343 = vector.extract_strided_slice %336 {offsets = [0, 128], sizes = [2, 128], strides = [1, 1]} : vector<2x512xf32> to vector<2x128xf32>
    %344 = arith.negf %343 : vector<2x128xf32>
    %345 = math.exp %344 : vector<2x128xf32>
    %cst_78 = arith.constant 1.000000e+00 : f32
    %346 = vector.broadcast %cst_78 : f32 to vector<2x128xf32>
    %347 = arith.addf %346, %345 : vector<2x128xf32>
    %348 = arith.divf %346, %347 : vector<2x128xf32>
    %349 = vector.extract_strided_slice %336 {offsets = [0, 256], sizes = [2, 128], strides = [1, 1]} : vector<2x512xf32> to vector<2x128xf32>
    %350 = math.tanh %349 : vector<2x128xf32>
    %351 = vector.extract_strided_slice %336 {offsets = [0, 384], sizes = [2, 128], strides = [1, 1]} : vector<2x512xf32> to vector<2x128xf32>
    %352 = arith.negf %351 : vector<2x128xf32>
    %353 = math.exp %352 : vector<2x128xf32>
    %cst_79 = arith.constant 1.000000e+00 : f32
    %354 = vector.broadcast %cst_79 : f32 to vector<2x128xf32>
    %355 = arith.addf %354, %353 : vector<2x128xf32>
    %356 = arith.divf %354, %355 : vector<2x128xf32>
    %357 = arith.mulf %348, %296 : vector<2x128xf32>
    %358 = arith.mulf %342, %350 : vector<2x128xf32>
    %359 = arith.addf %357, %358 : vector<2x128xf32>
    %360 = math.tanh %359 : vector<2x128xf32>
    %361 = arith.mulf %356, %360 : vector<2x128xf32>
    %362 = tpu.concatenate %361, %327 in 1 : vector<2x128xf32>, vector<2x128xf32> -> vector<2x256xf32>
    %c0_80 = arith.constant 0 : index
    %c0_81 = arith.constant 0 : index
    %363 = vector.load %arg4[%c0_80, %c0_81] : memref<256x512xf32, #tpu.memory_space<vmem>>, vector<256x512xf32>
    %cst_82 = arith.constant dense<0.000000e+00> : vector<2x512xf32>
    %364 = tpu.matmul %362, %363, %cst_82 {dimension_numbers = #tpu.dot_dimension_numbers<[1], [0], [0], [1], [0, 0, 1, 1], [], []>} : vector<2x256xf32>, vector<256x512xf32>, vector<2x512xf32> -> vector<2x512xf32>
    %365 = arith.addf %11, %364 : vector<2x512xf32>
    %366 = vector.extract_strided_slice %365 {offsets = [0, 0], sizes = [2, 128], strides = [1, 1]} : vector<2x512xf32> to vector<2x128xf32>
    %367 = arith.negf %366 : vector<2x128xf32>
    %368 = math.exp %367 : vector<2x128xf32>
    %cst_83 = arith.constant 1.000000e+00 : f32
    %369 = vector.broadcast %cst_83 : f32 to vector<2x128xf32>
    %370 = arith.addf %369, %368 : vector<2x128xf32>
    %371 = arith.divf %369, %370 : vector<2x128xf32>
    %372 = vector.extract_strided_slice %365 {offsets = [0, 128], sizes = [2, 128], strides = [1, 1]} : vector<2x512xf32> to vector<2x128xf32>
    %373 = arith.negf %372 : vector<2x128xf32>
    %374 = math.exp %373 : vector<2x128xf32>
    %cst_84 = arith.constant 1.000000e+00 : f32
    %375 = vector.broadcast %cst_84 : f32 to vector<2x128xf32>
    %376 = arith.addf %375, %374 : vector<2x128xf32>
    %377 = arith.divf %375, %376 : vector<2x128xf32>
    %378 = vector.extract_strided_slice %365 {offsets = [0, 256], sizes = [2, 128], strides = [1, 1]} : vector<2x512xf32> to vector<2x128xf32>
    %379 = math.tanh %378 : vector<2x128xf32>
    %380 = vector.extract_strided_slice %365 {offsets = [0, 384], sizes = [2, 128], strides = [1, 1]} : vector<2x512xf32> to vector<2x128xf32>
    %381 = arith.negf %380 : vector<2x128xf32>
    %382 = math.exp %381 : vector<2x128xf32>
    %cst_85 = arith.constant 1.000000e+00 : f32
    %383 = vector.broadcast %cst_85 : f32 to vector<2x128xf32>
    %384 = arith.addf %383, %382 : vector<2x128xf32>
    %385 = arith.divf %383, %384 : vector<2x128xf32>
    %386 = arith.mulf %377, %325 : vector<2x128xf32>
    %387 = arith.mulf %371, %379 : vector<2x128xf32>
    %388 = arith.addf %386, %387 : vector<2x128xf32>
    %389 = math.tanh %388 : vector<2x128xf32>
    %390 = arith.mulf %385, %389 : vector<2x128xf32>
    %c5_i32 = arith.constant 5 : i32
    %391 = vector.broadcast %c5_i32 : i32 to vector<2x1xi32>
    %392 = arith.cmpi eq, %12, %391 : vector<2x1xi32>
    %393 = vector.shape_cast %392 : vector<2x1xi1> to vector<2x1xi1>
    %394 = vector.broadcast %393 : vector<2x1xi1> to vector<2x128xi1>
    %395 = arith.select %394, %390, %332 : vector<2x128xi1>, vector<2x128xf32>
    %396 = vector.extract_strided_slice %8 {offsets = [12, 0], sizes = [2, 512], strides = [1, 1]} : vector<16x512xf32> to vector<2x512xf32>
    %c0_86 = arith.constant 0 : index
    %c0_87 = arith.constant 0 : index
    %397 = vector.load %arg3[%c0_86, %c0_87] : memref<128x512xf32, #tpu.memory_space<vmem>>, vector<128x512xf32>
    %cst_88 = arith.constant dense<0.000000e+00> : vector<2x512xf32>
    %398 = tpu.matmul %361, %397, %cst_88 {dimension_numbers = #tpu.dot_dimension_numbers<[1], [0], [0], [1], [0, 0, 1, 1], [], []>} : vector<2x128xf32>, vector<128x512xf32>, vector<2x512xf32> -> vector<2x512xf32>
    %399 = arith.addf %396, %398 : vector<2x512xf32>
    %400 = vector.extract_strided_slice %399 {offsets = [0, 0], sizes = [2, 128], strides = [1, 1]} : vector<2x512xf32> to vector<2x128xf32>
    %401 = arith.negf %400 : vector<2x128xf32>
    %402 = math.exp %401 : vector<2x128xf32>
    %cst_89 = arith.constant 1.000000e+00 : f32
    %403 = vector.broadcast %cst_89 : f32 to vector<2x128xf32>
    %404 = arith.addf %403, %402 : vector<2x128xf32>
    %405 = arith.divf %403, %404 : vector<2x128xf32>
    %406 = vector.extract_strided_slice %399 {offsets = [0, 128], sizes = [2, 128], strides = [1, 1]} : vector<2x512xf32> to vector<2x128xf32>
    %407 = arith.negf %406 : vector<2x128xf32>
    %408 = math.exp %407 : vector<2x128xf32>
    %cst_90 = arith.constant 1.000000e+00 : f32
    %409 = vector.broadcast %cst_90 : f32 to vector<2x128xf32>
    %410 = arith.addf %409, %408 : vector<2x128xf32>
    %411 = arith.divf %409, %410 : vector<2x128xf32>
    %412 = vector.extract_strided_slice %399 {offsets = [0, 256], sizes = [2, 128], strides = [1, 1]} : vector<2x512xf32> to vector<2x128xf32>
    %413 = math.tanh %412 : vector<2x128xf32>
    %414 = vector.extract_strided_slice %399 {offsets = [0, 384], sizes = [2, 128], strides = [1, 1]} : vector<2x512xf32> to vector<2x128xf32>
    %415 = arith.negf %414 : vector<2x128xf32>
    %416 = math.exp %415 : vector<2x128xf32>
    %cst_91 = arith.constant 1.000000e+00 : f32
    %417 = vector.broadcast %cst_91 : f32 to vector<2x128xf32>
    %418 = arith.addf %417, %416 : vector<2x128xf32>
    %419 = arith.divf %417, %418 : vector<2x128xf32>
    %420 = arith.mulf %411, %359 : vector<2x128xf32>
    %421 = arith.mulf %405, %413 : vector<2x128xf32>
    %422 = arith.addf %420, %421 : vector<2x128xf32>
    %423 = math.tanh %422 : vector<2x128xf32>
    %424 = arith.mulf %419, %423 : vector<2x128xf32>
    %425 = tpu.concatenate %424, %390 in 1 : vector<2x128xf32>, vector<2x128xf32> -> vector<2x256xf32>
    %c0_92 = arith.constant 0 : index
    %c0_93 = arith.constant 0 : index
    %426 = vector.load %arg4[%c0_92, %c0_93] : memref<256x512xf32, #tpu.memory_space<vmem>>, vector<256x512xf32>
    %cst_94 = arith.constant dense<0.000000e+00> : vector<2x512xf32>
    %427 = tpu.matmul %425, %426, %cst_94 {dimension_numbers = #tpu.dot_dimension_numbers<[1], [0], [0], [1], [0, 0, 1, 1], [], []>} : vector<2x256xf32>, vector<256x512xf32>, vector<2x512xf32> -> vector<2x512xf32>
    %428 = arith.addf %11, %427 : vector<2x512xf32>
    %429 = vector.extract_strided_slice %428 {offsets = [0, 0], sizes = [2, 128], strides = [1, 1]} : vector<2x512xf32> to vector<2x128xf32>
    %430 = arith.negf %429 : vector<2x128xf32>
    %431 = math.exp %430 : vector<2x128xf32>
    %cst_95 = arith.constant 1.000000e+00 : f32
    %432 = vector.broadcast %cst_95 : f32 to vector<2x128xf32>
    %433 = arith.addf %432, %431 : vector<2x128xf32>
    %434 = arith.divf %432, %433 : vector<2x128xf32>
    %435 = vector.extract_strided_slice %428 {offsets = [0, 128], sizes = [2, 128], strides = [1, 1]} : vector<2x512xf32> to vector<2x128xf32>
    %436 = arith.negf %435 : vector<2x128xf32>
    %437 = math.exp %436 : vector<2x128xf32>
    %cst_96 = arith.constant 1.000000e+00 : f32
    %438 = vector.broadcast %cst_96 : f32 to vector<2x128xf32>
    %439 = arith.addf %438, %437 : vector<2x128xf32>
    %440 = arith.divf %438, %439 : vector<2x128xf32>
    %441 = vector.extract_strided_slice %428 {offsets = [0, 256], sizes = [2, 128], strides = [1, 1]} : vector<2x512xf32> to vector<2x128xf32>
    %442 = math.tanh %441 : vector<2x128xf32>
    %443 = vector.extract_strided_slice %428 {offsets = [0, 384], sizes = [2, 128], strides = [1, 1]} : vector<2x512xf32> to vector<2x128xf32>
    %444 = arith.negf %443 : vector<2x128xf32>
    %445 = math.exp %444 : vector<2x128xf32>
    %cst_97 = arith.constant 1.000000e+00 : f32
    %446 = vector.broadcast %cst_97 : f32 to vector<2x128xf32>
    %447 = arith.addf %446, %445 : vector<2x128xf32>
    %448 = arith.divf %446, %447 : vector<2x128xf32>
    %449 = arith.mulf %440, %388 : vector<2x128xf32>
    %450 = arith.mulf %434, %442 : vector<2x128xf32>
    %451 = arith.addf %449, %450 : vector<2x128xf32>
    %452 = math.tanh %451 : vector<2x128xf32>
    %453 = arith.mulf %448, %452 : vector<2x128xf32>
    %c6_i32 = arith.constant 6 : i32
    %454 = vector.broadcast %c6_i32 : i32 to vector<2x1xi32>
    %455 = arith.cmpi eq, %12, %454 : vector<2x1xi32>
    %456 = vector.shape_cast %455 : vector<2x1xi1> to vector<2x1xi1>
    %457 = vector.broadcast %456 : vector<2x1xi1> to vector<2x128xi1>
    %458 = arith.select %457, %453, %395 : vector<2x128xi1>, vector<2x128xf32>
    %459 = vector.extract_strided_slice %8 {offsets = [14, 0], sizes = [2, 512], strides = [1, 1]} : vector<16x512xf32> to vector<2x512xf32>
    %c0_98 = arith.constant 0 : index
    %c0_99 = arith.constant 0 : index
    %460 = vector.load %arg3[%c0_98, %c0_99] : memref<128x512xf32, #tpu.memory_space<vmem>>, vector<128x512xf32>
    %cst_100 = arith.constant dense<0.000000e+00> : vector<2x512xf32>
    %461 = tpu.matmul %424, %460, %cst_100 {dimension_numbers = #tpu.dot_dimension_numbers<[1], [0], [0], [1], [0, 0, 1, 1], [], []>} : vector<2x128xf32>, vector<128x512xf32>, vector<2x512xf32> -> vector<2x512xf32>
    %462 = arith.addf %459, %461 : vector<2x512xf32>
    %463 = vector.extract_strided_slice %462 {offsets = [0, 0], sizes = [2, 128], strides = [1, 1]} : vector<2x512xf32> to vector<2x128xf32>
    %464 = arith.negf %463 : vector<2x128xf32>
    %465 = math.exp %464 : vector<2x128xf32>
    %cst_101 = arith.constant 1.000000e+00 : f32
    %466 = vector.broadcast %cst_101 : f32 to vector<2x128xf32>
    %467 = arith.addf %466, %465 : vector<2x128xf32>
    %468 = arith.divf %466, %467 : vector<2x128xf32>
    %469 = vector.extract_strided_slice %462 {offsets = [0, 128], sizes = [2, 128], strides = [1, 1]} : vector<2x512xf32> to vector<2x128xf32>
    %470 = arith.negf %469 : vector<2x128xf32>
    %471 = math.exp %470 : vector<2x128xf32>
    %cst_102 = arith.constant 1.000000e+00 : f32
    %472 = vector.broadcast %cst_102 : f32 to vector<2x128xf32>
    %473 = arith.addf %472, %471 : vector<2x128xf32>
    %474 = arith.divf %472, %473 : vector<2x128xf32>
    %475 = vector.extract_strided_slice %462 {offsets = [0, 256], sizes = [2, 128], strides = [1, 1]} : vector<2x512xf32> to vector<2x128xf32>
    %476 = math.tanh %475 : vector<2x128xf32>
    %477 = vector.extract_strided_slice %462 {offsets = [0, 384], sizes = [2, 128], strides = [1, 1]} : vector<2x512xf32> to vector<2x128xf32>
    %478 = arith.negf %477 : vector<2x128xf32>
    %479 = math.exp %478 : vector<2x128xf32>
    %cst_103 = arith.constant 1.000000e+00 : f32
    %480 = vector.broadcast %cst_103 : f32 to vector<2x128xf32>
    %481 = arith.addf %480, %479 : vector<2x128xf32>
    %482 = arith.divf %480, %481 : vector<2x128xf32>
    %483 = arith.mulf %474, %422 : vector<2x128xf32>
    %484 = arith.mulf %468, %476 : vector<2x128xf32>
    %485 = arith.addf %483, %484 : vector<2x128xf32>
    %486 = math.tanh %485 : vector<2x128xf32>
    %487 = arith.mulf %482, %486 : vector<2x128xf32>
    %488 = tpu.concatenate %487, %453 in 1 : vector<2x128xf32>, vector<2x128xf32> -> vector<2x256xf32>
    %c0_104 = arith.constant 0 : index
    %c0_105 = arith.constant 0 : index
    %489 = vector.load %arg4[%c0_104, %c0_105] : memref<256x512xf32, #tpu.memory_space<vmem>>, vector<256x512xf32>
    %cst_106 = arith.constant dense<0.000000e+00> : vector<2x512xf32>
    %490 = tpu.matmul %488, %489, %cst_106 {dimension_numbers = #tpu.dot_dimension_numbers<[1], [0], [0], [1], [0, 0, 1, 1], [], []>} : vector<2x256xf32>, vector<256x512xf32>, vector<2x512xf32> -> vector<2x512xf32>
    %491 = arith.addf %11, %490 : vector<2x512xf32>
    %492 = vector.extract_strided_slice %491 {offsets = [0, 0], sizes = [2, 128], strides = [1, 1]} : vector<2x512xf32> to vector<2x128xf32>
    %493 = arith.negf %492 : vector<2x128xf32>
    %494 = math.exp %493 : vector<2x128xf32>
    %cst_107 = arith.constant 1.000000e+00 : f32
    %495 = vector.broadcast %cst_107 : f32 to vector<2x128xf32>
    %496 = arith.addf %495, %494 : vector<2x128xf32>
    %497 = arith.divf %495, %496 : vector<2x128xf32>
    %498 = vector.extract_strided_slice %491 {offsets = [0, 128], sizes = [2, 128], strides = [1, 1]} : vector<2x512xf32> to vector<2x128xf32>
    %499 = arith.negf %498 : vector<2x128xf32>
    %500 = math.exp %499 : vector<2x128xf32>
    %cst_108 = arith.constant 1.000000e+00 : f32
    %501 = vector.broadcast %cst_108 : f32 to vector<2x128xf32>
    %502 = arith.addf %501, %500 : vector<2x128xf32>
    %503 = arith.divf %501, %502 : vector<2x128xf32>
    %504 = vector.extract_strided_slice %491 {offsets = [0, 256], sizes = [2, 128], strides = [1, 1]} : vector<2x512xf32> to vector<2x128xf32>
    %505 = math.tanh %504 : vector<2x128xf32>
    %506 = vector.extract_strided_slice %491 {offsets = [0, 384], sizes = [2, 128], strides = [1, 1]} : vector<2x512xf32> to vector<2x128xf32>
    %507 = arith.negf %506 : vector<2x128xf32>
    %508 = math.exp %507 : vector<2x128xf32>
    %cst_109 = arith.constant 1.000000e+00 : f32
    %509 = vector.broadcast %cst_109 : f32 to vector<2x128xf32>
    %510 = arith.addf %509, %508 : vector<2x128xf32>
    %511 = arith.divf %509, %510 : vector<2x128xf32>
    %512 = arith.mulf %503, %451 : vector<2x128xf32>
    %513 = arith.mulf %497, %505 : vector<2x128xf32>
    %514 = arith.addf %512, %513 : vector<2x128xf32>
    %515 = math.tanh %514 : vector<2x128xf32>
    %516 = arith.mulf %511, %515 : vector<2x128xf32>
    %c7_i32 = arith.constant 7 : i32
    %517 = vector.broadcast %c7_i32 : i32 to vector<2x1xi32>
    %518 = arith.cmpi eq, %12, %517 : vector<2x1xi32>
    %519 = vector.shape_cast %518 : vector<2x1xi1> to vector<2x1xi1>
    %520 = vector.broadcast %519 : vector<2x1xi1> to vector<2x128xi1>
    %521 = arith.select %520, %516, %458 : vector<2x128xi1>, vector<2x128xf32>
    %522 = vector.extract_strided_slice %521 {offsets = [0, 0], sizes = [2, 64], strides = [1, 1]} : vector<2x128xf32> to vector<2x64xf32>
    %c0_110 = arith.constant 0 : index
    %c0_111 = arith.constant 0 : index
    %523 = vector.load %arg6[%c0_110, %c0_111] : memref<2x64xf32, #tpu.memory_space<vmem>>, vector<2x64xf32>
    tpu.vector_store %arg6[%c0_110, %c0_111], %522 {strides = array<i32>} : memref<2x64xf32, #tpu.memory_space<vmem>>, vector<2x64xf32>,
    return
  }
}

</mosaic_0001>

<bundles_post_ra>
// kernel: tpu_custom_call.1
= control target key start
LH: loop header
LB: loop body
LE: loop exit
PB: predicated region body
PF: predicated region fallthrough
CT: control target
= control target key end

     0   :  { %11 = vsyncpa [#allocation3], 0  ;;  %s6657_s0 = inlined_call_operand.vmem [shape: s32[16,1], index: 0, kind: input, shape index: {}]   ;;  %s6658_s1 = inlined_call_operand.vmem [shape: s32[2,1], index: 1, kind: input, shape index: {}]   ;;  %s6659_s2 = inlined_call_operand.hbm [shape: f32[16,512], index: 2, kind: input, shape index: {}]   ;;  %s6660_s3 = inlined_call_operand.hbm [shape: f32[128,512], index: 3, kind: input, shape index: {}]   ;;  %s6661_s4 = inlined_call_operand.hbm [shape: f32[256,512], index: 4, kind: input, shape index: {}]   ;;  %s6662_s5 = inlined_call_operand.vmem [shape: f32[1,512], index: 5, kind: input, shape index: {}]   ;;  %s6663_s6 = inlined_call_operand.hbm [shape: f32[2,64], index: 6, kind: output, shape index: {}]  }
   0x1   :  { %12 = vsyncpa [#allocation6], 0 }
   0x2   :  { %13 = vsyncpa [#allocation4], 0  ;;  %s5350_s21 = smov [#allocation5]   ;;  %s5351_s23 = smov [#allocation2]  }
   0x3   :  { %s35_s22 = sshll.u32 %s5350_s21, 4  ;;  %s23_s24 = sshll.u32 %s5351_s23, 4  ;;  %s36_s22 = int_to_ptr.vmem [resolvable:$true] %s35_s22  ;;  %s5393_s24 = int_to_ptr.vmem [resolvable:$true] %s23_s24 }
   0x4   :  { %s5256_s27 = scalar_lea.hbm %s6660_s3, 8192 }
   0x5   :  { %p5257_p0 = scmp.ne.s32.totalorder %s6660_s3, %s5256_s27  ;;  %p5260_p1 = scmp.lt.u32.totalorder %s5256_s27, %s6660_s3 }
   0x7   :  { %p5262_p2 = pnand %p5260_p1, %p5257_p0 }
   0x9   :  { %5265 = shalt.err (!%p5262_p2)
}
   0xa   :  { %s5266_s8 = scalar_lea.vmem %s36_s22, 8192  ;;  %p5271_p4 = scmp.lt.s32.totalorder %s36_s22, %s36_s22 }
   0xb   :  { %p5267_p3 = scmp.ne.s32.totalorder %s36_s22, %s5266_s8  ;;  %p5272_p5 = scmp.lt.s32.totalorder %s5266_s8, %s5266_s8 }
   0xd   :  { %p5273_p6 = por %p5272_p5, %p5271_p4 }
   0xf   :  { %p5274_p7 = pnand %p5273_p6, %p5267_p3 }
  0x11   :  { %5277 = shalt.err (!%p5274_p7)
}
  0x12   :  { %s5352_s9 = smov 512   ;;  %s5353_s10 = smov 32  }
  0x13   :  { %41 = dma.hbm_to_vmem [thread:$0]  %s6660_s3, 8192, %s36_s22, [#allocation6], %s5352_s9, %s5352_s9, %s5353_s10  }
  0x14   :  { %s5278_s15 = scalar_lea.hbm %s6659_s2, 1024 }
  0x15   :  { %p5279_p8 = scmp.ne.s32.totalorder %s6659_s2, %s5278_s15  ;;  %p5282_p9 = scmp.lt.u32.totalorder %s5278_s15, %s6659_s2 }
  0x17   :  { %p5284_p10 = pnand %p5282_p9, %p5279_p8 }
  0x19   :  { %5287 = shalt.err (!%p5284_p10)
}
  0x1a   :  { %s5288_s20 = scalar_lea.vmem %s5393_s24, 1024  ;;  %p5293_p12 = scmp.lt.s32.totalorder %s5393_s24, %s5393_s24 }
  0x1b   :  { %p5289_p11 = scmp.ne.s32.totalorder %s5393_s24, %s5288_s20  ;;  %p5294_p13 = scmp.lt.s32.totalorder %s5288_s20, %s5288_s20 }
  0x1d   :  { %p5295_p0 = por %p5294_p13, %p5293_p12 }
  0x1f   :  { %p5296_p1 = pnand %p5295_p0, %p5289_p11 }
  0x21   :  { %5299 = shalt.err (!%p5296_p1)
}
  0x22   :  { %29 = dma.hbm_to_vmem [thread:$0]  %s6659_s2, 1024, %s5393_s24, [#allocation3], %s5352_s9, %s5352_s9, %s5353_s10  }
  0x23   :  { %s5354_s22 = smov [#allocation7]   ;;  %s5300_s27 = scalar_lea.hbm %s6661_s4, 16384 }
  0x24   :  { %s47_s23 = sshll.u32 %s5354_s22, 4  ;;  %p5301_p2 = scmp.ne.s32.totalorder %s6661_s4, %s5300_s27  ;;  %s48_s23 = int_to_ptr.vmem [resolvable:$true] %s47_s23 }
  0x25   :  { %p5304_p3 = scmp.lt.u32.totalorder %s5300_s27, %s6661_s4 }
  0x27   :  { %p5306_p4 = pnand %p5304_p3, %p5301_p2 }
  0x29   :  { %5309 = shalt.err (!%p5306_p4)
}
  0x2a   :  { %s5310_s8 = scalar_lea.vmem %s48_s23, 16384  ;;  %p5315_p6 = scmp.lt.s32.totalorder %s48_s23, %s48_s23 }
  0x2b   :  { %p5311_p5 = scmp.ne.s32.totalorder %s48_s23, %s5310_s8  ;;  %p5316_p7 = scmp.lt.s32.totalorder %s5310_s8, %s5310_s8 }
  0x2d   :  { %p5317_p8 = por %p5316_p7, %p5315_p6 }
  0x2f   :  { %p5318_p9 = pnand %p5317_p8, %p5311_p5 }
  0x31   :  { %5321 = shalt.err (!%p5318_p9)
}
  0x32   :  { %53 = dma.hbm_to_vmem [thread:$0]  %s6661_s4, 16384, %s48_s23, [#allocation6], %s5352_s9, %s5352_s9, %s5353_s10  }
  0x33   :  { %5344 = dma.done.wait [#allocation3], 1024  }
  0x34   :  { %5345 = vsyncadd [#allocation3], 4294966272 }
  0x35   :  { %5346 = dma.done.wait [#allocation6], 24576  }
  0x36   :  { %5347 = vsyncadd [#allocation6], 4294942720  ;;  %v6667_v0 = vmov 0   ;;  %v6665_v1 = vmov 0.0   ;;  %v67_v2 = vld [vmem:[%s6657_s0] sm:$0xff]  ;;  %v68_v3 = vld [vmem:[%s6657_s0 + $0x8] sm:$0xff]  ;;  %v6664_v26 = vlaneseq }
  0x37   :  { %4996 = vset.pattern.permute.xlu0 %v6667_v0  ;;  %158 = vmatprep.mubr.f32.mxu0 %v6665_v1  ;;  %v5458_v4 = vld [vmem:[%s6658_s1] sm:$0x3]  ;;  %v80_v5 = vld [vmem:[#allocation2 + $0x8] sm:$0xff]  ;;  %v82_v7 = vld [vmem:[#allocation2 + $0x18] sm:$0xff]  ;;  %vm87_vm3 = vcmask 130048  }
  0x38   :  { %235 = vmatprep.mubr.f32.mxu1 %v6665_v1  ;;  %4997 = vset.pattern.permute.xlu1 %v6667_v0  ;;  %v84_v6 = vld [vmem:[#allocation2 + $0x28] sm:$0xff]  ;;  %v86_v9 = vld [vmem:[#allocation2 + $0x38] sm:$0xff]  ;;  %v79_v10 = vld [vmem:[#allocation2] sm:$0xff]  ;;  %vm1541_vm0 = vcmp.eq.s32.totalorder %v5458_v4, 2  ;;  %vm2260_vm1 = vcmp.eq.s32.totalorder %v5458_v4, 4  ;;  %vm2998_vm2 = vcmp.eq.s32.totalorder %v5458_v4, 6 }
  0x39   :  { %70 = vperm.xlu0 %4996, %v67_v2   ;;  %v3444_v8 = vpack.c.bf16 %v84_v6, %v80_v5  ;;  %v83_v11 = vld [vmem:[#allocation2 + $0x20] sm:$0xff]  ;;  %v3448_v12 = vpack.c.bf16 %v86_v9, %v82_v7  ;;  %v81_v14 = vld [vmem:[#allocation2 + $0x10] sm:$0xff]  ;;  %v272_v17 = vld [vmem:[#allocation5 + $0x8] sm:$0xff]  ;;  %v1542_v22 = vsel %vm1541_vm0, 1, %v6667_v0  ;;  %v2261_v24 = vsel %vm2260_vm1, 1, %v6667_v0 }
  0x3a   :  { %v3446_v13 = vpack.c.bf16 %v83_v11, %v79_v10  ;;  %v85_v15 = vld [vmem:[#allocation2 + $0x30] sm:$0xff]  ;;  %v276_v18 = vld [vmem:[#allocation5 + $0x28] sm:$0xff]  ;;  %v274_v19 = vld [vmem:[#allocation5 + $0x18] sm:$0xff]  ;;  %v2999_v25 = vsel %vm2998_vm2, 1, %v6667_v0  ;;  %v66_v28 = vand.u32 127, %v6664_v26  ;;  %vm803_vm6 = vcmp.eq.s32.totalorder %v5458_v4, 0 }
  0x3b   :  { %3445 = vmatprep.subr.bf16.mxu0 %v3444_v8  ;;  %v3450_v16 = vpack.c.bf16 %v85_v15, %v81_v14  ;;  %3449 = vmatprep.subr.bf16.mxu1 %v3448_v12  ;;  %v5461_v20 = vpack.c.bf16 %v276_v18, %v272_v17  ;;  %v278_v21 = vld [vmem:[#allocation5 + $0x38] sm:$0xff]  ;;  %v271_v27 = vld [vmem:[#allocation5] sm:$0xff]  ;;  %v273_v30 = vld [vmem:[#allocation5 + $0x10] sm:$0xff]  ;;  %vm3374_vm2 = vcmask 517120  }
  0x3c   :  { %3447 = vmatpush1.bf16.msra.mxu0 %v3446_v13  ;;  %v5464_v23 = vpack.c.bf16 %v278_v21, %v274_v19  ;;  %v275_v29 = vld [vmem:[#allocation5 + $0x20] sm:$0xff]  ;;  %v277_v31 = vld [vmem:[#allocation5 + $0x30] sm:$0xff]  ;;  %v280_v32 = vld [vmem:[#allocation5 + $0x48] sm:$0xff] }
  0x3d   :  { %73 = vperm.xlu0 %4996, %v68_v3   ;;  %6815 = vst [vmem:[#allocation12_spill] sm:$0xff] %v5461_v20  ;;  %3451 = vmatpush1.bf16.msra.mxu1 %v3450_v16  ;;  %v284_v33 = vld [vmem:[#allocation5 + $0x68] sm:$0xff]  ;;  %v282_v34 = vld [vmem:[#allocation5 + $0x58] sm:$0xff]  ;;  %v5473_v37 = vpack.c.bf16 %v275_v29, %v271_v27  ;;  %v5475_v38 = vpack.c.bf16 %v277_v31, %v273_v30  ;;  %v279_v39 = vld [vmem:[#allocation5 + $0x40] sm:$0xff] }
  0x3e   :  { %6816 = vst [vmem:[#allocation13_spill] sm:$0xff] %v5464_v23  ;;  %3453 = vmatprep.subr.bf16.mxu0 %v5461_v20  ;;  %3485 = vmatprep.subr.bf16.mxu1 %v5464_v23  ;;  %v286_v35 = vld [vmem:[#allocation5 + $0x78] sm:$0xff]  ;;  %v283_v40 = vld [vmem:[#allocation5 + $0x60] sm:$0xff]  ;;  %v281_v41 = vld [vmem:[#allocation5 + $0x50] sm:$0xff]  ;;  %v5478_v45 = vpack.c.bf16 %v284_v33, %v280_v32 }
  0x3f   :  { %v285_v42 = vld [vmem:[#allocation5 + $0x70] sm:$0xff]  ;;  %v288_v43 = vld [vmem:[#allocation5 + $0x88] sm:$0xff]  ;;  %v5480_v46 = vpack.c.bf16 %v286_v35, %v282_v34  ;;  %v290_v48 = vld [vmem:[#allocation5 + $0x98] sm:$0xff]  ;;  %v5486_v51 = vpack.c.bf16 %v283_v40, %v279_v39 }
  0x40   :  { %v292_v47 = vld [vmem:[#allocation5 + $0xa8] sm:$0xff]  ;;  %v294_v49 = vld [vmem:[#allocation5 + $0xb8] sm:$0xff]  ;;  %v5488_v52 = vpack.c.bf16 %v285_v42, %v281_v41  ;;  %v287_v53 = vld [vmem:[#allocation5 + $0x80] sm:$0xff] }
  0x41   :  { %1544 = vperm.xlu0 %4996, %v1542_v22   ;;  %v291_v54 = vld [vmem:[#allocation5 + $0xa0] sm:$0xff]  ;;  %v5492_v55 = vpack.c.bf16 %v292_v47, %v288_v43  ;;  %v5494_v56 = vpack.c.bf16 %v294_v49, %v290_v48  ;;  %v289_v57 = vld [vmem:[#allocation5 + $0x90] sm:$0xff]  ;;  %v296_v59 = vld [vmem:[#allocation5 + $0xc8] sm:$0xff] }
  0x42   :  { %v293_v58 = vld [vmem:[#allocation5 + $0xb0] sm:$0xff]  ;;  %v300_v61 = vld [vmem:[#allocation5 + $0xe8] sm:$0xff]  ;;  %v298_v62 = vld [vmem:[#allocation5 + $0xd8] sm:$0xff]  ;;  %v5503_v2 = vpack.c.bf16 %v291_v54, %v287_v53 }
  0x43   :  { %v302_v63 = vld [vmem:[#allocation5 + $0xf8] sm:$0xff]  ;;  %v5505_v3 = vpack.c.bf16 %v293_v58, %v289_v57  ;;  %v295_v5 = vld [vmem:[#allocation5 + $0xc0] sm:$0xff]  ;;  %v5509_v7 = vpack.c.bf16 %v300_v61, %v296_v59  ;;  %v297_v9 = vld [vmem:[#allocation5 + $0xd0] sm:$0xff] }
  0x44   :  { %v299_v6 = vld [vmem:[#allocation5 + $0xe0] sm:$0xff]  ;;  %v5511_v8 = vpack.c.bf16 %v302_v63, %v298_v62  ;;  %v301_v10 = vld [vmem:[#allocation5 + $0xf0] sm:$0xff]  ;;  %v304_v11 = vld [vmem:[#allocation5 + $0x108] sm:$0xff] }
  0x45   :  { %2263 = vperm.xlu0 %4996, %v2261_v24   ;;  %v308_v12 = vld [vmem:[#allocation5 + $0x128] sm:$0xff]  ;;  %v306_v13 = vld [vmem:[#allocation5 + $0x118] sm:$0xff]  ;;  %v5517_v15 = vpack.c.bf16 %v299_v6, %v295_v5  ;;  %v5519_v16 = vpack.c.bf16 %v301_v10, %v297_v9  ;;  %v303_v17 = vld [vmem:[#allocation5 + $0x100] sm:$0xff] }
  0x46   :  { %v310_v14 = vld [vmem:[#allocation5 + $0x138] sm:$0xff]  ;;  %v307_v18 = vld [vmem:[#allocation5 + $0x120] sm:$0xff]  ;;  %v5523_v19 = vpack.c.bf16 %v308_v12, %v304_v11  ;;  %v305_v22 = vld [vmem:[#allocation5 + $0x110] sm:$0xff] }
  0x47   :  { %v5525_v21 = vpack.c.bf16 %v310_v14, %v306_v13  ;;  %v309_v24 = vld [vmem:[#allocation5 + $0x130] sm:$0xff]  ;;  %v316_v27 = vld [vmem:[#allocation5 + $0x168] sm:$0xff]  ;;  %v318_v29 = vld [vmem:[#allocation5 + $0x178] sm:$0xff]  ;;  %v5529_v30 = vpack.c.bf16 %v307_v18, %v303_v17 }
  0x48   :  { %v5531_v31 = vpack.c.bf16 %v309_v24, %v305_v22  ;;  %v311_v32 = vld [vmem:[#allocation5 + $0x140] sm:$0xff]  ;;  %v317_v39 = vld [vmem:[#allocation5 + $0x170] sm:$0xff]  ;;  %v320_v40 = vld [vmem:[#allocation5 + $0x188] sm:$0xff] }
  0x49   :  { %3001 = vperm.xlu0 %4996, %v2999_v25   ;;  %v312_v25 = vld [vmem:[#allocation5 + $0x148] sm:$0xff]  ;;  %v315_v33 = vld [vmem:[#allocation5 + $0x160] sm:$0xff]  ;;  %v322_v42 = vld [vmem:[#allocation5 + $0x198] sm:$0xff] }
  0x4a   :  { %v5535_v34 = vpack.c.bf16 %v316_v27, %v312_v25  ;;  %v324_v41 = vld [vmem:[#allocation5 + $0x1a8] sm:$0xff]  ;;  %v326_v43 = vld [vmem:[#allocation5 + $0x1b8] sm:$0xff]  ;;  %v319_v48 = vld [vmem:[#allocation5 + $0x180] sm:$0xff] }
  0x4b   :  { %v323_v49 = vld [vmem:[#allocation5 + $0x1a0] sm:$0xff]  ;;  %v5549_v53 = vpack.c.bf16 %v326_v43, %v322_v42  ;;  %v321_v54 = vld [vmem:[#allocation5 + $0x190] sm:$0xff]  ;;  %v328_v58 = vld [vmem:[#allocation5 + $0x1c8] sm:$0xff] }
  0x4c   :  { %v325_v57 = vld [vmem:[#allocation5 + $0x1b0] sm:$0xff]  ;;  %v332_v59 = vld [vmem:[#allocation5 + $0x1e8] sm:$0xff]  ;;  %v334_v61 = vld [vmem:[#allocation5 + $0x1f8] sm:$0xff]  ;;  %v5553_v62 = vpack.c.bf16 %v323_v49, %v319_v48 }
  0x4d   :  { %v5555_v63 = vpack.c.bf16 %v325_v57, %v321_v54  ;;  %v327_v5 = vld [vmem:[#allocation5 + $0x1c0] sm:$0xff]  ;;  %v5559_v6 = vpack.c.bf16 %v332_v59, %v328_v58  ;;  %v329_v11 = vld [vmem:[#allocation5 + $0x1d0] sm:$0xff]  ;;  %v506_v17 = vld [vmem:[#allocation7 + $0x8] sm:$0xff] }
  0x4e   :  { %v331_v10 = vld [vmem:[#allocation5 + $0x1e0] sm:$0xff]  ;;  %v333_v12 = vld [vmem:[#allocation5 + $0x1f0] sm:$0xff]  ;;  %v510_v18 = vld [vmem:[#allocation7 + $0x28] sm:$0xff] }
  0x4f   :  { %v5565_v13 = vpack.c.bf16 %v331_v10, %v327_v5  ;;  %v5567_v14 = vpack.c.bf16 %v333_v12, %v329_v11  ;;  %v508_v22 = vld [vmem:[#allocation7 + $0x18] sm:$0xff]  ;;  %v5577_v24 = vpack.c.bf16 %v510_v18, %v506_v17  ;;  %v505_v27 = vld [vmem:[#allocation7] sm:$0xff]  ;;  %v515_v58 = vld [vmem:[#allocation7 + $0x50] sm:$0xff] }
  0x50   :  { %v512_v25 = vld [vmem:[#allocation7 + $0x38] sm:$0xff]  ;;  %v513_v54 = vld [vmem:[#allocation7 + $0x40] sm:$0xff]  ;;  %v526_v5 = vld [vmem:[#allocation7 + $0xa8] sm:$0xff] }
  0x51   :  { %v516_v42 = vld [vmem:[#allocation7 + $0x58] sm:$0xff]  ;;  %v517_v57 = vld [vmem:[#allocation7 + $0x60] sm:$0xff] }
  0x52   :  { %v520_v43 = vld [vmem:[#allocation7 + $0x78] sm:$0xff]  ;;  %v5593_v59 = vpack.c.bf16 %v517_v57, %v513_v54  ;;  %v521_v18 = vld [vmem:[#allocation7 + $0x80] sm:$0xff] }
  0x53   :  { %v5590_v49 = vpack.c.bf16 %v520_v43, %v516_v42  ;;  %v524_v12 = vld [vmem:[#allocation7 + $0x98] sm:$0xff]  ;;  %v529_v57 = vld [vmem:[#allocation7 + $0xc0] sm:$0xff] }
  0x54   :  { %v528_v17 = vld [vmem:[#allocation7 + $0xb8] sm:$0xff] }
  0x55   :  { %v536_v54 = vld [vmem:[#allocation7 + $0xf8] sm:$0xff] }
  0xb8   :  { %v71_v36 = vpop.permute.xlu0 %70 }
  0xb9   :  { %vm75_vm4 = vcmp.eq.s32.totalorder %v71_v36, %v66_v28  ;;  %v313_v36 = vld [vmem:[#allocation5 + $0x150] sm:$0xff] }
  0xba   :  { %v77_v44 = vsel %vm75_vm4, 1.0, %v6665_v1  ;;  %v5543_v47 = vpack.c.bf16 %v317_v39, %v313_v36  ;;  %v511_v36 = vld [vmem:[#allocation7 + $0x30] sm:$0xff]  ;;  %v514_v39 = vld [vmem:[#allocation7 + $0x48] sm:$0xff] }
  0xbb   :  { %3392 = vmatmul.mubr.msk.f32.vlgmr.msra.gmra.mrb[0].mxu0 %vm87_vm3, %v77_v44  ;;  %3394 = vmatmul.mubr.msk.f32.vlgmr.msra.gmra.mrb[0].mxu1 %vm87_vm3, %v77_v44  ;;  %v5541_v44 = vpack.c.bf16 %v315_v33, %v311_v32  ;;  %v507_v33 = vld [vmem:[#allocation7 + $0x10] sm:$0xff] }
  0xbc   :  { %3455 = vmatpush1.bf16.msra.mxu0 %v5473_v37  ;;  %3487 = vmatpush1.bf16.msra.mxu1 %v5475_v38  ;;  %v74_v50 = vpop.permute.xlu0 %73 }
  0xbd   :  { %vm76_vm5 = vcmp.eq.s32.totalorder %v74_v50, %v66_v28  ;;  %164 = vmatprep.mubr.f32.mxu0 %v6665_v1  ;;  %241 = vmatprep.mubr.f32.mxu1 %v6665_v1  ;;  %v314_v28 = vld [vmem:[#allocation5 + $0x158] sm:$0xff]  ;;  %v5547_v50 = vpack.c.bf16 %v324_v41, %v320_v40  ;;  %v5584_v40 = vpack.c.bf16 %v511_v36, %v507_v33  ;;  %v518_v41 = vld [vmem:[#allocation7 + $0x68] sm:$0xff] }
  0xbe   :  { %v78_v60 = vsel %vm76_vm5, 1.0, %v6665_v1  ;;  %3457 = vmatprep.subr.bf16.mxu0 %v5478_v45  ;;  %3489 = vmatprep.subr.bf16.mxu1 %v5480_v46  ;;  %v5537_v35 = vpack.c.bf16 %v318_v29, %v314_v28  ;;  %v509_v28 = vld [vmem:[#allocation7 + $0x20] sm:$0xff]  ;;  %v5579_v29 = vpack.c.bf16 %v512_v25, %v508_v22  ;;  %v5588_v48 = vpack.c.bf16 %v518_v41, %v514_v39  ;;  %v530_v36 = vld [vmem:[#allocation7 + $0xc8] sm:$0xff]  ;;  %v532_v41 = vld [vmem:[#allocation7 + $0xd8] sm:$0xff] }
  0xbf   :  { %3393 = vmatmul.mubr.msk.f32.gmra.mrb[2].mxu0 %vm87_vm3, %v78_v60  ;;  %3395 = vmatmul.mubr.msk.f32.gmra.mrb[2].mxu1 %vm87_vm3, %v78_v60  ;;  %v330_v60 = vld [vmem:[#allocation5 + $0x1d8] sm:$0xff]  ;;  %v5581_v32 = vpack.c.bf16 %v509_v28, %v505_v27  ;;  %v5601_v22 = vpack.c.bf16 %v528_v17, %v524_v12  ;;  %v525_v25 = vld [vmem:[#allocation7 + $0xa0] sm:$0xff]  ;;  %v523_v27 = vld [vmem:[#allocation7 + $0x90] sm:$0xff] }
  0xc0   :  { %3459 = vmatpush1.bf16.msra.mxu0 %v5486_v51  ;;  %3491 = vmatpush1.bf16.msra.mxu1 %v5488_v52  ;;  %v5561_v9 = vpack.c.bf16 %v334_v61, %v330_v60  ;;  %v519_v60 = vld [vmem:[#allocation7 + $0x70] sm:$0xff]  ;;  %v522_v61 = vld [vmem:[#allocation7 + $0x88] sm:$0xff]  ;;  %v5604_v33 = vpack.c.bf16 %v525_v25, %v521_v18  ;;  %v540_v18 = vld [vmem:[#allocation7 + $0x118] sm:$0xff] }
  0xc1   :  { %3461 = vmatprep.subr.bf16.mxu0 %v5492_v55  ;;  %3493 = vmatprep.subr.bf16.mxu1 %v5494_v56  ;;  %v5597_v10 = vpack.c.bf16 %v519_v60, %v515_v58  ;;  %v5599_v11 = vpack.c.bf16 %v526_v5, %v522_v61  ;;  %6819 = vst [vmem:[#allocation16_spill] sm:$0xff] %v5601_v22  ;;  %v527_v28 = vld [vmem:[#allocation7 + $0xb0] sm:$0xff]  ;;  %v534_v39 = vld [vmem:[#allocation7 + $0xe8] sm:$0xff]  ;;  %v533_v58 = vld [vmem:[#allocation7 + $0xe0] sm:$0xff] }
  0xc2   :  { %399 = vmatprep.mubr.f32.mxu0 %v6665_v1  ;;  %470 = vmatprep.mubr.f32.mxu1 %v6665_v1  ;;  %6820 = vst [vmem:[#allocation17_spill] sm:$0xff] %v5604_v33  ;;  %v5608_v42 = vpack.c.bf16 %v527_v28, %v523_v27  ;;  %v5610_v43 = vpack.c.bf16 %v534_v39, %v530_v36  ;;  %v531_v61 = vld [vmem:[#allocation7 + $0xd0] sm:$0xff]  ;;  %v538_v12 = vld [vmem:[#allocation7 + $0x108] sm:$0xff]  ;;  %v544_v25 = vld [vmem:[#allocation7 + $0x138] sm:$0xff] }
  0xc3   :  { %6817 = vst [vmem:[#allocation14_spill] sm:$0xff] %v5597_v10  ;;  %6818 = vst [vmem:[#allocation15_spill] sm:$0xff] %v5599_v11  ;;  %v5613_v60 = vpack.c.bf16 %v536_v54, %v532_v41  ;;  %v535_v5 = vld [vmem:[#allocation7 + $0xf0] sm:$0xff]  ;;  %v542_v17 = vld [vmem:[#allocation7 + $0x128] sm:$0xff]  ;;  %v5616_v26 = vpack.c.bf16 %v533_v58, %v529_v57  ;;  %v5625_v41 = vpack.c.bf16 %v544_v25, %v540_v18 }
  0xc4   :  { %3463 = vmatpush1.bf16.msra.mxu0 %v5503_v2  ;;  %3495 = vmatpush1.bf16.msra.mxu1 %v5505_v3  ;;  %6821 = vst [vmem:[#allocation18_spill] sm:$0xff] %v5608_v42  ;;  %6822 = vst [vmem:[#allocation19_spill] sm:$0xff] %v5610_v43  ;;  %v5620_v27 = vpack.c.bf16 %v535_v5, %v531_v61  ;;  %v5622_v28 = vpack.c.bf16 %v542_v17, %v538_v12  ;;  %v537_v36 = vld [vmem:[#allocation7 + $0x100] sm:$0xff]  ;;  %v539_v54 = vld [vmem:[#allocation7 + $0x110] sm:$0xff] }
  0xc5   :  { %3465 = vmatprep.subr.bf16.mxu0 %v5509_v7  ;;  %3497 = vmatprep.subr.bf16.mxu1 %v5511_v8  ;;  %6823 = vst [vmem:[#allocation20_spill] sm:$0xff] %v5613_v60  ;;  %6824 = vst [vmem:[#allocation21_spill] sm:$0xff] %v5616_v26  ;;  %v541_v39 = vld [vmem:[#allocation7 + $0x120] sm:$0xff]  ;;  %v546_v61 = vld [vmem:[#allocation7 + $0x148] sm:$0xff] }
  0xc6   :  { %6825 = vst [vmem:[#allocation22_spill] sm:$0xff] %v5620_v27  ;;  %6826 = vst [vmem:[#allocation23_spill] sm:$0xff] %v5622_v28  ;;  %v5628_v57 = vpack.c.bf16 %v541_v39, %v537_v36  ;;  %v550_v5 = vld [vmem:[#allocation7 + $0x168] sm:$0xff]  ;;  %v548_v12 = vld [vmem:[#allocation7 + $0x158] sm:$0xff] }
  0xc7   :  { %6827 = vst [vmem:[#allocation24_spill] sm:$0xff] %v5625_v41  ;;  %v5637_v17 = vpack.c.bf16 %v550_v5, %v546_v61  ;;  %v552_v18 = vld [vmem:[#allocation7 + $0x178] sm:$0xff]  ;;  %v545_v25 = vld [vmem:[#allocation7 + $0x140] sm:$0xff]  ;;  %v558_v61 = vld [vmem:[#allocation7 + $0x1a8] sm:$0xff] }
  0xc8   :  { %3467 = vmatpush1.bf16.msra.mxu0 %v5517_v15  ;;  %3499 = vmatpush1.bf16.msra.mxu1 %v5519_v16  ;;  %6828 = vst [vmem:[#allocation25_spill] sm:$0xff] %v5628_v57  ;;  %v549_v36 = vld [vmem:[#allocation7 + $0x160] sm:$0xff]  ;;  %v5639_v39 = vpack.c.bf16 %v552_v18, %v548_v12  ;;  %v556_v5 = vld [vmem:[#allocation7 + $0x198] sm:$0xff] }
  0xc9   :  { %3469 = vmatprep.subr.bf16.mxu0 %v5523_v19  ;;  %3501 = vmatprep.subr.bf16.mxu1 %v5525_v21  ;;  %6830 = vst [vmem:[#allocation27_spill] sm:$0xff] %v5637_v17  ;;  %v5641_v0 = vpack.c.bf16 %v549_v36, %v545_v25  ;;  %v560_v12 = vld [vmem:[#allocation7 + $0x1b8] sm:$0xff]  ;;  %v553_v18 = vld [vmem:[#allocation7 + $0x180] sm:$0xff] }
  0xca   :  { %6831 = vst [vmem:[#allocation28_spill] sm:$0xff] %v5639_v39  ;;  %v557_v25 = vld [vmem:[#allocation7 + $0x1a0] sm:$0xff]  ;;  %v5651_v36 = vpack.c.bf16 %v560_v12, %v556_v5  ;;  %v568_v5 = vld [vmem:[#allocation7 + $0x1f8] sm:$0xff] }
  0xcb   :  { %6832 = vst [vmem:[#allocation29_spill] sm:$0xff] %v5641_v0  ;;  %v561_v12 = vld [vmem:[#allocation7 + $0x1c0] sm:$0xff] }
  0xcc   :  { %3471 = vmatpush1.bf16.msra.mxu0 %v5529_v30  ;;  %3503 = vmatpush1.bf16.msra.mxu1 %v5531_v31  ;;  %6835 = vst [vmem:[#allocation32_spill] sm:$0xff] %v5651_v36 }
  0xcd   :  { %3473 = vmatprep.subr.bf16.mxu0 %v5535_v34  ;;  %3505 = vmatprep.subr.bf16.mxu1 %v5537_v35 }
  0xd0   :  { %3475 = vmatpush1.bf16.msra.mxu0 %v5541_v44  ;;  %3507 = vmatpush1.bf16.msra.mxu1 %v5543_v47 }
  0xd1   :  { %3477 = vmatprep.subr.bf16.mxu0 %v5547_v50  ;;  %3509 = vmatprep.subr.bf16.mxu1 %v5549_v53 }
  0xd4   :  { %3479 = vmatpush1.bf16.msra.mxu0 %v5553_v62  ;;  %3511 = vmatpush1.bf16.msra.mxu1 %v5555_v63 }
  0xd5   :  { %3481 = vmatprep.subr.bf16.mxu0 %v5559_v6  ;;  %3513 = vmatprep.subr.bf16.mxu1 %v5561_v9 }
  0xd8   :  { %3483 = vmatpush1.bf16.msra.mxu0 %v5565_v13  ;;  %3515 = vmatpush1.bf16.msra.mxu1 %v5567_v14 }
  0xd9   :  { %3517 = vmatprep.subr.bf16.mxu0 %v5577_v24  ;;  %3581 = vmatprep.subr.bf16.mxu1 %v5579_v29 }
  0xdb   :  { %400 = vmatmul.mubr.f32.vlgmr.msra.gmra.mrb[4].mxu0 %v6665_v1  ;;  %471 = vmatmul.mubr.f32.vlgmr.msra.gmra.mrb[4].mxu1 %v6665_v1 }
  0xdc   :  { %697 = vmatprep.mubr.f32.mxu0 %v6665_v1  ;;  %768 = vmatprep.mubr.f32.mxu1 %v6665_v1  ;;  %v543_v1 = vld [vmem:[#allocation7 + $0x130] sm:$0xff] }
  0xdd   :  { %3519 = vmatpush1.bf16.msra.mxu0 %v5581_v32  ;;  %3583 = vmatpush1.bf16.msra.mxu1 %v5584_v40  ;;  %v5632_v58 = vpack.c.bf16 %v543_v1, %v539_v54  ;;  %v547_v1 = vld [vmem:[#allocation7 + $0x150] sm:$0xff] }
  0xde   :  { %3521 = vmatprep.subr.bf16.mxu0 %v5588_v48  ;;  %3585 = vmatprep.subr.bf16.mxu1 %v5590_v49  ;;  %v551_v54 = vld [vmem:[#allocation7 + $0x170] sm:$0xff] }
  0xdf   :  { %6829 = vst [vmem:[#allocation26_spill] sm:$0xff] %v5632_v58 }
  0xe1   :  { %3523 = vmatpush1.bf16.msra.mxu0 %v5593_v59  ;;  %3587 = vmatpush1.bf16.msra.mxu1 %v5597_v10 }
  0xe2   :  { %3525 = vmatprep.subr.bf16.mxu0 %v5599_v11  ;;  %3589 = vmatprep.subr.bf16.mxu1 %v5601_v22 }
  0xe5   :  { %3527 = vmatpush1.bf16.msra.mxu0 %v5604_v33  ;;  %3591 = vmatpush1.bf16.msra.mxu1 %v5608_v42 }
  0xe6   :  { %3529 = vmatprep.subr.bf16.mxu0 %v5610_v43  ;;  %3593 = vmatprep.subr.bf16.mxu1 %v5613_v60 }
  0xe9   :  { %3531 = vmatpush1.bf16.msra.mxu0 %v5616_v26  ;;  %3595 = vmatpush1.bf16.msra.mxu1 %v5620_v27  ;;  %v620_v27 = vld [vmem:[#allocation7 + $0x398] sm:$0xff] }
  0xea   :  { %3533 = vmatprep.subr.bf16.mxu0 %v5622_v28  ;;  %3597 = vmatprep.subr.bf16.mxu1 %v5625_v41  ;;  %v5644_v41 = vpack.c.bf16 %v551_v54, %v547_v1  ;;  %v5653_v28 = vpack.c.bf16 %v557_v25, %v553_v18  ;;  %v555_v1 = vld [vmem:[#allocation7 + $0x190] sm:$0xff]  ;;  %v565_v18 = vld [vmem:[#allocation7 + $0x1e0] sm:$0xff]  ;;  %v624_v26 = vld [vmem:[#allocation7 + $0x3b8] sm:$0xff] }
  0xeb   :  { %v559_v54 = vld [vmem:[#allocation7 + $0x1b0] sm:$0xff] }
  0xec   :  { %6833 = vst [vmem:[#allocation30_spill] sm:$0xff] %v5644_v41  ;;  %6836 = vst [vmem:[#allocation33_spill] sm:$0xff] %v5653_v28 }
  0xed   :  { %3535 = vmatpush1.bf16.msra.mxu0 %v5628_v57  ;;  %3599 = vmatpush1.bf16.msra.mxu1 %v5632_v58  ;;  %v554_v58 = vld [vmem:[#allocation7 + $0x188] sm:$0xff] }
  0xee   :  { %3537 = vmatprep.subr.bf16.mxu0 %v5637_v17  ;;  %3601 = vmatprep.subr.bf16.mxu1 %v5639_v39  ;;  %v5649_v57 = vpack.c.bf16 %v558_v61, %v554_v58  ;;  %v5656_v39 = vpack.c.bf16 %v559_v54, %v555_v1  ;;  %v566_v58 = vld [vmem:[#allocation7 + $0x1e8] sm:$0xff]  ;;  %v564_v61 = vld [vmem:[#allocation7 + $0x1d8] sm:$0xff]  ;;  %v5665_v17 = vpack.c.bf16 %v565_v18, %v561_v12  ;;  %v563_v1 = vld [vmem:[#allocation7 + $0x1d0] sm:$0xff] }
  0xef   :  { %v5663_v25 = vpack.c.bf16 %v568_v5, %v564_v61  ;;  %v567_v54 = vld [vmem:[#allocation7 + $0x1f0] sm:$0xff]  ;;  %v576_v61 = vld [vmem:[#allocation7 + $0x238] sm:$0xff]  ;;  %v569_v5 = vld [vmem:[#allocation7 + $0x200] sm:$0xff] }
  0xf0   :  { %6834 = vst [vmem:[#allocation31_spill] sm:$0xff] %v5649_v57  ;;  %6837 = vst [vmem:[#allocation34_spill] sm:$0xff] %v5656_v39  ;;  %v573_v12 = vld [vmem:[#allocation7 + $0x220] sm:$0xff] }
  0xf1   :  { %3539 = vmatpush1.bf16.msra.mxu0 %v5641_v0  ;;  %3603 = vmatpush1.bf16.msra.mxu1 %v5644_v41  ;;  %v562_v41 = vld [vmem:[#allocation7 + $0x1c8] sm:$0xff]  ;;  %6839 = vst [vmem:[#allocation36_spill] sm:$0xff] %v5663_v25  ;;  %6840 = vst [vmem:[#allocation37_spill] sm:$0xff] %v5665_v17 }
  0xf2   :  { %3541 = vmatprep.subr.bf16.mxu0 %v5649_v57  ;;  %3605 = vmatprep.subr.bf16.mxu1 %v5651_v36  ;;  %v5661_v0 = vpack.c.bf16 %v566_v58, %v562_v41  ;;  %v5668_v36 = vpack.c.bf16 %v567_v54, %v563_v1  ;;  %v574_v41 = vld [vmem:[#allocation7 + $0x228] sm:$0xff]  ;;  %v572_v58 = vld [vmem:[#allocation7 + $0x218] sm:$0xff]  ;;  %v5677_v57 = vpack.c.bf16 %v573_v12, %v569_v5  ;;  %v571_v1 = vld [vmem:[#allocation7 + $0x210] sm:$0xff] }
  0xf3   :  { %v5675_v18 = vpack.c.bf16 %v576_v61, %v572_v58  ;;  %v575_v54 = vld [vmem:[#allocation7 + $0x230] sm:$0xff]  ;;  %v584_v58 = vld [vmem:[#allocation7 + $0x278] sm:$0xff]  ;;  %v577_v61 = vld [vmem:[#allocation7 + $0x240] sm:$0xff] }
  0xf4   :  { %6838 = vst [vmem:[#allocation35_spill] sm:$0xff] %v5661_v0  ;;  %6841 = vst [vmem:[#allocation38_spill] sm:$0xff] %v5668_v36  ;;  %v581_v5 = vld [vmem:[#allocation7 + $0x260] sm:$0xff] }
  0xf5   :  { %3543 = vmatpush1.bf16.msra.mxu0 %v5653_v28  ;;  %3607 = vmatpush1.bf16.msra.mxu1 %v5656_v39  ;;  %v570_v39 = vld [vmem:[#allocation7 + $0x208] sm:$0xff]  ;;  %6843 = vst [vmem:[#allocation40_spill] sm:$0xff] %v5675_v18  ;;  %6844 = vst [vmem:[#allocation41_spill] sm:$0xff] %v5677_v57 }
  0xf6   :  { %3545 = vmatprep.subr.bf16.mxu0 %v5661_v0  ;;  %3609 = vmatprep.subr.bf16.mxu1 %v5663_v25  ;;  %v5673_v28 = vpack.c.bf16 %v574_v41, %v570_v39  ;;  %v5680_v25 = vpack.c.bf16 %v575_v54, %v571_v1  ;;  %v582_v39 = vld [vmem:[#allocation7 + $0x268] sm:$0xff]  ;;  %v580_v41 = vld [vmem:[#allocation7 + $0x258] sm:$0xff]  ;;  %v5689_v0 = vpack.c.bf16 %v581_v5, %v577_v61  ;;  %v579_v1 = vld [vmem:[#allocation7 + $0x250] sm:$0xff] }
  0xf7   :  { %v5687_v12 = vpack.c.bf16 %v584_v58, %v580_v41  ;;  %v583_v54 = vld [vmem:[#allocation7 + $0x270] sm:$0xff]  ;;  %v592_v41 = vld [vmem:[#allocation7 + $0x2b8] sm:$0xff]  ;;  %v585_v58 = vld [vmem:[#allocation7 + $0x280] sm:$0xff] }
  0xf8   :  { %6842 = vst [vmem:[#allocation39_spill] sm:$0xff] %v5673_v28  ;;  %6845 = vst [vmem:[#allocation42_spill] sm:$0xff] %v5680_v25  ;;  %v589_v61 = vld [vmem:[#allocation7 + $0x2a0] sm:$0xff] }
  0xf9   :  { %3547 = vmatpush1.bf16.msra.mxu0 %v5665_v17  ;;  %3611 = vmatpush1.bf16.msra.mxu1 %v5668_v36  ;;  %v578_v36 = vld [vmem:[#allocation7 + $0x248] sm:$0xff]  ;;  %6847 = vst [vmem:[#allocation44_spill] sm:$0xff] %v5687_v12  ;;  %6848 = vst [vmem:[#allocation45_spill] sm:$0xff] %v5689_v0 }
  0xfa   :  { %3549 = vmatprep.subr.bf16.mxu0 %v5673_v28  ;;  %3613 = vmatprep.subr.bf16.mxu1 %v5675_v18  ;;  %v5685_v17 = vpack.c.bf16 %v582_v39, %v578_v36  ;;  %v5692_v18 = vpack.c.bf16 %v583_v54, %v579_v1  ;;  %v590_v36 = vld [vmem:[#allocation7 + $0x2a8] sm:$0xff]  ;;  %v588_v39 = vld [vmem:[#allocation7 + $0x298] sm:$0xff]  ;;  %v5701_v28 = vpack.c.bf16 %v589_v61, %v585_v58  ;;  %v587_v1 = vld [vmem:[#allocation7 + $0x290] sm:$0xff] }
  0xfb   :  { %v5699_v5 = vpack.c.bf16 %v592_v41, %v588_v39  ;;  %v591_v54 = vld [vmem:[#allocation7 + $0x2b0] sm:$0xff]  ;;  %v600_v39 = vld [vmem:[#allocation7 + $0x2f8] sm:$0xff]  ;;  %v593_v41 = vld [vmem:[#allocation7 + $0x2c0] sm:$0xff] }
  0xfc   :  { %6846 = vst [vmem:[#allocation43_spill] sm:$0xff] %v5685_v17  ;;  %6849 = vst [vmem:[#allocation46_spill] sm:$0xff] %v5692_v18  ;;  %v597_v58 = vld [vmem:[#allocation7 + $0x2e0] sm:$0xff] }
  0xfd   :  { %3551 = vmatpush1.bf16.msra.mxu0 %v5677_v57  ;;  %3615 = vmatpush1.bf16.msra.mxu1 %v5680_v25  ;;  %v586_v25 = vld [vmem:[#allocation7 + $0x288] sm:$0xff]  ;;  %6851 = vst [vmem:[#allocation48_spill] sm:$0xff] %v5699_v5  ;;  %6852 = vst [vmem:[#allocation49_spill] sm:$0xff] %v5701_v28 }
  0xfe   :  { %3553 = vmatprep.subr.bf16.mxu0 %v5685_v17  ;;  %3617 = vmatprep.subr.bf16.mxu1 %v5687_v12  ;;  %v5697_v57 = vpack.c.bf16 %v590_v36, %v586_v25  ;;  %v5704_v12 = vpack.c.bf16 %v591_v54, %v587_v1  ;;  %v598_v25 = vld [vmem:[#allocation7 + $0x2e8] sm:$0xff]  ;;  %v596_v36 = vld [vmem:[#allocation7 + $0x2d8] sm:$0xff]  ;;  %v5713_v17 = vpack.c.bf16 %v597_v58, %v593_v41  ;;  %v595_v1 = vld [vmem:[#allocation7 + $0x2d0] sm:$0xff] }
  0xff   :  { %v5711_v61 = vpack.c.bf16 %v600_v39, %v596_v36  ;;  %v599_v54 = vld [vmem:[#allocation7 + $0x2f0] sm:$0xff]  ;;  %v608_v36 = vld [vmem:[#allocation7 + $0x338] sm:$0xff]  ;;  %v601_v39 = vld [vmem:[#allocation7 + $0x300] sm:$0xff] }
 0x100   :  { %6850 = vst [vmem:[#allocation47_spill] sm:$0xff] %v5697_v57  ;;  %6853 = vst [vmem:[#allocation50_spill] sm:$0xff] %v5704_v12  ;;  %v605_v41 = vld [vmem:[#allocation7 + $0x320] sm:$0xff] }
 0x101   :  { %3555 = vmatpush1.bf16.msra.mxu0 %v5689_v0  ;;  %3619 = vmatpush1.bf16.msra.mxu1 %v5692_v18  ;;  %v594_v18 = vld [vmem:[#allocation7 + $0x2c8] sm:$0xff]  ;;  %6855 = vst [vmem:[#allocation52_spill] sm:$0xff] %v5711_v61  ;;  %6856 = vst [vmem:[#allocation53_spill] sm:$0xff] %v5713_v17 }
 0x102   :  { %3557 = vmatprep.subr.bf16.mxu0 %v5697_v57  ;;  %3621 = vmatprep.subr.bf16.mxu1 %v5699_v5  ;;  %v5709_v0 = vpack.c.bf16 %v598_v25, %v594_v18  ;;  %v5716_v5 = vpack.c.bf16 %v599_v54, %v595_v1  ;;  %v606_v18 = vld [vmem:[#allocation7 + $0x328] sm:$0xff]  ;;  %v604_v25 = vld [vmem:[#allocation7 + $0x318] sm:$0xff]  ;;  %v5725_v57 = vpack.c.bf16 %v605_v41, %v601_v39  ;;  %v603_v1 = vld [vmem:[#allocation7 + $0x310] sm:$0xff] }
 0x103   :  { %v5723_v58 = vpack.c.bf16 %v608_v36, %v604_v25  ;;  %v607_v54 = vld [vmem:[#allocation7 + $0x330] sm:$0xff]  ;;  %v616_v25 = vld [vmem:[#allocation7 + $0x378] sm:$0xff]  ;;  %v609_v36 = vld [vmem:[#allocation7 + $0x340] sm:$0xff] }
 0x104   :  { %6854 = vst [vmem:[#allocation51_spill] sm:$0xff] %v5709_v0  ;;  %6857 = vst [vmem:[#allocation54_spill] sm:$0xff] %v5716_v5  ;;  %v613_v39 = vld [vmem:[#allocation7 + $0x360] sm:$0xff] }
 0x105   :  { %3559 = vmatpush1.bf16.msra.mxu0 %v5701_v28  ;;  %3623 = vmatpush1.bf16.msra.mxu1 %v5704_v12  ;;  %v602_v12 = vld [vmem:[#allocation7 + $0x308] sm:$0xff]  ;;  %6859 = vst [vmem:[#allocation56_spill] sm:$0xff] %v5723_v58  ;;  %6860 = vst [vmem:[#allocation57_spill] sm:$0xff] %v5725_v57 }
 0x106   :  { %3561 = vmatprep.subr.bf16.mxu0 %v5709_v0  ;;  %3625 = vmatprep.subr.bf16.mxu1 %v5711_v61  ;;  %v5721_v28 = vpack.c.bf16 %v606_v18, %v602_v12  ;;  %v5728_v61 = vpack.c.bf16 %v607_v54, %v603_v1  ;;  %v614_v12 = vld [vmem:[#allocation7 + $0x368] sm:$0xff]  ;;  %v612_v18 = vld [vmem:[#allocation7 + $0x358] sm:$0xff]  ;;  %v5737_v0 = vpack.c.bf16 %v613_v39, %v609_v36  ;;  %v611_v1 = vld [vmem:[#allocation7 + $0x350] sm:$0xff] }
 0x107   :  { %v5735_v41 = vpack.c.bf16 %v616_v25, %v612_v18  ;;  %v615_v54 = vld [vmem:[#allocation7 + $0x370] sm:$0xff]  ;;  %v617_v18 = vld [vmem:[#allocation7 + $0x380] sm:$0xff] }
 0x108   :  { %6858 = vst [vmem:[#allocation55_spill] sm:$0xff] %v5721_v28  ;;  %6861 = vst [vmem:[#allocation58_spill] sm:$0xff] %v5728_v61  ;;  %v621_v25 = vld [vmem:[#allocation7 + $0x3a0] sm:$0xff]  ;;  %v619_v36 = vld [vmem:[#allocation7 + $0x390] sm:$0xff] }
 0x109   :  { %3563 = vmatpush1.bf16.msra.mxu0 %v5713_v17  ;;  %3627 = vmatpush1.bf16.msra.mxu1 %v5716_v5  ;;  %v610_v5 = vld [vmem:[#allocation7 + $0x348] sm:$0xff]  ;;  %6863 = vst [vmem:[#allocation60_spill] sm:$0xff] %v5735_v41  ;;  %6864 = vst [vmem:[#allocation61_spill] sm:$0xff] %v5737_v0  ;;  %v5749_v39 = vpack.c.bf16 %v621_v25, %v617_v18  ;;  %v631_v18 = vld [vmem:[#allocation7 + $0x3f0] sm:$0xff] }
 0x10a   :  { %3565 = vmatprep.subr.bf16.mxu0 %v5721_v28  ;;  %3629 = vmatprep.subr.bf16.mxu1 %v5723_v58  ;;  %v5733_v17 = vpack.c.bf16 %v614_v12, %v610_v5  ;;  %v618_v28 = vld [vmem:[#allocation7 + $0x388] sm:$0xff]  ;;  %v5746_v12 = vpack.c.bf16 %v624_v26, %v620_v27  ;;  %v628_v26 = vld [vmem:[#allocation7 + $0x3d8] sm:$0xff] }
 0x10b   :  { %v622_v58 = vld [vmem:[#allocation7 + $0x3a8] sm:$0xff]  ;;  %6868 = vst [vmem:[#allocation65_spill] sm:$0xff] %v5749_v39  ;;  %v632_v27 = vld [vmem:[#allocation7 + $0x3f8] sm:$0xff] }
 0x10c   :  { %6862 = vst [vmem:[#allocation59_spill] sm:$0xff] %v5733_v17  ;;  %v5744_v5 = vpack.c.bf16 %v622_v58, %v618_v28  ;;  %6867 = vst [vmem:[#allocation64_spill] sm:$0xff] %v5746_v12  ;;  %v625_v58 = vld [vmem:[#allocation7 + $0x3c0] sm:$0xff] }
 0x10d   :  { %3567 = vmatpush1.bf16.msra.mxu0 %v5725_v57  ;;  %3631 = vmatpush1.bf16.msra.mxu1 %v5728_v61  ;;  %v5740_v57 = vpack.c.bf16 %v615_v54, %v611_v1  ;;  %v623_v1 = vld [vmem:[#allocation7 + $0x3b0] sm:$0xff]  ;;  %v626_v54 = vld [vmem:[#allocation7 + $0x3c8] sm:$0xff]  ;;  %v629_v61 = vld [vmem:[#allocation7 + $0x3e0] sm:$0xff] }
 0x10e   :  { %3569 = vmatprep.subr.bf16.mxu0 %v5733_v17  ;;  %3633 = vmatprep.subr.bf16.mxu1 %v5735_v41  ;;  %6866 = vst [vmem:[#allocation63_spill] sm:$0xff] %v5744_v5  ;;  %v630_v17 = vld [vmem:[#allocation7 + $0x3e8] sm:$0xff]  ;;  %v5753_v41 = vpack.c.bf16 %v623_v1, %v619_v36  ;;  %v5760_v25 = vpack.c.bf16 %v629_v61, %v625_v58 }
 0x10f   :  { %6865 = vst [vmem:[#allocation62_spill] sm:$0xff] %v5740_v57  ;;  %v5755_v28 = vpack.c.bf16 %v630_v17, %v626_v54  ;;  %v6874_v17 = vmov 0  }
 0x110   :  { %6869 = vst [vmem:[#allocation66_spill] sm:$0xff] %v5753_v41  ;;  %6872 = vst [vmem:[#allocation69_spill] sm:$0xff] %v5760_v25  ;;  %v804_v61 = vsel %vm803_vm6, 1, %v6874_v17 }
 0x111   :  { %3571 = vmatpush1.bf16.msra.mxu0 %v5737_v0  ;;  %3635 = vmatpush1.bf16.msra.mxu1 %v5740_v57  ;;  %6870 = vst [vmem:[#allocation67_spill] sm:$0xff] %v5755_v28  ;;  %v5757_v0 = vpack.c.bf16 %v632_v27, %v628_v26  ;;  %v627_v57 = vld [vmem:[#allocation7 + $0x3d0] sm:$0xff] }
 0x112   :  { %3573 = vmatprep.subr.bf16.mxu0 %v5744_v5  ;;  %3637 = vmatprep.subr.bf16.mxu1 %v5746_v12  ;;  %v5764_v36 = vpack.c.bf16 %v631_v18, %v627_v57 }
 0x113   :  { %6871 = vst [vmem:[#allocation68_spill] sm:$0xff] %v5757_v0  ;;  %806 = vperm.xlu1 %4997, %v804_v61  }
 0x114   :  { %6873 = vst [vmem:[#allocation70_spill] sm:$0xff] %v5764_v36 }
 0x115   :  { %3575 = vmatpush1.bf16.msra.mxu0 %v5749_v39  ;;  %3639 = vmatpush1.bf16.msra.mxu1 %v5753_v41 }
 0x116   :  { %3577 = vmatprep.subr.bf16.mxu0 %v5755_v28  ;;  %3641 = vmatprep.subr.bf16.mxu1 %v5757_v0 }
 0x119   :  { %3579 = vmatpush1.bf16.msra.mxu0 %v5760_v25  ;;  %3643 = vmatpush1.bf16.msra.mxu1 %v5764_v36 }
 0x11a   :  { %3645 = vmatprep.subr.bf16.mxu0 %v5461_v20  ;;  %3677 = vmatprep.subr.bf16.mxu1 %v5464_v23 }
 0x18e   :  { %v5773_v1 = vpop.f32.mrb[0].mxu0  ;;  %v5775_v54 = vpop.f32.mrb[0].mxu1 }
 0x18f   :  { %6875 = vst [vmem:[#allocation71_spill] sm:$0xff] %v5773_v1  ;;  %6876 = vst [vmem:[#allocation72_spill] sm:$0xff] %v5775_v54  ;;  %v5777_v57 = vpop.f32.mrb[1].mxu0  ;;  %v5779_v26 = vpop.f32.mrb[1].mxu1 }
 0x190   :  { %6877 = vst [vmem:[#allocation73_spill] sm:$0xff] %v5777_v57  ;;  %6878 = vst [vmem:[#allocation74_spill] sm:$0xff] %v5779_v26 }
 0x192   :  { %v5781_v27 = vpop.f32.mrb[2].mxu0  ;;  %v5783_v58 = vpop.f32.mrb[2].mxu1 }
 0x193   :  { %6879 = vst [vmem:[#allocation75_spill] sm:$0xff] %v5781_v27  ;;  %6880 = vst [vmem:[#allocation76_spill] sm:$0xff] %v5783_v58  ;;  %v5785_v18 = vpop.f32.mrb[3].mxu0  ;;  %v5787_v23 = vpop.f32.mrb[3].mxu1 }
 0x194   :  { %6881 = vst [vmem:[#allocation77_spill] sm:$0xff] %v5785_v18  ;;  %6882 = vst [vmem:[#allocation78_spill] sm:$0xff] %v5787_v23 }
 0x1ae   :  { %v401_v4 = vpop.f32.mrb[4].mxu0  ;;  %v472_v20 = vpop.f32.mrb[4].mxu1 }
 0x1af   :  { %v477_v61 = vadd.f32 %v401_v4, %v5773_v1  ;;  %v479_v17 = vadd.f32 %v472_v20, %v5775_v54  ;;  %v403_v36 = vpop.f32.mrb[5].mxu0  ;;  %v474_v25 = vpop.f32.mrb[5].mxu1 }
 0x1b0   :  { %v478_v0 = vadd.f32 %v403_v36, %v5777_v57  ;;  %v480_v28 = vadd.f32 %v474_v25, %v5779_v26 }
 0x1b1   :  { %v3396_v41 = vmul.f32 -1.442695, %v477_v61 }
 0x1b2   :  { %v3397_v27 = vmul.f32 -1.442695, %v478_v0  ;;  %v3398_v58 = vmul.f32 -1.442695, %v480_v28 }
 0x1b3   :  { %4998 = vpow2.f32 %v3396_v41 }
 0x1b4   :  { %5000 = vpow2.f32 %v3397_v27  ;;  %v6890_v27 = vld [vmem:[#allocation27_spill] sm:$0xff] }
 0x1b5   :  { %5002 = vpow2.f32 %v3398_v58  ;;  %v6891_v58 = vld [vmem:[#allocation28_spill] sm:$0xff] }
 0x1b6   :  { %5004 = vtanh.f32 %v479_v17  ;;  %v6886_v17 = vld [vmem:[#allocation23_spill] sm:$0xff] }
 0x1bd   :  { %v4999_v18 = vpop.eup %4998 }
 0x1be   :  { %v5001_v39 = vpop.eup %5000  ;;  %v484_v23 = vadd.f32 1.0, %v4999_v18  ;;  %v6892_v18 = vld [vmem:[#allocation29_spill] sm:$0xff] }
 0x1bf   :  { %v490_v12 = vadd.f32 1.0, %v5001_v39  ;;  %v5003_v20 = vpop.eup %5002  ;;  %v6885_v39 = vld [vmem:[#allocation22_spill] sm:$0xff] }
 0x1c0   :  { %5006 = vrcp.f32 %v484_v23  ;;  %v5005_v4 = vpop.eup %5004  ;;  %v497_v57 = vadd.f32 1.0, %v5003_v20  ;;  %v6883_v23 = vmov 0.0   ;;  %v6893_v20 = vld [vmem:[#allocation30_spill] sm:$0xff] }
 0x1c1   :  { %5008 = vrcp.f32 %v490_v12  ;;  %v6884_v12 = vld [vmem:[#allocation21_spill] sm:$0xff] }
 0x1c2   :  { %5010 = vrcp.f32 %v497_v57  ;;  %v6889_v57 = vld [vmem:[#allocation26_spill] sm:$0xff] }
 0x1ca   :  { %v5007_v54 = vpop.eup %5006 }
 0x1cb   :  { %v5009_v1 = vpop.eup %5008  ;;  %v501_v36 = vmul.f32 %v5007_v54, %v5005_v4  ;;  %v6888_v54 = vld [vmem:[#allocation25_spill] sm:$0xff]  ;;  %v6894_v4 = vld [vmem:[#allocation31_spill] sm:$0xff] }
 0x1cc   :  { %v500_v25 = vmul.f32 0.0, %v5009_v1  ;;  %v5011_v0 = vpop.eup %5010  ;;  %v6887_v1 = vld [vmem:[#allocation24_spill] sm:$0xff] }
 0x1ce   :  { %v5793_v61 = vadd.f32 %v501_v36, %v500_v25  ;;  %v6895_v36 = vld [vmem:[#allocation32_spill] sm:$0xff]  ;;  %v6896_v25 = vld [vmem:[#allocation33_spill] sm:$0xff] }
 0x1d0   :  { %5012 = vtanh.f32 %v5793_v61 }
 0x1da   :  { %v5013_v41 = vpop.eup %5012 }
 0x1db   :  { %v504_v28 = vmul.f32 %v5013_v41, %v5011_v0  ;;  %v6897_v0 = vld [vmem:[#allocation34_spill] sm:$0xff]  ;;  %v6898_v41 = vld [vmem:[#allocation35_spill] sm:$0xff] }
 0x1dd   :  { %698 = vmatmul.mubr.f32.vlgmr.msra.gmra.mrb[6].mxu0 %v504_v28  ;;  %769 = vmatmul.mubr.f32.vlgmr.msra.gmra.mrb[6].mxu1 %v504_v28 }
 0x1de   :  { %3647 = vmatpush1.bf16.msra.mxu0 %v5473_v37  ;;  %3679 = vmatpush1.bf16.msra.mxu1 %v5475_v38 }
 0x1df   :  { %3649 = vmatprep.subr.bf16.mxu0 %v5478_v45  ;;  %3681 = vmatprep.subr.bf16.mxu1 %v5480_v46 }
 0x1e0   :  { %874 = vmatprep.mubr.f32.mxu0 %v6883_v23  ;;  %945 = vmatprep.mubr.f32.mxu1 %v6883_v23 }
 0x1e2   :  { %3651 = vmatpush1.bf16.msra.mxu0 %v5486_v51  ;;  %3683 = vmatpush1.bf16.msra.mxu1 %v5488_v52 }
 0x1e3   :  { %3653 = vmatprep.subr.bf16.mxu0 %v5492_v55  ;;  %3685 = vmatprep.subr.bf16.mxu1 %v5494_v56 }
 0x1e6   :  { %3655 = vmatpush1.bf16.msra.mxu0 %v5503_v2  ;;  %3687 = vmatpush1.bf16.msra.mxu1 %v5505_v3 }
 0x1e7   :  { %3657 = vmatprep.subr.bf16.mxu0 %v5509_v7  ;;  %3689 = vmatprep.subr.bf16.mxu1 %v5511_v8 }
 0x1ea   :  { %3659 = vmatpush1.bf16.msra.mxu0 %v5517_v15  ;;  %3691 = vmatpush1.bf16.msra.mxu1 %v5519_v16 }
 0x1eb   :  { %3661 = vmatprep.subr.bf16.mxu0 %v5523_v19  ;;  %3693 = vmatprep.subr.bf16.mxu1 %v5525_v21 }
 0x1ee   :  { %3663 = vmatpush1.bf16.msra.mxu0 %v5529_v30  ;;  %3695 = vmatpush1.bf16.msra.mxu1 %v5531_v31 }
 0x1ef   :  { %3665 = vmatprep.subr.bf16.mxu0 %v5535_v34  ;;  %3697 = vmatprep.subr.bf16.mxu1 %v5537_v35 }
 0x1f2   :  { %3667 = vmatpush1.bf16.msra.mxu0 %v5541_v44  ;;  %3699 = vmatpush1.bf16.msra.mxu1 %v5543_v47 }
 0x1f3   :  { %3669 = vmatprep.subr.bf16.mxu0 %v5547_v50  ;;  %3701 = vmatprep.subr.bf16.mxu1 %v5549_v53 }
 0x1f6   :  { %3671 = vmatpush1.bf16.msra.mxu0 %v5553_v62  ;;  %3703 = vmatpush1.bf16.msra.mxu1 %v5555_v63 }
 0x1f7   :  { %3673 = vmatprep.subr.bf16.mxu0 %v5559_v6  ;;  %3705 = vmatprep.subr.bf16.mxu1 %v5561_v9 }
 0x1fa   :  { %3675 = vmatpush1.bf16.msra.mxu0 %v5565_v13  ;;  %3707 = vmatpush1.bf16.msra.mxu1 %v5567_v14 }
 0x1fb   :  { %3709 = vmatprep.subr.bf16.mxu0 %v5577_v24  ;;  %3773 = vmatprep.subr.bf16.mxu1 %v5579_v29 }
 0x1fd   :  { %875 = vmatmul.mubr.f32.vlgmr.msra.gmra.mrb[8].mxu0 %v504_v28  ;;  %946 = vmatmul.mubr.f32.vlgmr.msra.gmra.mrb[8].mxu1 %v504_v28  ;;  %v6899_v28 = vld [vmem:[#allocation36_spill] sm:$0xff] }
 0x1fe   :  { %3711 = vmatpush1.bf16.msra.mxu0 %v5581_v32  ;;  %3775 = vmatpush1.bf16.msra.mxu1 %v5584_v40 }
 0x1ff   :  { %3713 = vmatprep.subr.bf16.mxu0 %v5588_v48  ;;  %3777 = vmatprep.subr.bf16.mxu1 %v5590_v49 }
 0x202   :  { %3715 = vmatpush1.bf16.msra.mxu0 %v5593_v59  ;;  %3779 = vmatpush1.bf16.msra.mxu1 %v5597_v10 }
 0x203   :  { %3717 = vmatprep.subr.bf16.mxu0 %v5599_v11  ;;  %3781 = vmatprep.subr.bf16.mxu1 %v5601_v22 }
 0x206   :  { %3719 = vmatpush1.bf16.msra.mxu0 %v5604_v33  ;;  %3783 = vmatpush1.bf16.msra.mxu1 %v5608_v42 }
 0x207   :  { %3721 = vmatprep.subr.bf16.mxu0 %v5610_v43  ;;  %3785 = vmatprep.subr.bf16.mxu1 %v5613_v60 }
 0x20a   :  { %3723 = vmatpush1.bf16.msra.mxu0 %v6884_v12  ;;  %3787 = vmatpush1.bf16.msra.mxu1 %v6885_v39 }
 0x20b   :  { %3725 = vmatprep.subr.bf16.mxu0 %v6886_v17  ;;  %3789 = vmatprep.subr.bf16.mxu1 %v6887_v1 }
 0x20e   :  { %3727 = vmatpush1.bf16.msra.mxu0 %v6888_v54  ;;  %3791 = vmatpush1.bf16.msra.mxu1 %v6889_v57  ;;  %v6900_v57 = vld [vmem:[#allocation37_spill] sm:$0xff] }
 0x20f   :  { %3729 = vmatprep.subr.bf16.mxu0 %v6890_v27  ;;  %3793 = vmatprep.subr.bf16.mxu1 %v6891_v58  ;;  %v6901_v27 = vld [vmem:[#allocation38_spill] sm:$0xff]  ;;  %v6902_v58 = vld [vmem:[#allocation39_spill] sm:$0xff] }
 0x212   :  { %3731 = vmatpush1.bf16.msra.mxu0 %v6892_v18  ;;  %3795 = vmatpush1.bf16.msra.mxu1 %v6893_v20  ;;  %v6903_v18 = vld [vmem:[#allocation40_spill] sm:$0xff]  ;;  %v6904_v20 = vld [vmem:[#allocation41_spill] sm:$0xff] }
 0x213   :  { %3733 = vmatprep.subr.bf16.mxu0 %v6894_v4  ;;  %3797 = vmatprep.subr.bf16.mxu1 %v6895_v36  ;;  %v6905_v4 = vld [vmem:[#allocation42_spill] sm:$0xff]  ;;  %v6906_v36 = vld [vmem:[#allocation43_spill] sm:$0xff] }
 0x216   :  { %3735 = vmatpush1.bf16.msra.mxu0 %v6896_v25  ;;  %3799 = vmatpush1.bf16.msra.mxu1 %v6897_v0  ;;  %v6907_v25 = vld [vmem:[#allocation44_spill] sm:$0xff]  ;;  %v6908_v0 = vld [vmem:[#allocation45_spill] sm:$0xff] }
 0x217   :  { %3737 = vmatprep.subr.bf16.mxu0 %v6898_v41  ;;  %3801 = vmatprep.subr.bf16.mxu1 %v6899_v28  ;;  %v6909_v41 = vld [vmem:[#allocation46_spill] sm:$0xff]  ;;  %v6910_v28 = vld [vmem:[#allocation47_spill] sm:$0xff] }
 0x21a   :  { %3739 = vmatpush1.bf16.msra.mxu0 %v6900_v57  ;;  %3803 = vmatpush1.bf16.msra.mxu1 %v6901_v27  ;;  %v6911_v57 = vld [vmem:[#allocation48_spill] sm:$0xff]  ;;  %v6912_v27 = vld [vmem:[#allocation49_spill] sm:$0xff] }
 0x21b   :  { %3741 = vmatprep.subr.bf16.mxu0 %v6902_v58  ;;  %3805 = vmatprep.subr.bf16.mxu1 %v6903_v18  ;;  %v6913_v58 = vld [vmem:[#allocation50_spill] sm:$0xff]  ;;  %v6914_v18 = vld [vmem:[#allocation51_spill] sm:$0xff] }
 0x21e   :  { %3743 = vmatpush1.bf16.msra.mxu0 %v6904_v20  ;;  %3807 = vmatpush1.bf16.msra.mxu1 %v6905_v4  ;;  %v6915_v20 = vld [vmem:[#allocation52_spill] sm:$0xff]  ;;  %v6916_v4 = vld [vmem:[#allocation53_spill] sm:$0xff] }
 0x21f   :  { %3745 = vmatprep.subr.bf16.mxu0 %v6906_v36  ;;  %3809 = vmatprep.subr.bf16.mxu1 %v6907_v25  ;;  %v6917_v36 = vld [vmem:[#allocation54_spill] sm:$0xff]  ;;  %v6918_v25 = vld [vmem:[#allocation55_spill] sm:$0xff] }
 0x222   :  { %3747 = vmatpush1.bf16.msra.mxu0 %v6908_v0  ;;  %3811 = vmatpush1.bf16.msra.mxu1 %v6909_v41  ;;  %v6919_v0 = vld [vmem:[#allocation56_spill] sm:$0xff]  ;;  %v6920_v41 = vld [vmem:[#allocation57_spill] sm:$0xff] }
 0x223   :  { %3749 = vmatprep.subr.bf16.mxu0 %v6910_v28  ;;  %3813 = vmatprep.subr.bf16.mxu1 %v6911_v57  ;;  %v6921_v28 = vld [vmem:[#allocation58_spill] sm:$0xff]  ;;  %v6922_v57 = vld [vmem:[#allocation59_spill] sm:$0xff] }
 0x226   :  { %3751 = vmatpush1.bf16.msra.mxu0 %v6912_v27  ;;  %3815 = vmatpush1.bf16.msra.mxu1 %v6913_v58  ;;  %v6923_v27 = vld [vmem:[#allocation60_spill] sm:$0xff]  ;;  %v6924_v58 = vld [vmem:[#allocation61_spill] sm:$0xff] }
 0x227   :  { %3753 = vmatprep.subr.bf16.mxu0 %v6914_v18  ;;  %3817 = vmatprep.subr.bf16.mxu1 %v6915_v20  ;;  %v6925_v18 = vld [vmem:[#allocation62_spill] sm:$0xff] }
 0x22a   :  { %3755 = vmatpush1.bf16.msra.mxu0 %v6916_v4  ;;  %3819 = vmatpush1.bf16.msra.mxu1 %v6917_v36  ;;  %v6926_v4 = vld [vmem:[#allocation64_spill] sm:$0xff]  ;;  %v6927_v36 = vld [vmem:[#allocation65_spill] sm:$0xff] }
 0x22b   :  { %3757 = vmatprep.subr.bf16.mxu0 %v6918_v25  ;;  %3821 = vmatprep.subr.bf16.mxu1 %v6919_v0  ;;  %v6928_v25 = vld [vmem:[#allocation66_spill] sm:$0xff]  ;;  %v6929_v0 = vld [vmem:[#allocation67_spill] sm:$0xff] }
 0x22e   :  { %3759 = vmatpush1.bf16.msra.mxu0 %v6920_v41  ;;  %3823 = vmatpush1.bf16.msra.mxu1 %v6921_v28  ;;  %v6930_v41 = vld [vmem:[#allocation68_spill] sm:$0xff]  ;;  %v6931_v28 = vld [vmem:[#allocation69_spill] sm:$0xff] }
 0x22f   :  { %3761 = vmatprep.subr.bf16.mxu0 %v6922_v57  ;;  %3825 = vmatprep.subr.bf16.mxu1 %v6923_v27  ;;  %v6932_v57 = vld [vmem:[#allocation70_spill] sm:$0xff]  ;;  %v6933_v27 = vld [vmem:[#allocation12_spill] sm:$0xff] }
 0x232   :  { %3763 = vmatpush1.bf16.msra.mxu0 %v6924_v58  ;;  %3827 = vmatpush1.bf16.msra.mxu1 %v6925_v18  ;;  %v6934_v58 = vld [vmem:[#allocation13_spill] sm:$0xff] }
 0x233   :  { %3765 = vmatprep.subr.bf16.mxu0 %v5744_v5  ;;  %3829 = vmatprep.subr.bf16.mxu1 %v6926_v4  ;;  %v5897_v4 = vld [vmem:[%s6658_s1] sm:$0x3] }
 0x234   :  { %6935 = vst [vmem:[#allocation79_spill] sm:$0xff] %v5897_v4  ;;  %vm1172_vm7 = vcmp.eq.s32.totalorder %v5897_v4, 1 }
 0x236   :  { %3767 = vmatpush1.bf16.msra.mxu0 %v6927_v36  ;;  %3831 = vmatpush1.bf16.msra.mxu1 %v6928_v25  ;;  %v6936_v25 = vmov 0  }
 0x237   :  { %3769 = vmatprep.subr.bf16.mxu0 %v6929_v0  ;;  %3833 = vmatprep.subr.bf16.mxu1 %v6930_v41  ;;  %v1173_v36 = vsel %vm1172_vm7, 1, %v6936_v25  ;;  %v6937_v0 = vlaneseq }
 0x238   :  { %1175 = vperm.xlu1 %4997, %v1173_v36  }
 0x239   :  { %v251_v5 = vshrl.u32 %v6937_v0, 7 }
 0x23a   :  { %3771 = vmatpush1.bf16.msra.mxu0 %v6931_v28  ;;  %3835 = vmatpush1.bf16.msra.mxu1 %v6932_v57  ;;  %v248_v57 = vld [vmem:[%s6662_s5] sm:$0xf] }
 0x23b   :  { %3837 = vmatprep.subr.bf16.mxu0 %v6933_v27  ;;  %3869 = vmatprep.subr.bf16.mxu1 %v6934_v58  ;;  %v252_v41 = vsub.s32 0, %v251_v5  ;;  %v256_v27 = vsub.s32 1, %v251_v5  ;;  %v264_v18 = vsub.s32 3, %v251_v5  ;;  %v260_v12 = vsub.s32 2, %v251_v5 }
 0x23d   :  { %v5905_v28 = vrot.slane %v248_v57, %v252_v41  ;;  %v5907_v58 = vrot.slane %v248_v57, %v256_v27  ;;  %v5911_v17 = vrot.slane %v248_v57, %v264_v18  ;;  %v5914_v27 = vrot.slane %v248_v57, %v260_v12 }
 0x23f   :  { %6938 = vst [vmem:[#allocation80_spill] sm:$0xff] %v5905_v28  ;;  %6939 = vst [vmem:[#allocation81_spill] sm:$0xff] %v5907_v58 }
 0x240   :  { %6940 = vst [vmem:[#allocation82_spill] sm:$0xff] %v5911_v17  ;;  %6941 = vst [vmem:[#allocation83_spill] sm:$0xff] %v5914_v27 }
 0x2b0   :  { %v699_v20 = vpop.f32.mrb[6].mxu0  ;;  %v770_v54 = vpop.f32.mrb[6].mxu1 }
 0x2b1   :  { %v775_v4 = vadd.f32 %v699_v20, %v5905_v28  ;;  %v701_v1 = vpop.f32.mrb[7].mxu0  ;;  %v772_v25 = vpop.f32.mrb[7].mxu1  ;;  %v777_v43 = vadd.f32 %v770_v54, %v5914_v27 }
 0x2b2   :  { %v776_v0 = vadd.f32 %v701_v1, %v5907_v58  ;;  %v778_v41 = vadd.f32 %v772_v25, %v5911_v17  ;;  %v6944_v17 = vld [vmem:[#allocation72_spill] sm:$0xff] }
 0x2b3   :  { %v3399_v36 = vmul.f32 -1.442695, %v775_v4 }
 0x2b4   :  { %v3400_v39 = vmul.f32 -1.442695, %v776_v0  ;;  %v3401_v60 = vmul.f32 -1.442695, %v778_v41 }
 0x2b5   :  { %5014 = vpow2.f32 %v3399_v36 }
 0x2b6   :  { %5016 = vpow2.f32 %v3400_v39 }
 0x2b7   :  { %5018 = vpow2.f32 %v3401_v60 }
 0x2b8   :  { %5020 = vtanh.f32 %v777_v43 }
 0x2bf   :  { %v5015_v42 = vpop.eup %5014 }
 0x2c0   :  { %v5017_v20 = vpop.eup %5016  ;;  %v782_v28 = vadd.f32 1.0, %v5015_v42 }
 0x2c1   :  { %v788_v1 = vadd.f32 1.0, %v5017_v20  ;;  %v5019_v18 = vpop.eup %5018  ;;  %v6943_v20 = vld [vmem:[#allocation71_spill] sm:$0xff] }
 0x2c2   :  { %5022 = vrcp.f32 %v782_v28  ;;  %v5021_v4 = vpop.eup %5020  ;;  %v795_v36 = vadd.f32 1.0, %v5019_v18 }
 0x2c3   :  { %5024 = vrcp.f32 %v788_v1 }
 0x2c4   :  { %5026 = vrcp.f32 %v795_v36 }
 0x2cc   :  { %v5023_v5 = vpop.eup %5022 }
 0x2cd   :  { %v5025_v0 = vpop.eup %5024  ;;  %v799_v39 = vmul.f32 %v5023_v5, %v5021_v4  ;;  %v6945_v4 = vld [vmem:[#allocation73_spill] sm:$0xff] }
 0x2ce   :  { %v798_v25 = vmul.f32 0.0, %v5025_v0  ;;  %v5027_v36 = vpop.eup %5026 }
 0x2d0   :  { %v5917_v12 = vadd.f32 %v799_v39, %v798_v25  ;;  %v876_v57 = vpop.f32.mrb[8].mxu0  ;;  %v947_v41 = vpop.f32.mrb[8].mxu1 }
 0x2d1   :  { %v956_v54 = vrot.slane %v876_v57, 6  ;;  %v958_v27 = vrot.slane %v947_v41, 6  ;;  %v878_v42 = vpop.f32.mrb[9].mxu0  ;;  %v949_v60 = vpop.f32.mrb[9].mxu1 }
 0x2d2   :  { %6942 = vst [vmem:[#allocation84_spill] sm:$0xff] %v5917_v12  ;;  %5028 = vtanh.f32 %v5917_v12  ;;  %v957_v43 = vrot.slane %v878_v42, 6  ;;  %v959_v28 = vrot.slane %v949_v60, 6 }
 0x2d3   :  { %v964_v1 = vadd.f32 %v956_v54, %v6943_v20  ;;  %v966_v58 = vadd.f32 %v958_v27, %v6944_v17 }
 0x2d4   :  { %v965_v18 = vadd.f32 %v957_v43, %v6945_v4  ;;  %v967_v5 = vadd.f32 %v959_v28, %v5779_v26 }
 0x2d5   :  { %v3402_v0 = vmul.f32 -1.442695, %v964_v1 }
 0x2d6   :  { %v3403_v39 = vmul.f32 -1.442695, %v965_v18  ;;  %v3404_v41 = vmul.f32 -1.442695, %v967_v5  ;;  %v988_v18 = vrot.slane %v5793_v61, 6  ;;  %v6946_v61 = vld [vmem:[#allocation18_spill] sm:$0xff] }
 0x2d7   :  { %5030 = vpow2.f32 %v3402_v0 }
 0x2d8   :  { %5032 = vpow2.f32 %v3403_v39 }
 0x2d9   :  { %5034 = vpow2.f32 %v3404_v41 }
 0x2da   :  { %5036 = vtanh.f32 %v966_v58 }
 0x2dc   :  { %v5029_v25 = vpop.eup %5028 }
 0x2dd   :  { %v5924_v57 = vmul.f32 %v5029_v25, %v5027_v36 }
 0x2df   :  { %v996_v42 = vrot.slane %v5924_v57, 6 }
 0x2e1   :  { %v5031_v60 = vpop.eup %5030  ;;  %v999_v12 = vrot.slane %v996_v42, 2 }
 0x2e2   :  { %v5033_v54 = vpop.eup %5032  ;;  %v971_v20 = vadd.f32 1.0, %v5031_v60  ;;  %v6948_v60 = vld [vmem:[#allocation20_spill] sm:$0xff] }
 0x2e3   :  { %v977_v27 = vadd.f32 1.0, %v5033_v54  ;;  %1066 = vmatprep.mubr.f32.mxu0 %v999_v12  ;;  %1137 = vmatprep.mubr.f32.mxu1 %v999_v12  ;;  %v5035_v43 = vpop.eup %5034  ;;  %v6949_v54 = vld [vmem:[#allocation21_spill] sm:$0xff] }
 0x2e4   :  { %5038 = vrcp.f32 %v971_v20  ;;  %v5037_v28 = vpop.eup %5036  ;;  %v984_v39 = vadd.f32 1.0, %v5035_v43  ;;  %v6947_v20 = vld [vmem:[#allocation19_spill] sm:$0xff] }
 0x2e5   :  { %5040 = vrcp.f32 %v977_v27  ;;  %v6950_v27 = vld [vmem:[#allocation22_spill] sm:$0xff]  ;;  %v6951_v43 = vld [vmem:[#allocation23_spill] sm:$0xff] }
 0x2e6   :  { %5042 = vrcp.f32 %v984_v39  ;;  %v6957_v39 = vld [vmem:[#allocation29_spill] sm:$0xff] }
 0x2ee   :  { %v5039_v1 = vpop.eup %5038 }
 0x2ef   :  { %v5041_v0 = vpop.eup %5040  ;;  %v991_v5 = vmul.f32 %v5039_v1, %v5037_v28  ;;  %v6952_v28 = vld [vmem:[#allocation24_spill] sm:$0xff]  ;;  %v6953_v1 = vld [vmem:[#allocation25_spill] sm:$0xff] }
 0x2f0   :  { %v990_v36 = vmul.f32 %v5041_v0, %v988_v18  ;;  %v5043_v58 = vpop.eup %5042  ;;  %v6954_v18 = vld [vmem:[#allocation26_spill] sm:$0xff]  ;;  %v6955_v0 = vld [vmem:[#allocation27_spill] sm:$0xff] }
 0x2f2   :  { %v5928_v25 = vadd.f32 %v991_v5, %v990_v36  ;;  %v6956_v5 = vld [vmem:[#allocation28_spill] sm:$0xff]  ;;  %v6958_v36 = vld [vmem:[#allocation30_spill] sm:$0xff] }
 0x2f4   :  { %5044 = vtanh.f32 %v5928_v25 }
 0x2fe   :  { %v5045_v41 = vpop.eup %5044 }
 0x2ff   :  { %v994_v42 = vmul.f32 %v5045_v41, %v5043_v58  ;;  %v6959_v58 = vld [vmem:[#allocation31_spill] sm:$0xff]  ;;  %v6960_v41 = vld [vmem:[#allocation32_spill] sm:$0xff] }
 0x301   :  { %v998_v12 = vrot.slane %v994_v42, 2  ;;  %v6961_v42 = vld [vmem:[#allocation33_spill] sm:$0xff] }
 0x303   :  { %1067 = vmatmul.mubr.f32.vlgmr.msra.gmra.mrb[10].mxu0 %v998_v12  ;;  %1138 = vmatmul.mubr.f32.vlgmr.msra.gmra.mrb[10].mxu1 %v998_v12 }
 0x304   :  { %3839 = vmatpush1.bf16.msra.mxu0 %v5473_v37  ;;  %3871 = vmatpush1.bf16.msra.mxu1 %v5475_v38 }
 0x305   :  { %3841 = vmatprep.subr.bf16.mxu0 %v5478_v45  ;;  %3873 = vmatprep.subr.bf16.mxu1 %v5480_v46 }
 0x306   :  { %1243 = vmatprep.mubr.f32.mxu0 %v6883_v23  ;;  %1314 = vmatprep.mubr.f32.mxu1 %v6883_v23 }
 0x308   :  { %3843 = vmatpush1.bf16.msra.mxu0 %v5486_v51  ;;  %3875 = vmatpush1.bf16.msra.mxu1 %v5488_v52 }
 0x309   :  { %3845 = vmatprep.subr.bf16.mxu0 %v5492_v55  ;;  %3877 = vmatprep.subr.bf16.mxu1 %v5494_v56 }
 0x30c   :  { %3847 = vmatpush1.bf16.msra.mxu0 %v5503_v2  ;;  %3879 = vmatpush1.bf16.msra.mxu1 %v5505_v3 }
 0x30d   :  { %3849 = vmatprep.subr.bf16.mxu0 %v5509_v7  ;;  %3881 = vmatprep.subr.bf16.mxu1 %v5511_v8 }
 0x310   :  { %3851 = vmatpush1.bf16.msra.mxu0 %v5517_v15  ;;  %3883 = vmatpush1.bf16.msra.mxu1 %v5519_v16 }
 0x311   :  { %3853 = vmatprep.subr.bf16.mxu0 %v5523_v19  ;;  %3885 = vmatprep.subr.bf16.mxu1 %v5525_v21 }
 0x314   :  { %3855 = vmatpush1.bf16.msra.mxu0 %v5529_v30  ;;  %3887 = vmatpush1.bf16.msra.mxu1 %v5531_v31 }
 0x315   :  { %3857 = vmatprep.subr.bf16.mxu0 %v5535_v34  ;;  %3889 = vmatprep.subr.bf16.mxu1 %v5537_v35 }
 0x318   :  { %3859 = vmatpush1.bf16.msra.mxu0 %v5541_v44  ;;  %3891 = vmatpush1.bf16.msra.mxu1 %v5543_v47 }
 0x319   :  { %3861 = vmatprep.subr.bf16.mxu0 %v5547_v50  ;;  %3893 = vmatprep.subr.bf16.mxu1 %v5549_v53 }
 0x31c   :  { %3863 = vmatpush1.bf16.msra.mxu0 %v5553_v62  ;;  %3895 = vmatpush1.bf16.msra.mxu1 %v5555_v63 }
 0x31d   :  { %3865 = vmatprep.subr.bf16.mxu0 %v5559_v6  ;;  %3897 = vmatprep.subr.bf16.mxu1 %v5561_v9 }
 0x320   :  { %3867 = vmatpush1.bf16.msra.mxu0 %v5565_v13  ;;  %3899 = vmatpush1.bf16.msra.mxu1 %v5567_v14 }
 0x321   :  { %3901 = vmatprep.subr.bf16.mxu0 %v5577_v24  ;;  %3965 = vmatprep.subr.bf16.mxu1 %v5579_v29 }
 0x323   :  { %1244 = vmatmul.mubr.f32.vlgmr.msra.gmra.mrb[12].mxu0 %v998_v12  ;;  %1315 = vmatmul.mubr.f32.vlgmr.msra.gmra.mrb[12].mxu1 %v998_v12  ;;  %v6962_v12 = vld [vmem:[#allocation34_spill] sm:$0xff] }
 0x324   :  { %3903 = vmatpush1.bf16.msra.mxu0 %v5581_v32  ;;  %3967 = vmatpush1.bf16.msra.mxu1 %v5584_v40 }
 0x325   :  { %3905 = vmatprep.subr.bf16.mxu0 %v5588_v48  ;;  %3969 = vmatprep.subr.bf16.mxu1 %v5590_v49 }
 0x328   :  { %3907 = vmatpush1.bf16.msra.mxu0 %v5593_v59  ;;  %3971 = vmatpush1.bf16.msra.mxu1 %v5597_v10 }
 0x329   :  { %3909 = vmatprep.subr.bf16.mxu0 %v5599_v11  ;;  %3973 = vmatprep.subr.bf16.mxu1 %v5601_v22 }
 0x32c   :  { %3911 = vmatpush1.bf16.msra.mxu0 %v5604_v33  ;;  %3975 = vmatpush1.bf16.msra.mxu1 %v6946_v61 }
 0x32d   :  { %3913 = vmatprep.subr.bf16.mxu0 %v6947_v20  ;;  %3977 = vmatprep.subr.bf16.mxu1 %v6948_v60 }
 0x330   :  { %3915 = vmatpush1.bf16.msra.mxu0 %v6949_v54  ;;  %3979 = vmatpush1.bf16.msra.mxu1 %v6950_v27  ;;  %v7002_v54 = vld [vmem:[#allocation81_spill] sm:$0xff] }
 0x331   :  { %3917 = vmatprep.subr.bf16.mxu0 %v6951_v43  ;;  %3981 = vmatprep.subr.bf16.mxu1 %v6952_v28  ;;  %v6963_v28 = vld [vmem:[#allocation35_spill] sm:$0xff]  ;;  %v7001_v43 = vld [vmem:[#allocation80_spill] sm:$0xff] }
 0x334   :  { %3919 = vmatpush1.bf16.msra.mxu0 %v6953_v1  ;;  %3983 = vmatpush1.bf16.msra.mxu1 %v6954_v18  ;;  %v6964_v1 = vld [vmem:[#allocation36_spill] sm:$0xff]  ;;  %v6965_v18 = vld [vmem:[#allocation37_spill] sm:$0xff] }
 0x335   :  { %3921 = vmatprep.subr.bf16.mxu0 %v6955_v0  ;;  %3985 = vmatprep.subr.bf16.mxu1 %v6956_v5  ;;  %v6966_v0 = vld [vmem:[#allocation38_spill] sm:$0xff]  ;;  %v6967_v5 = vld [vmem:[#allocation39_spill] sm:$0xff] }
 0x338   :  { %3923 = vmatpush1.bf16.msra.mxu0 %v6957_v39  ;;  %3987 = vmatpush1.bf16.msra.mxu1 %v6958_v36  ;;  %v6968_v39 = vld [vmem:[#allocation40_spill] sm:$0xff]  ;;  %v6969_v36 = vld [vmem:[#allocation41_spill] sm:$0xff] }
 0x339   :  { %3925 = vmatprep.subr.bf16.mxu0 %v6959_v58  ;;  %3989 = vmatprep.subr.bf16.mxu1 %v6960_v41  ;;  %v6970_v58 = vld [vmem:[#allocation42_spill] sm:$0xff]  ;;  %v6971_v41 = vld [vmem:[#allocation43_spill] sm:$0xff] }
 0x33c   :  { %3927 = vmatpush1.bf16.msra.mxu0 %v6961_v42  ;;  %3991 = vmatpush1.bf16.msra.mxu1 %v6962_v12  ;;  %v6972_v42 = vld [vmem:[#allocation44_spill] sm:$0xff]  ;;  %v6973_v12 = vld [vmem:[#allocation45_spill] sm:$0xff] }
 0x33d   :  { %3929 = vmatprep.subr.bf16.mxu0 %v6963_v28  ;;  %3993 = vmatprep.subr.bf16.mxu1 %v6964_v1  ;;  %v6974_v28 = vld [vmem:[#allocation46_spill] sm:$0xff]  ;;  %v6975_v1 = vld [vmem:[#allocation47_spill] sm:$0xff] }
 0x340   :  { %3931 = vmatpush1.bf16.msra.mxu0 %v6965_v18  ;;  %3995 = vmatpush1.bf16.msra.mxu1 %v6966_v0  ;;  %v6976_v18 = vld [vmem:[#allocation48_spill] sm:$0xff]  ;;  %v6977_v0 = vld [vmem:[#allocation49_spill] sm:$0xff] }
 0x341   :  { %3933 = vmatprep.subr.bf16.mxu0 %v6967_v5  ;;  %3997 = vmatprep.subr.bf16.mxu1 %v6968_v39  ;;  %v6978_v5 = vld [vmem:[#allocation50_spill] sm:$0xff]  ;;  %v6979_v39 = vld [vmem:[#allocation51_spill] sm:$0xff] }
 0x344   :  { %3935 = vmatpush1.bf16.msra.mxu0 %v6969_v36  ;;  %3999 = vmatpush1.bf16.msra.mxu1 %v6970_v58  ;;  %v6980_v36 = vld [vmem:[#allocation52_spill] sm:$0xff]  ;;  %v6981_v58 = vld [vmem:[#allocation53_spill] sm:$0xff] }
 0x345   :  { %3937 = vmatprep.subr.bf16.mxu0 %v6971_v41  ;;  %4001 = vmatprep.subr.bf16.mxu1 %v6972_v42  ;;  %v6982_v41 = vld [vmem:[#allocation54_spill] sm:$0xff]  ;;  %v6983_v42 = vld [vmem:[#allocation55_spill] sm:$0xff] }
 0x348   :  { %3939 = vmatpush1.bf16.msra.mxu0 %v6973_v12  ;;  %4003 = vmatpush1.bf16.msra.mxu1 %v6974_v28  ;;  %v6984_v12 = vld [vmem:[#allocation56_spill] sm:$0xff]  ;;  %v6985_v28 = vld [vmem:[#allocation57_spill] sm:$0xff] }
 0x349   :  { %3941 = vmatprep.subr.bf16.mxu0 %v6975_v1  ;;  %4005 = vmatprep.subr.bf16.mxu1 %v6976_v18  ;;  %v6986_v1 = vld [vmem:[#allocation58_spill] sm:$0xff]  ;;  %v6987_v18 = vld [vmem:[#allocation59_spill] sm:$0xff] }
 0x34c   :  { %3943 = vmatpush1.bf16.msra.mxu0 %v6977_v0  ;;  %4007 = vmatpush1.bf16.msra.mxu1 %v6978_v5  ;;  %v6988_v0 = vld [vmem:[#allocation60_spill] sm:$0xff]  ;;  %v6989_v5 = vld [vmem:[#allocation61_spill] sm:$0xff] }
 0x34d   :  { %3945 = vmatprep.subr.bf16.mxu0 %v6979_v39  ;;  %4009 = vmatprep.subr.bf16.mxu1 %v6980_v36  ;;  %v6990_v39 = vld [vmem:[#allocation62_spill] sm:$0xff]  ;;  %v6991_v36 = vld [vmem:[#allocation63_spill] sm:$0xff] }
 0x350   :  { %3947 = vmatpush1.bf16.msra.mxu0 %v6981_v58  ;;  %4011 = vmatpush1.bf16.msra.mxu1 %v6982_v41  ;;  %v6992_v58 = vld [vmem:[#allocation64_spill] sm:$0xff]  ;;  %v6993_v41 = vld [vmem:[#allocation65_spill] sm:$0xff] }
 0x351   :  { %3949 = vmatprep.subr.bf16.mxu0 %v6983_v42  ;;  %4013 = vmatprep.subr.bf16.mxu1 %v6984_v12  ;;  %v6994_v42 = vld [vmem:[#allocation66_spill] sm:$0xff]  ;;  %v6995_v12 = vld [vmem:[#allocation67_spill] sm:$0xff] }
 0x354   :  { %3951 = vmatpush1.bf16.msra.mxu0 %v6985_v28  ;;  %4015 = vmatpush1.bf16.msra.mxu1 %v6986_v1  ;;  %v6996_v28 = vld [vmem:[#allocation68_spill] sm:$0xff]  ;;  %v6997_v1 = vld [vmem:[#allocation69_spill] sm:$0xff] }
 0x355   :  { %3953 = vmatprep.subr.bf16.mxu0 %v6987_v18  ;;  %4017 = vmatprep.subr.bf16.mxu1 %v6988_v0  ;;  %v6998_v18 = vld [vmem:[#allocation70_spill] sm:$0xff]  ;;  %v6999_v0 = vld [vmem:[#allocation12_spill] sm:$0xff] }
 0x358   :  { %3955 = vmatpush1.bf16.msra.mxu0 %v6989_v5  ;;  %4019 = vmatpush1.bf16.msra.mxu1 %v6990_v39  ;;  %v7000_v5 = vld [vmem:[#allocation13_spill] sm:$0xff] }
 0x359   :  { %3957 = vmatprep.subr.bf16.mxu0 %v6991_v36  ;;  %4021 = vmatprep.subr.bf16.mxu1 %v6992_v58 }
 0x35c   :  { %3959 = vmatpush1.bf16.msra.mxu0 %v6993_v41  ;;  %4023 = vmatpush1.bf16.msra.mxu1 %v6994_v42 }
 0x35d   :  { %3961 = vmatprep.subr.bf16.mxu0 %v6995_v12  ;;  %4025 = vmatprep.subr.bf16.mxu1 %v6996_v28  ;;  %v7003_v28 = vld [vmem:[#allocation82_spill] sm:$0xff] }
 0x360   :  { %3963 = vmatpush1.bf16.msra.mxu0 %v6997_v1  ;;  %4027 = vmatpush1.bf16.msra.mxu1 %v6998_v18  ;;  %v7004_v18 = vld [vmem:[#allocation83_spill] sm:$0xff] }
 0x361   :  { %4029 = vmatprep.subr.bf16.mxu0 %v6999_v0  ;;  %4061 = vmatprep.subr.bf16.mxu1 %v7000_v5 }
 0x3d6   :  { %v1068_v39 = vpop.f32.mrb[10].mxu0  ;;  %v1139_v36 = vpop.f32.mrb[10].mxu1 }
 0x3d7   :  { %v1144_v58 = vadd.f32 %v1068_v39, %v7001_v43  ;;  %v1070_v27 = vpop.f32.mrb[11].mxu0  ;;  %v1141_v41 = vpop.f32.mrb[11].mxu1  ;;  %v1146_v61 = vadd.f32 %v1139_v36, %v7004_v18 }
 0x3d8   :  { %v1145_v42 = vadd.f32 %v1070_v27, %v7002_v54  ;;  %v1147_v1 = vadd.f32 %v1141_v41, %v7003_v28 }
 0x3d9   :  { %v3405_v60 = vmul.f32 -1.442695, %v1144_v58 }
 0x3da   :  { %v3406_v12 = vmul.f32 -1.442695, %v1145_v42  ;;  %v3407_v20 = vmul.f32 -1.442695, %v1147_v1 }
 0x3db   :  { %5046 = vpow2.f32 %v3405_v60 }
 0x3dc   :  { %5048 = vpow2.f32 %v3406_v12  ;;  %v7005_v12 = vld [vmem:[#allocation84_spill] sm:$0xff] }
 0x3dd   :  { %5050 = vpow2.f32 %v3407_v20 }
 0x3de   :  { %5052 = vtanh.f32 %v1146_v61 }
 0x3e5   :  { %v5047_v0 = vpop.eup %5046 }
 0x3e6   :  { %v5049_v33 = vpop.eup %5048  ;;  %v1151_v5 = vadd.f32 1.0, %v5047_v0 }
 0x3e7   :  { %v1157_v22 = vadd.f32 1.0, %v5049_v33  ;;  %v5051_v39 = vpop.eup %5050 }
 0x3e8   :  { %5054 = vrcp.f32 %v1151_v5  ;;  %v5053_v43 = vpop.eup %5052  ;;  %v1164_v60 = vadd.f32 1.0, %v5051_v39 }
 0x3e9   :  { %5056 = vrcp.f32 %v1157_v22  ;;  %v7006_v22 = vld [vmem:[#allocation71_spill] sm:$0xff] }
 0x3ea   :  { %5058 = vrcp.f32 %v1164_v60 }
 0x3f2   :  { %v5055_v27 = vpop.eup %5054 }
 0x3f3   :  { %v5057_v58 = vpop.eup %5056  ;;  %v1168_v42 = vmul.f32 %v5055_v27, %v5053_v43  ;;  %v807_v27 = vpop.permute.xlu1 %806 }
 0x3f4   :  { %v1167_v54 = vmul.f32 %v5057_v58, %v7005_v12  ;;  %v5059_v12 = vpop.eup %5058  ;;  %vm808_vm8 = vcmp.eq.s32.totalorder %v807_v27, 1 }
 0x3f6   :  { %v6034_v41 = vadd.f32 %v1168_v42, %v1167_v54  ;;  %v1245_v1 = vpop.f32.mrb[12].mxu0  ;;  %v1316_v36 = vpop.f32.mrb[12].mxu1 }
 0x3f7   :  { %v1325_v18 = vrot.slane %v1245_v1, 4  ;;  %v1327_v0 = vrot.slane %v1316_v36, 4  ;;  %v1247_v20 = vpop.f32.mrb[13].mxu0  ;;  %v1318_v61 = vpop.f32.mrb[13].mxu1 }
 0x3f8   :  { %v1326_v33 = vrot.slane %v1247_v20, 4  ;;  %v1328_v5 = vrot.slane %v1318_v61, 4  ;;  %5060 = vtanh.f32 %v6034_v41  ;;  %v1176_v60 = vpop.permute.xlu1 %1175  ;;  %v809_v20 = vsel %vm808_vm8, %v5924_v57, 0.0 }
 0x3f9   :  { %v1333_v28 = vadd.f32 %v1325_v18, %v7006_v22  ;;  %v1335_v43 = vadd.f32 %v1327_v0, %v6944_v17  ;;  %vm1177_vm9 = vcmp.eq.s32.totalorder %v1176_v60, 1  ;;  %v1357_v57 = vrot.slane %v5928_v25, 6  ;;  %v7008_v25 = vld [vmem:[#allocation17_spill] sm:$0xff] }
 0x3fa   :  { %v1334_v39 = vadd.f32 %v1326_v33, %v6945_v4  ;;  %v1336_v54 = vadd.f32 %v1328_v5, %v5779_v26 }
 0x3fb   :  { %v3408_v58 = vmul.f32 -1.442695, %v1333_v28 }
 0x3fc   :  { %v3409_v42 = vmul.f32 -1.442695, %v1334_v39  ;;  %v3410_v18 = vmul.f32 -1.442695, %v1336_v54 }
 0x3fd   :  { %5062 = vpow2.f32 %v3408_v58 }
 0x3fe   :  { %5064 = vpow2.f32 %v3409_v42 }
 0x3ff   :  { %5066 = vpow2.f32 %v3410_v18  ;;  %v7009_v18 = vld [vmem:[#allocation18_spill] sm:$0xff] }
 0x400   :  { %5068 = vtanh.f32 %v1335_v43 }
 0x402   :  { %v5061_v1 = vpop.eup %5060 }
 0x403   :  { %v1171_v36 = vmul.f32 %v5061_v1, %v5059_v12 }
 0x405   :  { %v6042_v61 = vsel %vm1177_vm9, %v1171_v36, %v809_v20  ;;  %v1365_v0 = vrot.slane %v1171_v36, 4 }
 0x407   :  { %v5063_v33 = vpop.eup %5062  ;;  %v1368_v4 = vrot.slane %v1365_v0, 4  ;;  %v7010_v0 = vld [vmem:[#allocation19_spill] sm:$0xff] }
 0x408   :  { %v5065_v5 = vpop.eup %5064  ;;  %v1340_v26 = vadd.f32 1.0, %v5063_v33  ;;  %v7011_v33 = vld [vmem:[#allocation20_spill] sm:$0xff] }
 0x409   :  { %v1346_v28 = vadd.f32 1.0, %v5065_v5  ;;  %1435 = vmatprep.mubr.f32.mxu0 %v1368_v4  ;;  %1506 = vmatprep.mubr.f32.mxu1 %v1368_v4  ;;  %v5067_v39 = vpop.eup %5066  ;;  %v7012_v5 = vld [vmem:[#allocation21_spill] sm:$0xff] }
 0x40a   :  { %5070 = vrcp.f32 %v1340_v26  ;;  %v5069_v27 = vpop.eup %5068  ;;  %v1353_v60 = vadd.f32 1.0, %v5067_v39  ;;  %v7007_v26 = vld [vmem:[#allocation16_spill] sm:$0xff]  ;;  %v7014_v39 = vld [vmem:[#allocation23_spill] sm:$0xff] }
 0x40b   :  { %5072 = vrcp.f32 %v1346_v28  ;;  %v7013_v28 = vld [vmem:[#allocation22_spill] sm:$0xff] }
 0x40c   :  { %5074 = vrcp.f32 %v1353_v60  ;;  %v7020_v60 = vld [vmem:[#allocation29_spill] sm:$0xff] }
 0x414   :  { %v5071_v58 = vpop.eup %5070 }
 0x415   :  { %v5073_v54 = vpop.eup %5072  ;;  %v1360_v42 = vmul.f32 %v5071_v58, %v5069_v27  ;;  %v7015_v27 = vld [vmem:[#allocation24_spill] sm:$0xff]  ;;  %v7016_v58 = vld [vmem:[#allocation25_spill] sm:$0xff] }
 0x416   :  { %v1359_v12 = vmul.f32 %v5073_v54, %v1357_v57  ;;  %v5075_v43 = vpop.eup %5074  ;;  %v7017_v57 = vld [vmem:[#allocation26_spill] sm:$0xff]  ;;  %v7018_v54 = vld [vmem:[#allocation27_spill] sm:$0xff] }
 0x418   :  { %v6045_v1 = vadd.f32 %v1360_v42, %v1359_v12  ;;  %v7019_v42 = vld [vmem:[#allocation28_spill] sm:$0xff]  ;;  %v7021_v12 = vld [vmem:[#allocation30_spill] sm:$0xff] }
 0x41a   :  { %5076 = vtanh.f32 %v6045_v1 }
 0x424   :  { %v5077_v36 = vpop.eup %5076 }
 0x425   :  { %v1363_v20 = vmul.f32 %v5077_v36, %v5075_v43  ;;  %v7022_v43 = vld [vmem:[#allocation31_spill] sm:$0xff]  ;;  %v7023_v36 = vld [vmem:[#allocation32_spill] sm:$0xff] }
 0x427   :  { %v1367_v4 = vrot.slane %v1363_v20, 4  ;;  %v7024_v20 = vld [vmem:[#allocation33_spill] sm:$0xff] }
 0x429   :  { %1436 = vmatmul.mubr.f32.vlgmr.msra.gmra.mrb[14].mxu0 %v1367_v4  ;;  %1507 = vmatmul.mubr.f32.vlgmr.msra.gmra.mrb[14].mxu1 %v1367_v4 }
 0x42a   :  { %4031 = vmatpush1.bf16.msra.mxu0 %v5473_v37  ;;  %4063 = vmatpush1.bf16.msra.mxu1 %v5475_v38 }
 0x42b   :  { %4033 = vmatprep.subr.bf16.mxu0 %v5478_v45  ;;  %4065 = vmatprep.subr.bf16.mxu1 %v5480_v46 }
 0x42c   :  { %1612 = vmatprep.mubr.f32.mxu0 %v6883_v23  ;;  %1683 = vmatprep.mubr.f32.mxu1 %v6883_v23 }
 0x42e   :  { %4035 = vmatpush1.bf16.msra.mxu0 %v5486_v51  ;;  %4067 = vmatpush1.bf16.msra.mxu1 %v5488_v52 }
 0x42f   :  { %4037 = vmatprep.subr.bf16.mxu0 %v5492_v55  ;;  %4069 = vmatprep.subr.bf16.mxu1 %v5494_v56 }
 0x432   :  { %4039 = vmatpush1.bf16.msra.mxu0 %v5503_v2  ;;  %4071 = vmatpush1.bf16.msra.mxu1 %v5505_v3 }
 0x433   :  { %4041 = vmatprep.subr.bf16.mxu0 %v5509_v7  ;;  %4073 = vmatprep.subr.bf16.mxu1 %v5511_v8 }
 0x436   :  { %4043 = vmatpush1.bf16.msra.mxu0 %v5517_v15  ;;  %4075 = vmatpush1.bf16.msra.mxu1 %v5519_v16 }
 0x437   :  { %4045 = vmatprep.subr.bf16.mxu0 %v5523_v19  ;;  %4077 = vmatprep.subr.bf16.mxu1 %v5525_v21 }
 0x43a   :  { %4047 = vmatpush1.bf16.msra.mxu0 %v5529_v30  ;;  %4079 = vmatpush1.bf16.msra.mxu1 %v5531_v31 }
 0x43b   :  { %4049 = vmatprep.subr.bf16.mxu0 %v5535_v34  ;;  %4081 = vmatprep.subr.bf16.mxu1 %v5537_v35 }
 0x43e   :  { %4051 = vmatpush1.bf16.msra.mxu0 %v5541_v44  ;;  %4083 = vmatpush1.bf16.msra.mxu1 %v5543_v47 }
 0x43f   :  { %4053 = vmatprep.subr.bf16.mxu0 %v5547_v50  ;;  %4085 = vmatprep.subr.bf16.mxu1 %v5549_v53 }
 0x442   :  { %4055 = vmatpush1.bf16.msra.mxu0 %v5553_v62  ;;  %4087 = vmatpush1.bf16.msra.mxu1 %v5555_v63 }
 0x443   :  { %4057 = vmatprep.subr.bf16.mxu0 %v5559_v6  ;;  %4089 = vmatprep.subr.bf16.mxu1 %v5561_v9 }
 0x446   :  { %4059 = vmatpush1.bf16.msra.mxu0 %v5565_v13  ;;  %4091 = vmatpush1.bf16.msra.mxu1 %v5567_v14 }
 0x447   :  { %4093 = vmatprep.subr.bf16.mxu0 %v5577_v24  ;;  %4157 = vmatprep.subr.bf16.mxu1 %v5579_v29 }
 0x449   :  { %1613 = vmatmul.mubr.f32.vlgmr.msra.gmra.mrb[16].mxu0 %v1367_v4  ;;  %1684 = vmatmul.mubr.f32.vlgmr.msra.gmra.mrb[16].mxu1 %v1367_v4  ;;  %v7025_v4 = vld [vmem:[#allocation34_spill] sm:$0xff] }
 0x44a   :  { %4095 = vmatpush1.bf16.msra.mxu0 %v5581_v32  ;;  %4159 = vmatpush1.bf16.msra.mxu1 %v5584_v40 }
 0x44b   :  { %4097 = vmatprep.subr.bf16.mxu0 %v5588_v48  ;;  %4161 = vmatprep.subr.bf16.mxu1 %v5590_v49 }
 0x44e   :  { %4099 = vmatpush1.bf16.msra.mxu0 %v5593_v59  ;;  %4163 = vmatpush1.bf16.msra.mxu1 %v5597_v10 }
 0x44f   :  { %4101 = vmatprep.subr.bf16.mxu0 %v5599_v11  ;;  %4165 = vmatprep.subr.bf16.mxu1 %v7007_v26 }
 0x452   :  { %4103 = vmatpush1.bf16.msra.mxu0 %v7008_v25  ;;  %4167 = vmatpush1.bf16.msra.mxu1 %v7009_v18  ;;  %v7069_v18 = vld [vmem:[#allocation83_spill] sm:$0xff] }
 0x453   :  { %4105 = vmatprep.subr.bf16.mxu0 %v7010_v0  ;;  %4169 = vmatprep.subr.bf16.mxu1 %v7011_v33 }
 0x456   :  { %4107 = vmatpush1.bf16.msra.mxu0 %v7012_v5  ;;  %4171 = vmatpush1.bf16.msra.mxu1 %v7013_v28 }
 0x457   :  { %4109 = vmatprep.subr.bf16.mxu0 %v7014_v39  ;;  %4173 = vmatprep.subr.bf16.mxu1 %v7015_v27  ;;  %v7026_v27 = vld [vmem:[#allocation35_spill] sm:$0xff] }
 0x45a   :  { %4111 = vmatpush1.bf16.msra.mxu0 %v7016_v58  ;;  %4175 = vmatpush1.bf16.msra.mxu1 %v7017_v57  ;;  %v7027_v58 = vld [vmem:[#allocation36_spill] sm:$0xff]  ;;  %v7028_v57 = vld [vmem:[#allocation37_spill] sm:$0xff] }
 0x45b   :  { %4113 = vmatprep.subr.bf16.mxu0 %v7018_v54  ;;  %4177 = vmatprep.subr.bf16.mxu1 %v7019_v42  ;;  %v7029_v54 = vld [vmem:[#allocation38_spill] sm:$0xff]  ;;  %v7030_v42 = vld [vmem:[#allocation39_spill] sm:$0xff] }
 0x45e   :  { %4115 = vmatpush1.bf16.msra.mxu0 %v7020_v60  ;;  %4179 = vmatpush1.bf16.msra.mxu1 %v7021_v12  ;;  %v7031_v60 = vld [vmem:[#allocation40_spill] sm:$0xff]  ;;  %v7032_v12 = vld [vmem:[#allocation41_spill] sm:$0xff] }
 0x45f   :  { %4117 = vmatprep.subr.bf16.mxu0 %v7022_v43  ;;  %4181 = vmatprep.subr.bf16.mxu1 %v7023_v36  ;;  %v7033_v43 = vld [vmem:[#allocation42_spill] sm:$0xff]  ;;  %v7034_v36 = vld [vmem:[#allocation43_spill] sm:$0xff] }
 0x462   :  { %4119 = vmatpush1.bf16.msra.mxu0 %v7024_v20  ;;  %4183 = vmatpush1.bf16.msra.mxu1 %v7025_v4  ;;  %v7035_v20 = vld [vmem:[#allocation44_spill] sm:$0xff]  ;;  %v7036_v4 = vld [vmem:[#allocation45_spill] sm:$0xff] }
 0x463   :  { %4121 = vmatprep.subr.bf16.mxu0 %v7026_v27  ;;  %4185 = vmatprep.subr.bf16.mxu1 %v7027_v58  ;;  %v7037_v27 = vld [vmem:[#allocation46_spill] sm:$0xff]  ;;  %v7038_v58 = vld [vmem:[#allocation47_spill] sm:$0xff] }
 0x466   :  { %4123 = vmatpush1.bf16.msra.mxu0 %v7028_v57  ;;  %4187 = vmatpush1.bf16.msra.mxu1 %v7029_v54  ;;  %v7039_v57 = vld [vmem:[#allocation48_spill] sm:$0xff]  ;;  %v7040_v54 = vld [vmem:[#allocation49_spill] sm:$0xff] }
 0x467   :  { %4125 = vmatprep.subr.bf16.mxu0 %v7030_v42  ;;  %4189 = vmatprep.subr.bf16.mxu1 %v7031_v60  ;;  %v7041_v42 = vld [vmem:[#allocation50_spill] sm:$0xff]  ;;  %v7042_v60 = vld [vmem:[#allocation51_spill] sm:$0xff] }
 0x46a   :  { %4127 = vmatpush1.bf16.msra.mxu0 %v7032_v12  ;;  %4191 = vmatpush1.bf16.msra.mxu1 %v7033_v43  ;;  %v7043_v12 = vld [vmem:[#allocation52_spill] sm:$0xff]  ;;  %v7044_v43 = vld [vmem:[#allocation53_spill] sm:$0xff] }
 0x46b   :  { %4129 = vmatprep.subr.bf16.mxu0 %v7034_v36  ;;  %4193 = vmatprep.subr.bf16.mxu1 %v7035_v20  ;;  %v7045_v36 = vld [vmem:[#allocation54_spill] sm:$0xff]  ;;  %v7046_v20 = vld [vmem:[#allocation55_spill] sm:$0xff] }
 0x46e   :  { %4131 = vmatpush1.bf16.msra.mxu0 %v7036_v4  ;;  %4195 = vmatpush1.bf16.msra.mxu1 %v7037_v27  ;;  %v7047_v4 = vld [vmem:[#allocation56_spill] sm:$0xff]  ;;  %v7048_v27 = vld [vmem:[#allocation57_spill] sm:$0xff] }
 0x46f   :  { %4133 = vmatprep.subr.bf16.mxu0 %v7038_v58  ;;  %4197 = vmatprep.subr.bf16.mxu1 %v7039_v57  ;;  %v7049_v58 = vld [vmem:[#allocation58_spill] sm:$0xff]  ;;  %v7050_v57 = vld [vmem:[#allocation59_spill] sm:$0xff] }
 0x472   :  { %4135 = vmatpush1.bf16.msra.mxu0 %v7040_v54  ;;  %4199 = vmatpush1.bf16.msra.mxu1 %v7041_v42  ;;  %v7051_v54 = vld [vmem:[#allocation60_spill] sm:$0xff]  ;;  %v7052_v42 = vld [vmem:[#allocation61_spill] sm:$0xff] }
 0x473   :  { %4137 = vmatprep.subr.bf16.mxu0 %v7042_v60  ;;  %4201 = vmatprep.subr.bf16.mxu1 %v7043_v12  ;;  %v7053_v60 = vld [vmem:[#allocation62_spill] sm:$0xff]  ;;  %v7054_v12 = vld [vmem:[#allocation63_spill] sm:$0xff] }
 0x476   :  { %4139 = vmatpush1.bf16.msra.mxu0 %v7044_v43  ;;  %4203 = vmatpush1.bf16.msra.mxu1 %v7045_v36  ;;  %v7055_v43 = vld [vmem:[#allocation64_spill] sm:$0xff]  ;;  %v7056_v36 = vld [vmem:[#allocation65_spill] sm:$0xff] }
 0x477   :  { %4141 = vmatprep.subr.bf16.mxu0 %v7046_v20  ;;  %4205 = vmatprep.subr.bf16.mxu1 %v7047_v4  ;;  %v7057_v20 = vld [vmem:[#allocation66_spill] sm:$0xff]  ;;  %v7058_v4 = vld [vmem:[#allocation67_spill] sm:$0xff] }
 0x47a   :  { %4143 = vmatpush1.bf16.msra.mxu0 %v7048_v27  ;;  %4207 = vmatpush1.bf16.msra.mxu1 %v7049_v58  ;;  %v7059_v27 = vld [vmem:[#allocation68_spill] sm:$0xff]  ;;  %v7060_v58 = vld [vmem:[#allocation69_spill] sm:$0xff] }
 0x47b   :  { %4145 = vmatprep.subr.bf16.mxu0 %v7050_v57  ;;  %4209 = vmatprep.subr.bf16.mxu1 %v7051_v54  ;;  %v7061_v57 = vld [vmem:[#allocation70_spill] sm:$0xff]  ;;  %v7062_v54 = vld [vmem:[#allocation12_spill] sm:$0xff] }
 0x47e   :  { %4147 = vmatpush1.bf16.msra.mxu0 %v7052_v42  ;;  %4211 = vmatpush1.bf16.msra.mxu1 %v7053_v60  ;;  %v7063_v42 = vld [vmem:[#allocation13_spill] sm:$0xff]  ;;  %v7064_v60 = vld [vmem:[#allocation79_spill] sm:$0xff] }
 0x47f   :  { %4149 = vmatprep.subr.bf16.mxu0 %v7054_v12  ;;  %4213 = vmatprep.subr.bf16.mxu1 %v7055_v43  ;;  %vm1910_vm10 = vcmp.eq.s32.totalorder %v7064_v60, 3  ;;  %v7065_v12 = vmov 0  }
 0x480   :  { %v1911_v43 = vsel %vm1910_vm10, 1, %v7065_v12 }
 0x481   :  { %1913 = vperm.xlu1 %4997, %v1911_v43  }
 0x482   :  { %4151 = vmatpush1.bf16.msra.mxu0 %v7056_v36  ;;  %4215 = vmatpush1.bf16.msra.mxu1 %v7057_v20  ;;  %v7066_v20 = vld [vmem:[#allocation80_spill] sm:$0xff] }
 0x483   :  { %4153 = vmatprep.subr.bf16.mxu0 %v7058_v4  ;;  %4217 = vmatprep.subr.bf16.mxu1 %v7059_v27  ;;  %v7067_v27 = vld [vmem:[#allocation81_spill] sm:$0xff] }
 0x486   :  { %4155 = vmatpush1.bf16.msra.mxu0 %v7060_v58  ;;  %4219 = vmatpush1.bf16.msra.mxu1 %v7061_v57 }
 0x487   :  { %4221 = vmatprep.subr.bf16.mxu0 %v7062_v54  ;;  %4253 = vmatprep.subr.bf16.mxu1 %v7063_v42  ;;  %v7068_v54 = vld [vmem:[#allocation82_spill] sm:$0xff] }
 0x4fc   :  { %v1437_v36 = vpop.f32.mrb[14].mxu0  ;;  %v1508_v39 = vpop.f32.mrb[14].mxu1 }
 0x4fd   :  { %v1513_v28 = vadd.f32 %v1437_v36, %v7066_v20  ;;  %v1439_v4 = vpop.f32.mrb[15].mxu0  ;;  %v1510_v5 = vpop.f32.mrb[15].mxu1  ;;  %v1515_v60 = vadd.f32 %v1508_v39, %v7069_v18 }
 0x4fe   :  { %v1514_v33 = vadd.f32 %v1439_v4, %v7067_v27  ;;  %v1516_v57 = vadd.f32 %v1510_v5, %v7068_v54 }
 0x4ff   :  { %v3411_v58 = vmul.f32 -1.442695, %v1513_v28 }
 0x500   :  { %v3412_v0 = vmul.f32 -1.442695, %v1514_v33  ;;  %v3413_v42 = vmul.f32 -1.442695, %v1516_v57 }
 0x501   :  { %5078 = vpow2.f32 %v3411_v58 }
 0x502   :  { %5080 = vpow2.f32 %v3412_v0 }
 0x503   :  { %5082 = vpow2.f32 %v3413_v42 }
 0x504   :  { %5084 = vtanh.f32 %v1515_v60 }
 0x50b   :  { %v5079_v25 = vpop.eup %5078 }
 0x50c   :  { %v5081_v12 = vpop.eup %5080  ;;  %v1520_v43 = vadd.f32 1.0, %v5079_v25 }
 0x50d   :  { %v1526_v26 = vadd.f32 1.0, %v5081_v12  ;;  %v5083_v36 = vpop.eup %5082 }
 0x50e   :  { %5086 = vrcp.f32 %v1520_v43  ;;  %v5085_v20 = vpop.eup %5084  ;;  %v1533_v58 = vadd.f32 1.0, %v5083_v36  ;;  %v7071_v36 = vld [vmem:[#allocation73_spill] sm:$0xff] }
 0x50f   :  { %5088 = vrcp.f32 %v1526_v26 }
 0x510   :  { %5090 = vrcp.f32 %v1533_v58 }
 0x518   :  { %v5087_v4 = vpop.eup %5086 }
 0x519   :  { %v5089_v28 = vpop.eup %5088  ;;  %v1537_v33 = vmul.f32 %v5087_v4, %v5085_v20 }
 0x51a   :  { %v1536_v0 = vmul.f32 %v5089_v28, %v6034_v41  ;;  %v7072_v41 = vld [vmem:[#allocation74_spill] sm:$0xff]  ;;  %v5091_v58 = vpop.eup %5090 }
 0x51c   :  { %v6153_v5 = vadd.f32 %v1537_v33, %v1536_v0  ;;  %v1614_v57 = vpop.f32.mrb[16].mxu0  ;;  %v1685_v39 = vpop.f32.mrb[16].mxu1 }
 0x51d   :  { %v1694_v18 = vrot.slane %v1614_v57, 2  ;;  %v1696_v25 = vrot.slane %v1685_v39, 2  ;;  %v1616_v42 = vpop.f32.mrb[17].mxu0  ;;  %v1687_v60 = vpop.f32.mrb[17].mxu1 }
 0x51e   :  { %7070 = vst [vmem:[#allocation72_spill] sm:$0xff] %v6153_v5  ;;  %v1695_v12 = vrot.slane %v1616_v42, 2  ;;  %v1697_v43 = vrot.slane %v1687_v60, 2  ;;  %5092 = vtanh.f32 %v6153_v5  ;;  %v1545_v57 = vpop.permute.xlu0 %1544 }
 0x51f   :  { %v1702_v26 = vadd.f32 %v1694_v18, %v7006_v22  ;;  %v1704_v20 = vadd.f32 %v1696_v25, %v6944_v17  ;;  %vm1546_vm11 = vcmp.eq.s32.totalorder %v1545_v57, 1 }
 0x520   :  { %v1703_v4 = vadd.f32 %v1695_v12, %v7071_v36  ;;  %v1705_v28 = vadd.f32 %v1697_v43, %v7072_v41 }
 0x521   :  { %v3414_v33 = vmul.f32 -1.442695, %v1702_v26 }
 0x522   :  { %v3415_v0 = vmul.f32 -1.442695, %v1703_v4  ;;  %v3416_v42 = vmul.f32 -1.442695, %v1705_v28  ;;  %v1726_v4 = vrot.slane %v6045_v1, 6  ;;  %v7073_v1 = vld [vmem:[#allocation16_spill] sm:$0xff] }
 0x523   :  { %5094 = vpow2.f32 %v3414_v33 }
 0x524   :  { %5096 = vpow2.f32 %v3415_v0 }
 0x525   :  { %5098 = vpow2.f32 %v3416_v42  ;;  %v7075_v42 = vld [vmem:[#allocation18_spill] sm:$0xff] }
 0x526   :  { %5100 = vtanh.f32 %v1704_v20 }
 0x528   :  { %v5093_v39 = vpop.eup %5092 }
 0x529   :  { %v1540_v54 = vmul.f32 %v5093_v39, %v5091_v58  ;;  %v7074_v39 = vld [vmem:[#allocation17_spill] sm:$0xff] }
 0x52b   :  { %v1734_v60 = vrot.slane %v1540_v54, 2  ;;  %v6161_v5 = vsel %vm1546_vm11, %v1540_v54, %v6042_v61 }
 0x52d   :  { %v5095_v22 = vpop.eup %5094  ;;  %v1737_v17 = vrot.slane %v1734_v60, 6  ;;  %v7076_v60 = vld [vmem:[#allocation19_spill] sm:$0xff] }
 0x52e   :  { %v5097_v18 = vpop.eup %5096  ;;  %v1709_v25 = vadd.f32 1.0, %v5095_v22  ;;  %v7077_v22 = vld [vmem:[#allocation20_spill] sm:$0xff] }
 0x52f   :  { %v1715_v12 = vadd.f32 1.0, %v5097_v18  ;;  %1804 = vmatprep.mubr.f32.mxu0 %v1737_v17  ;;  %1875 = vmatprep.mubr.f32.mxu1 %v1737_v17  ;;  %v5099_v43 = vpop.eup %5098  ;;  %v7078_v17 = vld [vmem:[#allocation21_spill] sm:$0xff]  ;;  %v7079_v18 = vld [vmem:[#allocation22_spill] sm:$0xff] }
 0x530   :  { %5102 = vrcp.f32 %v1709_v25  ;;  %v5101_v26 = vpop.eup %5100  ;;  %v1722_v61 = vadd.f32 1.0, %v5099_v43  ;;  %v7080_v25 = vld [vmem:[#allocation23_spill] sm:$0xff]  ;;  %v7082_v43 = vld [vmem:[#allocation25_spill] sm:$0xff] }
 0x531   :  { %5104 = vrcp.f32 %v1715_v12  ;;  %v7081_v12 = vld [vmem:[#allocation24_spill] sm:$0xff] }
 0x532   :  { %5106 = vrcp.f32 %v1722_v61  ;;  %v7088_v61 = vld [vmem:[#allocation31_spill] sm:$0xff] }
 0x53a   :  { %v5103_v36 = vpop.eup %5102 }
 0x53b   :  { %v5105_v41 = vpop.eup %5104  ;;  %v1729_v28 = vmul.f32 %v5103_v36, %v5101_v26  ;;  %v7083_v26 = vld [vmem:[#allocation26_spill] sm:$0xff]  ;;  %v7084_v36 = vld [vmem:[#allocation27_spill] sm:$0xff] }
 0x53c   :  { %v1728_v54 = vmul.f32 %v5105_v41, %v1726_v4  ;;  %v5107_v20 = vpop.eup %5106  ;;  %v7085_v4 = vld [vmem:[#allocation28_spill] sm:$0xff]  ;;  %v7086_v41 = vld [vmem:[#allocation29_spill] sm:$0xff] }
 0x53e   :  { %v6164_v33 = vadd.f32 %v1729_v28, %v1728_v54  ;;  %v7087_v28 = vld [vmem:[#allocation30_spill] sm:$0xff]  ;;  %v7089_v54 = vld [vmem:[#allocation32_spill] sm:$0xff] }
 0x540   :  { %5108 = vtanh.f32 %v6164_v33 }
 0x54a   :  { %v5109_v0 = vpop.eup %5108 }
 0x54b   :  { %v1732_v58 = vmul.f32 %v5109_v0, %v5107_v20  ;;  %v7090_v20 = vld [vmem:[#allocation33_spill] sm:$0xff]  ;;  %v7091_v0 = vld [vmem:[#allocation34_spill] sm:$0xff] }
 0x54d   :  { %v1736_v57 = vrot.slane %v1732_v58, 6  ;;  %v7092_v58 = vld [vmem:[#allocation35_spill] sm:$0xff] }
 0x54f   :  { %1805 = vmatmul.mubr.f32.vlgmr.msra.gmra.mrb[18].mxu0 %v1736_v57  ;;  %1876 = vmatmul.mubr.f32.vlgmr.msra.gmra.mrb[18].mxu1 %v1736_v57 }
 0x550   :  { %4223 = vmatpush1.bf16.msra.mxu0 %v5473_v37  ;;  %4255 = vmatpush1.bf16.msra.mxu1 %v5475_v38 }
 0x551   :  { %4225 = vmatprep.subr.bf16.mxu0 %v5478_v45  ;;  %4257 = vmatprep.subr.bf16.mxu1 %v5480_v46 }
 0x552   :  { %1981 = vmatprep.mubr.f32.mxu0 %v6883_v23  ;;  %2052 = vmatprep.mubr.f32.mxu1 %v6883_v23 }
 0x554   :  { %4227 = vmatpush1.bf16.msra.mxu0 %v5486_v51  ;;  %4259 = vmatpush1.bf16.msra.mxu1 %v5488_v52 }
 0x555   :  { %4229 = vmatprep.subr.bf16.mxu0 %v5492_v55  ;;  %4261 = vmatprep.subr.bf16.mxu1 %v5494_v56 }
 0x558   :  { %4231 = vmatpush1.bf16.msra.mxu0 %v5503_v2  ;;  %4263 = vmatpush1.bf16.msra.mxu1 %v5505_v3 }
 0x559   :  { %4233 = vmatprep.subr.bf16.mxu0 %v5509_v7  ;;  %4265 = vmatprep.subr.bf16.mxu1 %v5511_v8 }
 0x55c   :  { %4235 = vmatpush1.bf16.msra.mxu0 %v5517_v15  ;;  %4267 = vmatpush1.bf16.msra.mxu1 %v5519_v16 }
 0x55d   :  { %4237 = vmatprep.subr.bf16.mxu0 %v5523_v19  ;;  %4269 = vmatprep.subr.bf16.mxu1 %v5525_v21 }
 0x560   :  { %4239 = vmatpush1.bf16.msra.mxu0 %v5529_v30  ;;  %4271 = vmatpush1.bf16.msra.mxu1 %v5531_v31 }
 0x561   :  { %4241 = vmatprep.subr.bf16.mxu0 %v5535_v34  ;;  %4273 = vmatprep.subr.bf16.mxu1 %v5537_v35 }
 0x564   :  { %4243 = vmatpush1.bf16.msra.mxu0 %v5541_v44  ;;  %4275 = vmatpush1.bf16.msra.mxu1 %v5543_v47 }
 0x565   :  { %4245 = vmatprep.subr.bf16.mxu0 %v5547_v50  ;;  %4277 = vmatprep.subr.bf16.mxu1 %v5549_v53 }
 0x568   :  { %4247 = vmatpush1.bf16.msra.mxu0 %v5553_v62  ;;  %4279 = vmatpush1.bf16.msra.mxu1 %v5555_v63 }
 0x569   :  { %4249 = vmatprep.subr.bf16.mxu0 %v5559_v6  ;;  %4281 = vmatprep.subr.bf16.mxu1 %v5561_v9 }
 0x56c   :  { %4251 = vmatpush1.bf16.msra.mxu0 %v5565_v13  ;;  %4283 = vmatpush1.bf16.msra.mxu1 %v5567_v14 }
 0x56d   :  { %4285 = vmatprep.subr.bf16.mxu0 %v5577_v24  ;;  %4349 = vmatprep.subr.bf16.mxu1 %v5579_v29 }
 0x56f   :  { %1982 = vmatmul.mubr.f32.vlgmr.msra.gmra.mrb[20].mxu0 %v1736_v57  ;;  %2053 = vmatmul.mubr.f32.vlgmr.msra.gmra.mrb[20].mxu1 %v1736_v57  ;;  %v7093_v57 = vld [vmem:[#allocation36_spill] sm:$0xff] }
 0x570   :  { %4287 = vmatpush1.bf16.msra.mxu0 %v5581_v32  ;;  %4351 = vmatpush1.bf16.msra.mxu1 %v5584_v40 }
 0x571   :  { %4289 = vmatprep.subr.bf16.mxu0 %v5588_v48  ;;  %4353 = vmatprep.subr.bf16.mxu1 %v5590_v49 }
 0x574   :  { %4291 = vmatpush1.bf16.msra.mxu0 %v5593_v59  ;;  %4355 = vmatpush1.bf16.msra.mxu1 %v5597_v10 }
 0x575   :  { %4293 = vmatprep.subr.bf16.mxu0 %v5599_v11  ;;  %4357 = vmatprep.subr.bf16.mxu1 %v7073_v1 }
 0x578   :  { %4295 = vmatpush1.bf16.msra.mxu0 %v7074_v39  ;;  %4359 = vmatpush1.bf16.msra.mxu1 %v7075_v42  ;;  %v7137_v42 = vld [vmem:[#allocation78_spill] sm:$0xff] }
 0x579   :  { %4297 = vmatprep.subr.bf16.mxu0 %v7076_v60  ;;  %4361 = vmatprep.subr.bf16.mxu1 %v7077_v22 }
 0x57c   :  { %4299 = vmatpush1.bf16.msra.mxu0 %v7078_v17  ;;  %4363 = vmatpush1.bf16.msra.mxu1 %v7079_v18 }
 0x57d   :  { %4301 = vmatprep.subr.bf16.mxu0 %v7080_v25  ;;  %4365 = vmatprep.subr.bf16.mxu1 %v7081_v12 }
 0x580   :  { %4303 = vmatpush1.bf16.msra.mxu0 %v7082_v43  ;;  %4367 = vmatpush1.bf16.msra.mxu1 %v7083_v26  ;;  %v7094_v26 = vld [vmem:[#allocation37_spill] sm:$0xff]  ;;  %v7130_v43 = vld [vmem:[#allocation80_spill] sm:$0xff] }
 0x581   :  { %4305 = vmatprep.subr.bf16.mxu0 %v7084_v36  ;;  %4369 = vmatprep.subr.bf16.mxu1 %v7085_v4  ;;  %v7095_v36 = vld [vmem:[#allocation38_spill] sm:$0xff]  ;;  %v7096_v4 = vld [vmem:[#allocation39_spill] sm:$0xff] }
 0x584   :  { %4307 = vmatpush1.bf16.msra.mxu0 %v7086_v41  ;;  %4371 = vmatpush1.bf16.msra.mxu1 %v7087_v28  ;;  %v7097_v41 = vld [vmem:[#allocation40_spill] sm:$0xff]  ;;  %v7098_v28 = vld [vmem:[#allocation41_spill] sm:$0xff] }
 0x585   :  { %4309 = vmatprep.subr.bf16.mxu0 %v7088_v61  ;;  %4373 = vmatprep.subr.bf16.mxu1 %v7089_v54  ;;  %v7099_v61 = vld [vmem:[#allocation42_spill] sm:$0xff]  ;;  %v7100_v54 = vld [vmem:[#allocation43_spill] sm:$0xff] }
 0x588   :  { %4311 = vmatpush1.bf16.msra.mxu0 %v7090_v20  ;;  %4375 = vmatpush1.bf16.msra.mxu1 %v7091_v0  ;;  %v7101_v20 = vld [vmem:[#allocation44_spill] sm:$0xff]  ;;  %v7102_v0 = vld [vmem:[#allocation45_spill] sm:$0xff] }
 0x589   :  { %4313 = vmatprep.subr.bf16.mxu0 %v7092_v58  ;;  %4377 = vmatprep.subr.bf16.mxu1 %v7093_v57  ;;  %v7103_v58 = vld [vmem:[#allocation46_spill] sm:$0xff]  ;;  %v7104_v57 = vld [vmem:[#allocation47_spill] sm:$0xff] }
 0x58c   :  { %4315 = vmatpush1.bf16.msra.mxu0 %v7094_v26  ;;  %4379 = vmatpush1.bf16.msra.mxu1 %v7095_v36  ;;  %v7105_v26 = vld [vmem:[#allocation48_spill] sm:$0xff]  ;;  %v7106_v36 = vld [vmem:[#allocation49_spill] sm:$0xff] }
 0x58d   :  { %4317 = vmatprep.subr.bf16.mxu0 %v7096_v4  ;;  %4381 = vmatprep.subr.bf16.mxu1 %v7097_v41  ;;  %v7107_v4 = vld [vmem:[#allocation50_spill] sm:$0xff]  ;;  %v7108_v41 = vld [vmem:[#allocation51_spill] sm:$0xff] }
 0x590   :  { %4319 = vmatpush1.bf16.msra.mxu0 %v7098_v28  ;;  %4383 = vmatpush1.bf16.msra.mxu1 %v7099_v61  ;;  %v7109_v28 = vld [vmem:[#allocation52_spill] sm:$0xff]  ;;  %v7110_v61 = vld [vmem:[#allocation53_spill] sm:$0xff] }
 0x591   :  { %4321 = vmatprep.subr.bf16.mxu0 %v7100_v54  ;;  %4385 = vmatprep.subr.bf16.mxu1 %v7101_v20  ;;  %v7111_v54 = vld [vmem:[#allocation54_spill] sm:$0xff]  ;;  %v7112_v20 = vld [vmem:[#allocation55_spill] sm:$0xff] }
 0x594   :  { %4323 = vmatpush1.bf16.msra.mxu0 %v7102_v0  ;;  %4387 = vmatpush1.bf16.msra.mxu1 %v7103_v58  ;;  %v7113_v0 = vld [vmem:[#allocation56_spill] sm:$0xff]  ;;  %v7114_v58 = vld [vmem:[#allocation57_spill] sm:$0xff] }
 0x595   :  { %4325 = vmatprep.subr.bf16.mxu0 %v7104_v57  ;;  %4389 = vmatprep.subr.bf16.mxu1 %v7105_v26  ;;  %v7115_v57 = vld [vmem:[#allocation58_spill] sm:$0xff]  ;;  %v7116_v26 = vld [vmem:[#allocation59_spill] sm:$0xff] }
 0x598   :  { %4327 = vmatpush1.bf16.msra.mxu0 %v7106_v36  ;;  %4391 = vmatpush1.bf16.msra.mxu1 %v7107_v4  ;;  %v7117_v36 = vld [vmem:[#allocation60_spill] sm:$0xff]  ;;  %v7118_v4 = vld [vmem:[#allocation61_spill] sm:$0xff] }
 0x599   :  { %4329 = vmatprep.subr.bf16.mxu0 %v7108_v41  ;;  %4393 = vmatprep.subr.bf16.mxu1 %v7109_v28  ;;  %v7119_v41 = vld [vmem:[#allocation62_spill] sm:$0xff]  ;;  %v7120_v28 = vld [vmem:[#allocation63_spill] sm:$0xff] }
 0x59c   :  { %4331 = vmatpush1.bf16.msra.mxu0 %v7110_v61  ;;  %4395 = vmatpush1.bf16.msra.mxu1 %v7111_v54  ;;  %v7121_v61 = vld [vmem:[#allocation64_spill] sm:$0xff]  ;;  %v7122_v54 = vld [vmem:[#allocation65_spill] sm:$0xff] }
 0x59d   :  { %4333 = vmatprep.subr.bf16.mxu0 %v7112_v20  ;;  %4397 = vmatprep.subr.bf16.mxu1 %v7113_v0  ;;  %v7123_v20 = vld [vmem:[#allocation66_spill] sm:$0xff]  ;;  %v7124_v0 = vld [vmem:[#allocation67_spill] sm:$0xff] }
 0x5a0   :  { %4335 = vmatpush1.bf16.msra.mxu0 %v7114_v58  ;;  %4399 = vmatpush1.bf16.msra.mxu1 %v7115_v57  ;;  %v7125_v58 = vld [vmem:[#allocation68_spill] sm:$0xff]  ;;  %v7126_v57 = vld [vmem:[#allocation69_spill] sm:$0xff] }
 0x5a1   :  { %4337 = vmatprep.subr.bf16.mxu0 %v7116_v26  ;;  %4401 = vmatprep.subr.bf16.mxu1 %v7117_v36  ;;  %v7127_v26 = vld [vmem:[#allocation70_spill] sm:$0xff]  ;;  %v7128_v36 = vld [vmem:[#allocation12_spill] sm:$0xff] }
 0x5a4   :  { %4339 = vmatpush1.bf16.msra.mxu0 %v7118_v4  ;;  %4403 = vmatpush1.bf16.msra.mxu1 %v7119_v41  ;;  %v7129_v4 = vld [vmem:[#allocation13_spill] sm:$0xff] }
 0x5a5   :  { %4341 = vmatprep.subr.bf16.mxu0 %v7120_v28  ;;  %4405 = vmatprep.subr.bf16.mxu1 %v7121_v61 }
 0x5a8   :  { %4343 = vmatpush1.bf16.msra.mxu0 %v7122_v54  ;;  %4407 = vmatpush1.bf16.msra.mxu1 %v7123_v20 }
 0x5a9   :  { %4345 = vmatprep.subr.bf16.mxu0 %v7124_v0  ;;  %4409 = vmatprep.subr.bf16.mxu1 %v7125_v58  ;;  %v7131_v58 = vld [vmem:[#allocation82_spill] sm:$0xff] }
 0x5ac   :  { %4347 = vmatpush1.bf16.msra.mxu0 %v7126_v57  ;;  %4411 = vmatpush1.bf16.msra.mxu1 %v7127_v26  ;;  %v7132_v26 = vld [vmem:[#allocation83_spill] sm:$0xff] }
 0x5ad   :  { %4413 = vmatprep.subr.bf16.mxu0 %v7128_v36  ;;  %4445 = vmatprep.subr.bf16.mxu1 %v7129_v4 }
 0x622   :  { %v1806_v41 = vpop.f32.mrb[18].mxu0  ;;  %v1877_v28 = vpop.f32.mrb[18].mxu1 }
 0x623   :  { %v1882_v61 = vadd.f32 %v1806_v41, %v7130_v43  ;;  %v1808_v12 = vpop.f32.mrb[19].mxu0  ;;  %v1879_v54 = vpop.f32.mrb[19].mxu1  ;;  %v1884_v17 = vadd.f32 %v1877_v28, %v7132_v26  ;;  %v7134_v26 = vld [vmem:[#allocation75_spill] sm:$0xff] }
 0x624   :  { %v1883_v20 = vadd.f32 %v1808_v12, %v7067_v27  ;;  %v1885_v57 = vadd.f32 %v1879_v54, %v7131_v58 }
 0x625   :  { %v3417_v25 = vmul.f32 -1.442695, %v1882_v61 }
 0x626   :  { %v3418_v0 = vmul.f32 -1.442695, %v1883_v20  ;;  %v3419_v18 = vmul.f32 -1.442695, %v1885_v57 }
 0x627   :  { %5110 = vpow2.f32 %v3417_v25 }
 0x628   :  { %5112 = vpow2.f32 %v3418_v0  ;;  %v7133_v0 = vld [vmem:[#allocation72_spill] sm:$0xff] }
 0x629   :  { %5114 = vpow2.f32 %v3419_v18  ;;  %v7135_v18 = vld [vmem:[#allocation76_spill] sm:$0xff] }
 0x62a   :  { %5116 = vtanh.f32 %v1884_v17 }
 0x631   :  { %v5111_v36 = vpop.eup %5110 }
 0x632   :  { %v5113_v22 = vpop.eup %5112  ;;  %v1889_v4 = vadd.f32 1.0, %v5111_v36 }
 0x633   :  { %v1895_v60 = vadd.f32 1.0, %v5113_v22  ;;  %v5115_v41 = vpop.eup %5114 }
 0x634   :  { %5118 = vrcp.f32 %v1889_v4  ;;  %v5117_v43 = vpop.eup %5116  ;;  %v1902_v25 = vadd.f32 1.0, %v5115_v41 }
 0x635   :  { %5120 = vrcp.f32 %v1895_v60  ;;  %v7136_v60 = vld [vmem:[#allocation77_spill] sm:$0xff] }
 0x636   :  { %5122 = vrcp.f32 %v1902_v25 }
 0x63e   :  { %v5119_v12 = vpop.eup %5118 }
 0x63f   :  { %v5121_v61 = vpop.eup %5120  ;;  %v1906_v20 = vmul.f32 %v5119_v12, %v5117_v43 }
 0x640   :  { %v1905_v27 = vmul.f32 %v5121_v61, %v7133_v0  ;;  %v5123_v12 = vpop.eup %5122 }
 0x642   :  { %v6270_v54 = vadd.f32 %v1906_v20, %v1905_v27  ;;  %v1983_v57 = vpop.f32.mrb[20].mxu0  ;;  %v2054_v28 = vpop.f32.mrb[20].mxu1 }
 0x643   :  { %v2059_v36 = vadd.f32 %v1983_v57, %v7134_v26  ;;  %v2061_v17 = vadd.f32 %v2054_v28, %v7135_v18  ;;  %v1985_v22 = vpop.f32.mrb[21].mxu0  ;;  %v2056_v4 = vpop.f32.mrb[21].mxu1 }
 0x644   :  { %v2060_v58 = vadd.f32 %v1985_v22, %v7136_v60  ;;  %v2062_v39 = vadd.f32 %v2056_v4, %v7137_v42  ;;  %5124 = vtanh.f32 %v6270_v54  ;;  %v1914_v27 = vpop.permute.xlu1 %1913 }
 0x645   :  { %v3420_v43 = vmul.f32 -1.442695, %v2059_v36  ;;  %vm1915_vm12 = vcmp.eq.s32.totalorder %v1914_v27, 1 }
 0x646   :  { %v3421_v41 = vmul.f32 -1.442695, %v2060_v58  ;;  %v3422_v20 = vmul.f32 -1.442695, %v2062_v39  ;;  %v2083_v39 = vrot.slane %v6164_v33, 6  ;;  %v7138_v33 = vld [vmem:[#allocation17_spill] sm:$0xff] }
 0x647   :  { %5126 = vpow2.f32 %v3420_v43 }
 0x648   :  { %5128 = vpow2.f32 %v3421_v41 }
 0x649   :  { %5130 = vpow2.f32 %v3422_v20 }
 0x64a   :  { %5132 = vtanh.f32 %v2061_v17 }
 0x64e   :  { %v5125_v61 = vpop.eup %5124 }
 0x64f   :  { %v1909_v25 = vmul.f32 %v5125_v61, %v5123_v12 }
 0x651   :  { %v5127_v0 = vpop.eup %5126  ;;  %v6278_v57 = vsel %vm1915_vm12, %v1909_v25, %v6161_v5  ;;  %2154 = vmatprep.mubr.f32.mxu0 %v1909_v25  ;;  %2225 = vmatprep.mubr.f32.mxu1 %v1909_v25 }
 0x652   :  { %v5129_v28 = vpop.eup %5128  ;;  %v2066_v22 = vadd.f32 1.0, %v5127_v0  ;;  %v7139_v0 = vld [vmem:[#allocation18_spill] sm:$0xff] }
 0x653   :  { %v2072_v36 = vadd.f32 1.0, %v5129_v28  ;;  %v5131_v58 = vpop.eup %5130  ;;  %v7140_v28 = vld [vmem:[#allocation19_spill] sm:$0xff] }
 0x654   :  { %5134 = vrcp.f32 %v2066_v22  ;;  %v5133_v4 = vpop.eup %5132  ;;  %v2079_v12 = vadd.f32 1.0, %v5131_v58  ;;  %v7141_v22 = vld [vmem:[#allocation20_spill] sm:$0xff]  ;;  %v7143_v58 = vld [vmem:[#allocation22_spill] sm:$0xff] }
 0x655   :  { %5136 = vrcp.f32 %v2072_v36  ;;  %v7142_v36 = vld [vmem:[#allocation21_spill] sm:$0xff] }
 0x656   :  { %5138 = vrcp.f32 %v2079_v12  ;;  %v7149_v12 = vld [vmem:[#allocation28_spill] sm:$0xff] }
 0x65e   :  { %v5135_v43 = vpop.eup %5134 }
 0x65f   :  { %v5137_v41 = vpop.eup %5136  ;;  %v2086_v27 = vmul.f32 %v5135_v43, %v5133_v4  ;;  %v7144_v4 = vld [vmem:[#allocation23_spill] sm:$0xff]  ;;  %v7145_v43 = vld [vmem:[#allocation24_spill] sm:$0xff] }
 0x660   :  { %v2085_v61 = vmul.f32 %v5137_v41, %v2083_v39  ;;  %v5139_v25 = vpop.eup %5138  ;;  %v7146_v39 = vld [vmem:[#allocation25_spill] sm:$0xff]  ;;  %v7147_v41 = vld [vmem:[#allocation26_spill] sm:$0xff] }
 0x662   :  { %v6281_v5 = vadd.f32 %v2086_v27, %v2085_v61  ;;  %v7148_v27 = vld [vmem:[#allocation27_spill] sm:$0xff]  ;;  %v7150_v61 = vld [vmem:[#allocation29_spill] sm:$0xff] }
 0x664   :  { %5140 = vtanh.f32 %v6281_v5 }
 0x66e   :  { %v5141_v20 = vpop.eup %5140 }
 0x66f   :  { %v2089_v17 = vmul.f32 %v5141_v20, %v5139_v25  ;;  %v7151_v25 = vld [vmem:[#allocation30_spill] sm:$0xff]  ;;  %v7152_v20 = vld [vmem:[#allocation31_spill] sm:$0xff] }
 0x671   :  { %2155 = vmatmul.mubr.f32.vlgmr.msra.gmra.mrb[22].mxu0 %v2089_v17  ;;  %2226 = vmatmul.mubr.f32.vlgmr.msra.gmra.mrb[22].mxu1 %v2089_v17 }
 0x672   :  { %4415 = vmatpush1.bf16.msra.mxu0 %v5473_v37  ;;  %4447 = vmatpush1.bf16.msra.mxu1 %v5475_v38 }
 0x673   :  { %4417 = vmatprep.subr.bf16.mxu0 %v5478_v45  ;;  %4449 = vmatprep.subr.bf16.mxu1 %v5480_v46 }
 0x674   :  { %2331 = vmatprep.mubr.f32.mxu0 %v6883_v23  ;;  %2402 = vmatprep.mubr.f32.mxu1 %v6883_v23 }
 0x676   :  { %4419 = vmatpush1.bf16.msra.mxu0 %v5486_v51  ;;  %4451 = vmatpush1.bf16.msra.mxu1 %v5488_v52 }
 0x677   :  { %4421 = vmatprep.subr.bf16.mxu0 %v5492_v55  ;;  %4453 = vmatprep.subr.bf16.mxu1 %v5494_v56 }
 0x67a   :  { %4423 = vmatpush1.bf16.msra.mxu0 %v5503_v2  ;;  %4455 = vmatpush1.bf16.msra.mxu1 %v5505_v3 }
 0x67b   :  { %4425 = vmatprep.subr.bf16.mxu0 %v5509_v7  ;;  %4457 = vmatprep.subr.bf16.mxu1 %v5511_v8 }
 0x67e   :  { %4427 = vmatpush1.bf16.msra.mxu0 %v5517_v15  ;;  %4459 = vmatpush1.bf16.msra.mxu1 %v5519_v16 }
 0x67f   :  { %4429 = vmatprep.subr.bf16.mxu0 %v5523_v19  ;;  %4461 = vmatprep.subr.bf16.mxu1 %v5525_v21 }
 0x682   :  { %4431 = vmatpush1.bf16.msra.mxu0 %v5529_v30  ;;  %4463 = vmatpush1.bf16.msra.mxu1 %v5531_v31 }
 0x683   :  { %4433 = vmatprep.subr.bf16.mxu0 %v5535_v34  ;;  %4465 = vmatprep.subr.bf16.mxu1 %v5537_v35 }
 0x686   :  { %4435 = vmatpush1.bf16.msra.mxu0 %v5541_v44  ;;  %4467 = vmatpush1.bf16.msra.mxu1 %v5543_v47 }
 0x687   :  { %4437 = vmatprep.subr.bf16.mxu0 %v5547_v50  ;;  %4469 = vmatprep.subr.bf16.mxu1 %v5549_v53 }
 0x68a   :  { %4439 = vmatpush1.bf16.msra.mxu0 %v5553_v62  ;;  %4471 = vmatpush1.bf16.msra.mxu1 %v5555_v63 }
 0x68b   :  { %4441 = vmatprep.subr.bf16.mxu0 %v5559_v6  ;;  %4473 = vmatprep.subr.bf16.mxu1 %v5561_v9 }
 0x68e   :  { %4443 = vmatpush1.bf16.msra.mxu0 %v5565_v13  ;;  %4475 = vmatpush1.bf16.msra.mxu1 %v5567_v14 }
 0x68f   :  { %4477 = vmatprep.subr.bf16.mxu0 %v5577_v24  ;;  %4541 = vmatprep.subr.bf16.mxu1 %v5579_v29 }
 0x691   :  { %2332 = vmatmul.mubr.f32.vlgmr.msra.gmra.mrb[24].mxu0 %v2089_v17  ;;  %2403 = vmatmul.mubr.f32.vlgmr.msra.gmra.mrb[24].mxu1 %v2089_v17  ;;  %v7153_v17 = vld [vmem:[#allocation32_spill] sm:$0xff] }
 0x692   :  { %4479 = vmatpush1.bf16.msra.mxu0 %v5581_v32  ;;  %4543 = vmatpush1.bf16.msra.mxu1 %v5584_v40 }
 0x693   :  { %4481 = vmatprep.subr.bf16.mxu0 %v5588_v48  ;;  %4545 = vmatprep.subr.bf16.mxu1 %v5590_v49 }
 0x696   :  { %4483 = vmatpush1.bf16.msra.mxu0 %v5593_v59  ;;  %4547 = vmatpush1.bf16.msra.mxu1 %v5597_v10 }
 0x697   :  { %4485 = vmatprep.subr.bf16.mxu0 %v5599_v11  ;;  %4549 = vmatprep.subr.bf16.mxu1 %v7073_v1  ;;  %v7199_v1 = vld [vmem:[#allocation83_spill] sm:$0xff] }
 0x69a   :  { %4487 = vmatpush1.bf16.msra.mxu0 %v7138_v33  ;;  %4551 = vmatpush1.bf16.msra.mxu1 %v7139_v0 }
 0x69b   :  { %4489 = vmatprep.subr.bf16.mxu0 %v7140_v28  ;;  %4553 = vmatprep.subr.bf16.mxu1 %v7141_v22  ;;  %v7198_v28 = vld [vmem:[#allocation82_spill] sm:$0xff] }
 0x69e   :  { %4491 = vmatpush1.bf16.msra.mxu0 %v7142_v36  ;;  %4555 = vmatpush1.bf16.msra.mxu1 %v7143_v58  ;;  %v7154_v58 = vld [vmem:[#allocation33_spill] sm:$0xff] }
 0x69f   :  { %4493 = vmatprep.subr.bf16.mxu0 %v7144_v4  ;;  %4557 = vmatprep.subr.bf16.mxu1 %v7145_v43  ;;  %v7155_v4 = vld [vmem:[#allocation34_spill] sm:$0xff]  ;;  %v7156_v43 = vld [vmem:[#allocation35_spill] sm:$0xff]  ;;  %v7197_v36 = vld [vmem:[#allocation81_spill] sm:$0xff] }
 0x6a2   :  { %4495 = vmatpush1.bf16.msra.mxu0 %v7146_v39  ;;  %4559 = vmatpush1.bf16.msra.mxu1 %v7147_v41  ;;  %v7157_v39 = vld [vmem:[#allocation36_spill] sm:$0xff]  ;;  %v7158_v41 = vld [vmem:[#allocation37_spill] sm:$0xff] }
 0x6a3   :  { %4497 = vmatprep.subr.bf16.mxu0 %v7148_v27  ;;  %4561 = vmatprep.subr.bf16.mxu1 %v7149_v12  ;;  %v7159_v27 = vld [vmem:[#allocation38_spill] sm:$0xff]  ;;  %v7160_v12 = vld [vmem:[#allocation39_spill] sm:$0xff] }
 0x6a6   :  { %4499 = vmatpush1.bf16.msra.mxu0 %v7150_v61  ;;  %4563 = vmatpush1.bf16.msra.mxu1 %v7151_v25  ;;  %v7161_v61 = vld [vmem:[#allocation40_spill] sm:$0xff]  ;;  %v7162_v25 = vld [vmem:[#allocation41_spill] sm:$0xff] }
 0x6a7   :  { %4501 = vmatprep.subr.bf16.mxu0 %v7152_v20  ;;  %4565 = vmatprep.subr.bf16.mxu1 %v7153_v17  ;;  %v7163_v20 = vld [vmem:[#allocation42_spill] sm:$0xff]  ;;  %v7164_v17 = vld [vmem:[#allocation43_spill] sm:$0xff] }
 0x6aa   :  { %4503 = vmatpush1.bf16.msra.mxu0 %v7154_v58  ;;  %4567 = vmatpush1.bf16.msra.mxu1 %v7155_v4  ;;  %v7165_v58 = vld [vmem:[#allocation44_spill] sm:$0xff]  ;;  %v7166_v4 = vld [vmem:[#allocation45_spill] sm:$0xff] }
 0x6ab   :  { %4505 = vmatprep.subr.bf16.mxu0 %v7156_v43  ;;  %4569 = vmatprep.subr.bf16.mxu1 %v7157_v39  ;;  %v7167_v43 = vld [vmem:[#allocation46_spill] sm:$0xff]  ;;  %v7168_v39 = vld [vmem:[#allocation47_spill] sm:$0xff] }
 0x6ae   :  { %4507 = vmatpush1.bf16.msra.mxu0 %v7158_v41  ;;  %4571 = vmatpush1.bf16.msra.mxu1 %v7159_v27  ;;  %v7169_v41 = vld [vmem:[#allocation48_spill] sm:$0xff]  ;;  %v7170_v27 = vld [vmem:[#allocation49_spill] sm:$0xff] }
 0x6af   :  { %4509 = vmatprep.subr.bf16.mxu0 %v7160_v12  ;;  %4573 = vmatprep.subr.bf16.mxu1 %v7161_v61  ;;  %v7171_v12 = vld [vmem:[#allocation50_spill] sm:$0xff]  ;;  %v7172_v61 = vld [vmem:[#allocation51_spill] sm:$0xff] }
 0x6b2   :  { %4511 = vmatpush1.bf16.msra.mxu0 %v7162_v25  ;;  %4575 = vmatpush1.bf16.msra.mxu1 %v7163_v20  ;;  %v7173_v25 = vld [vmem:[#allocation52_spill] sm:$0xff]  ;;  %v7174_v20 = vld [vmem:[#allocation53_spill] sm:$0xff] }
 0x6b3   :  { %4513 = vmatprep.subr.bf16.mxu0 %v7164_v17  ;;  %4577 = vmatprep.subr.bf16.mxu1 %v7165_v58  ;;  %v7175_v17 = vld [vmem:[#allocation54_spill] sm:$0xff]  ;;  %v7176_v58 = vld [vmem:[#allocation55_spill] sm:$0xff] }
 0x6b6   :  { %4515 = vmatpush1.bf16.msra.mxu0 %v7166_v4  ;;  %4579 = vmatpush1.bf16.msra.mxu1 %v7167_v43  ;;  %v7177_v4 = vld [vmem:[#allocation56_spill] sm:$0xff]  ;;  %v7178_v43 = vld [vmem:[#allocation57_spill] sm:$0xff] }
 0x6b7   :  { %4517 = vmatprep.subr.bf16.mxu0 %v7168_v39  ;;  %4581 = vmatprep.subr.bf16.mxu1 %v7169_v41  ;;  %v7179_v39 = vld [vmem:[#allocation58_spill] sm:$0xff]  ;;  %v7180_v41 = vld [vmem:[#allocation59_spill] sm:$0xff] }
 0x6ba   :  { %4519 = vmatpush1.bf16.msra.mxu0 %v7170_v27  ;;  %4583 = vmatpush1.bf16.msra.mxu1 %v7171_v12  ;;  %v7181_v27 = vld [vmem:[#allocation60_spill] sm:$0xff]  ;;  %v7182_v12 = vld [vmem:[#allocation61_spill] sm:$0xff] }
 0x6bb   :  { %4521 = vmatprep.subr.bf16.mxu0 %v7172_v61  ;;  %4585 = vmatprep.subr.bf16.mxu1 %v7173_v25  ;;  %v7183_v61 = vld [vmem:[#allocation62_spill] sm:$0xff]  ;;  %v7184_v25 = vld [vmem:[#allocation63_spill] sm:$0xff] }
 0x6be   :  { %4523 = vmatpush1.bf16.msra.mxu0 %v7174_v20  ;;  %4587 = vmatpush1.bf16.msra.mxu1 %v7175_v17  ;;  %v7185_v20 = vld [vmem:[#allocation64_spill] sm:$0xff]  ;;  %v7186_v17 = vld [vmem:[#allocation65_spill] sm:$0xff] }
 0x6bf   :  { %4525 = vmatprep.subr.bf16.mxu0 %v7176_v58  ;;  %4589 = vmatprep.subr.bf16.mxu1 %v7177_v4  ;;  %v7187_v58 = vld [vmem:[#allocation66_spill] sm:$0xff]  ;;  %v7188_v4 = vld [vmem:[#allocation67_spill] sm:$0xff] }
 0x6c2   :  { %4527 = vmatpush1.bf16.msra.mxu0 %v7178_v43  ;;  %4591 = vmatpush1.bf16.msra.mxu1 %v7179_v39  ;;  %v7189_v43 = vld [vmem:[#allocation68_spill] sm:$0xff]  ;;  %v7190_v39 = vld [vmem:[#allocation69_spill] sm:$0xff] }
 0x6c3   :  { %4529 = vmatprep.subr.bf16.mxu0 %v7180_v41  ;;  %4593 = vmatprep.subr.bf16.mxu1 %v7181_v27  ;;  %v7191_v41 = vld [vmem:[#allocation70_spill] sm:$0xff]  ;;  %v7192_v27 = vld [vmem:[#allocation12_spill] sm:$0xff] }
 0x6c6   :  { %4531 = vmatpush1.bf16.msra.mxu0 %v7182_v12  ;;  %4595 = vmatpush1.bf16.msra.mxu1 %v7183_v61  ;;  %v7193_v12 = vld [vmem:[#allocation13_spill] sm:$0xff] }
 0x6c7   :  { %4533 = vmatprep.subr.bf16.mxu0 %v7184_v25  ;;  %4597 = vmatprep.subr.bf16.mxu1 %v7185_v20  ;;  %v6385_v20 = vld [vmem:[%s6658_s1] sm:$0x3]  ;;  %v7196_v25 = vld [vmem:[#allocation80_spill] sm:$0xff]  ;;  %s5357_s1 = smov [#allocation8]  }
 0x6c8   :  { %7194 = vst [vmem:[#allocation84_spill] sm:$0xff] %v6385_v20  ;;  %vm2629_vm13 = vcmp.eq.s32.totalorder %v6385_v20, 5  ;;  %s3382_s18 = sshll.u32 %s5357_s1, 4  ;;  %s3383_s18 = int_to_ptr.vmem [resolvable:$true] %s3382_s18 }
 0x6c9   :  { %s5322_s19 = scalar_lea.vmem %s3383_s18, 32  ;;  %p5327_p11 = scmp.lt.s32.totalorder %s3383_s18, %s3383_s18 }
 0x6ca   :  { %4535 = vmatpush1.bf16.msra.mxu0 %v7186_v17  ;;  %4599 = vmatpush1.bf16.msra.mxu1 %v7187_v58  ;;  %v7195_v58 = vmov 0   ;;  %p5323_p10 = scmp.ne.s32.totalorder %s3383_s18, %s5322_s19  ;;  %p5328_p12 = scmp.lt.s32.totalorder %s5322_s19, %s5322_s19 }
 0x6cb   :  { %4537 = vmatprep.subr.bf16.mxu0 %v7188_v4  ;;  %4601 = vmatprep.subr.bf16.mxu1 %v7189_v43  ;;  %v2630_v17 = vsel %vm2629_vm13, 1, %v7195_v58 }
 0x6cc   :  { %2632 = vperm.xlu1 %4997, %v2630_v17   ;;  %p5329_p13 = por %p5328_p12, %p5327_p11 }
 0x6ce   :  { %4539 = vmatpush1.bf16.msra.mxu0 %v7190_v39  ;;  %4603 = vmatpush1.bf16.msra.mxu1 %v7191_v41  ;;  %p5330_p0 = pnand %p5329_p13, %p5323_p10 }
 0x6cf   :  { %4605 = vmatprep.subr.bf16.mxu0 %v7192_v27  ;;  %4637 = vmatprep.subr.bf16.mxu1 %v7193_v12 }
 0x744   :  { %v2156_v4 = vpop.f32.mrb[22].mxu0  ;;  %v2227_v43 = vpop.f32.mrb[22].mxu1 }
 0x745   :  { %v2232_v39 = vadd.f32 %v2156_v4, %v7196_v25  ;;  %v2158_v61 = vpop.f32.mrb[23].mxu0  ;;  %v2229_v41 = vpop.f32.mrb[23].mxu1  ;;  %v2234_v20 = vadd.f32 %v2227_v43, %v7199_v1 }
 0x746   :  { %v2233_v27 = vadd.f32 %v2158_v61, %v7197_v36  ;;  %v2235_v0 = vadd.f32 %v2229_v41, %v7198_v28 }
 0x747   :  { %v3423_v22 = vmul.f32 -1.442695, %v2232_v39 }
 0x748   :  { %v3424_v12 = vmul.f32 -1.442695, %v2233_v27  ;;  %v3425_v33 = vmul.f32 -1.442695, %v2235_v0 }
 0x749   :  { %5142 = vpow2.f32 %v3423_v22 }
 0x74a   :  { %5144 = vpow2.f32 %v3424_v12 }
 0x74b   :  { %5146 = vpow2.f32 %v3425_v33 }
 0x74c   :  { %5148 = vtanh.f32 %v2234_v20 }
 0x753   :  { %v5143_v11 = vpop.eup %5142 }
 0x754   :  { %v5145_v58 = vpop.eup %5144  ;;  %v2239_v17 = vadd.f32 1.0, %v5143_v11 }
 0x755   :  { %v2245_v10 = vadd.f32 1.0, %v5145_v58  ;;  %v5147_v4 = vpop.eup %5146 }
 0x756   :  { %5150 = vrcp.f32 %v2239_v17  ;;  %v5149_v25 = vpop.eup %5148  ;;  %v2252_v22 = vadd.f32 1.0, %v5147_v4 }
 0x757   :  { %5152 = vrcp.f32 %v2245_v10 }
 0x758   :  { %5154 = vrcp.f32 %v2252_v22  ;;  %v2264_v22 = vpop.permute.xlu0 %2263 }
 0x759   :  { %vm2265_vm14 = vcmp.eq.s32.totalorder %v2264_v22, 1 }
 0x760   :  { %v5151_v61 = vpop.eup %5150 }
 0x761   :  { %v5153_v39 = vpop.eup %5152  ;;  %v2256_v27 = vmul.f32 %v5151_v61, %v5149_v25 }
 0x762   :  { %v2255_v12 = vmul.f32 %v5153_v39, %v6270_v54 }
 0x764   :  { %v6394_v41 = vadd.f32 %v2256_v27, %v2255_v12  ;;  %v2333_v0 = vpop.f32.mrb[24].mxu0  ;;  %v2404_v43 = vpop.f32.mrb[24].mxu1 }
 0x765   :  { %v2413_v1 = vrot.slane %v2333_v0, 6  ;;  %v2415_v11 = vrot.slane %v2404_v43, 6  ;;  %v2335_v33 = vpop.f32.mrb[25].mxu0  ;;  %v2406_v20 = vpop.f32.mrb[25].mxu1 }
 0x766   :  { %v2414_v58 = vrot.slane %v2335_v33, 6  ;;  %v2416_v17 = vrot.slane %v2406_v20, 6  ;;  %5156 = vtanh.f32 %v6394_v41  ;;  %v5155_v27 = vpop.eup %5154 }
 0x767   :  { %v2421_v10 = vadd.f32 %v2413_v1, %v7134_v26  ;;  %v2423_v25 = vadd.f32 %v2415_v11, %v7135_v18 }
 0x768   :  { %v2422_v4 = vadd.f32 %v2414_v58, %v7136_v60  ;;  %v2424_v54 = vadd.f32 %v2416_v17, %v7137_v42 }
 0x769   :  { %v3426_v61 = vmul.f32 -1.442695, %v2421_v10 }
 0x76a   :  { %v3427_v39 = vmul.f32 -1.442695, %v2422_v4  ;;  %v3428_v43 = vmul.f32 -1.442695, %v2424_v54  ;;  %v2445_v54 = vrot.slane %v6281_v5, 6  ;;  %v7200_v5 = vld [vmem:[#allocation14_spill] sm:$0xff] }
 0x76b   :  { %5158 = vpow2.f32 %v3426_v61 }
 0x76c   :  { %5160 = vpow2.f32 %v3427_v39 }
 0x76d   :  { %5162 = vpow2.f32 %v3428_v43 }
 0x76e   :  { %5164 = vtanh.f32 %v2423_v25 }
 0x770   :  { %v5157_v12 = vpop.eup %5156 }
 0x771   :  { %v2259_v0 = vmul.f32 %v5157_v12, %v5155_v27 }
 0x773   :  { %v2453_v33 = vrot.slane %v2259_v0, 6  ;;  %v6402_v20 = vsel %vm2265_vm14, %v2259_v0, %v6278_v57 }
 0x775   :  { %v5159_v1 = vpop.eup %5158  ;;  %v2456_v11 = vrot.slane %v2453_v33, 2  ;;  %v7201_v33 = vld [vmem:[#allocation15_spill] sm:$0xff] }
 0x776   :  { %v5161_v18 = vpop.eup %5160  ;;  %v2428_v58 = vadd.f32 1.0, %v5159_v1  ;;  %v7202_v1 = vld [vmem:[#allocation16_spill] sm:$0xff] }
 0x777   :  { %v2434_v17 = vadd.f32 1.0, %v5161_v18  ;;  %2523 = vmatprep.mubr.f32.mxu0 %v2456_v11  ;;  %2594 = vmatprep.mubr.f32.mxu1 %v2456_v11  ;;  %v5163_v10 = vpop.eup %5162  ;;  %v7203_v11 = vld [vmem:[#allocation17_spill] sm:$0xff] }
 0x778   :  { %5166 = vrcp.f32 %v2428_v58  ;;  %v5165_v4 = vpop.eup %5164  ;;  %v2441_v57 = vadd.f32 1.0, %v5163_v10  ;;  %v7204_v58 = vld [vmem:[#allocation18_spill] sm:$0xff]  ;;  %v7206_v10 = vld [vmem:[#allocation20_spill] sm:$0xff] }
 0x779   :  { %5168 = vrcp.f32 %v2434_v17  ;;  %v7205_v17 = vld [vmem:[#allocation19_spill] sm:$0xff] }
 0x77a   :  { %5170 = vrcp.f32 %v2441_v57  ;;  %v7212_v57 = vld [vmem:[#allocation26_spill] sm:$0xff] }
 0x782   :  { %v5167_v61 = vpop.eup %5166 }
 0x783   :  { %v5169_v39 = vpop.eup %5168  ;;  %v2448_v27 = vmul.f32 %v5167_v61, %v5165_v4  ;;  %v7207_v4 = vld [vmem:[#allocation21_spill] sm:$0xff]  ;;  %v7208_v61 = vld [vmem:[#allocation22_spill] sm:$0xff] }
 0x784   :  { %v2447_v22 = vmul.f32 %v5169_v39, %v2445_v54  ;;  %v5171_v25 = vpop.eup %5170  ;;  %v7209_v54 = vld [vmem:[#allocation23_spill] sm:$0xff]  ;;  %v7210_v39 = vld [vmem:[#allocation24_spill] sm:$0xff] }
 0x786   :  { %v6405_v12 = vadd.f32 %v2448_v27, %v2447_v22  ;;  %v7211_v27 = vld [vmem:[#allocation25_spill] sm:$0xff]  ;;  %v7213_v22 = vld [vmem:[#allocation27_spill] sm:$0xff] }
 0x788   :  { %5172 = vtanh.f32 %v6405_v12 }
 0x792   :  { %v5173_v18 = vpop.eup %5172 }
 0x793   :  { %v2451_v0 = vmul.f32 %v5173_v18, %v5171_v25  ;;  %v7214_v25 = vld [vmem:[#allocation28_spill] sm:$0xff]  ;;  %v7215_v18 = vld [vmem:[#allocation29_spill] sm:$0xff] }
 0x795   :  { %v2455_v43 = vrot.slane %v2451_v0, 2  ;;  %v7216_v0 = vld [vmem:[#allocation30_spill] sm:$0xff] }
 0x797   :  { %2524 = vmatmul.mubr.f32.vlgmr.msra.gmra.mrb[26].mxu0 %v2455_v43  ;;  %2595 = vmatmul.mubr.f32.vlgmr.msra.gmra.mrb[26].mxu1 %v2455_v43 }
 0x798   :  { %4607 = vmatpush1.bf16.msra.mxu0 %v5473_v37  ;;  %4639 = vmatpush1.bf16.msra.mxu1 %v5475_v38 }
 0x799   :  { %4609 = vmatprep.subr.bf16.mxu0 %v5478_v45  ;;  %4641 = vmatprep.subr.bf16.mxu1 %v5480_v46 }
 0x79a   :  { %2700 = vmatprep.mubr.f32.mxu0 %v6883_v23  ;;  %2771 = vmatprep.mubr.f32.mxu1 %v6883_v23 }
 0x79c   :  { %4611 = vmatpush1.bf16.msra.mxu0 %v5486_v51  ;;  %4643 = vmatpush1.bf16.msra.mxu1 %v5488_v52 }
 0x79d   :  { %4613 = vmatprep.subr.bf16.mxu0 %v5492_v55  ;;  %4645 = vmatprep.subr.bf16.mxu1 %v5494_v56 }
 0x7a0   :  { %4615 = vmatpush1.bf16.msra.mxu0 %v5503_v2  ;;  %4647 = vmatpush1.bf16.msra.mxu1 %v5505_v3 }
 0x7a1   :  { %4617 = vmatprep.subr.bf16.mxu0 %v5509_v7  ;;  %4649 = vmatprep.subr.bf16.mxu1 %v5511_v8 }
 0x7a4   :  { %4619 = vmatpush1.bf16.msra.mxu0 %v5517_v15  ;;  %4651 = vmatpush1.bf16.msra.mxu1 %v5519_v16 }
 0x7a5   :  { %4621 = vmatprep.subr.bf16.mxu0 %v5523_v19  ;;  %4653 = vmatprep.subr.bf16.mxu1 %v5525_v21 }
 0x7a8   :  { %4623 = vmatpush1.bf16.msra.mxu0 %v5529_v30  ;;  %4655 = vmatpush1.bf16.msra.mxu1 %v5531_v31 }
 0x7a9   :  { %4625 = vmatprep.subr.bf16.mxu0 %v5535_v34  ;;  %4657 = vmatprep.subr.bf16.mxu1 %v5537_v35 }
 0x7ac   :  { %4627 = vmatpush1.bf16.msra.mxu0 %v5541_v44  ;;  %4659 = vmatpush1.bf16.msra.mxu1 %v5543_v47 }
 0x7ad   :  { %4629 = vmatprep.subr.bf16.mxu0 %v5547_v50  ;;  %4661 = vmatprep.subr.bf16.mxu1 %v5549_v53 }
 0x7b0   :  { %4631 = vmatpush1.bf16.msra.mxu0 %v5553_v62  ;;  %4663 = vmatpush1.bf16.msra.mxu1 %v5555_v63 }
 0x7b1   :  { %4633 = vmatprep.subr.bf16.mxu0 %v5559_v6  ;;  %4665 = vmatprep.subr.bf16.mxu1 %v5561_v9 }
 0x7b4   :  { %4635 = vmatpush1.bf16.msra.mxu0 %v5565_v13  ;;  %4667 = vmatpush1.bf16.msra.mxu1 %v5567_v14 }
 0x7b5   :  { %4669 = vmatprep.subr.bf16.mxu0 %v5577_v24  ;;  %4733 = vmatprep.subr.bf16.mxu1 %v5579_v29 }
 0x7b7   :  { %2701 = vmatmul.mubr.f32.vlgmr.msra.gmra.mrb[28].mxu0 %v2455_v43  ;;  %2772 = vmatmul.mubr.f32.vlgmr.msra.gmra.mrb[28].mxu1 %v2455_v43  ;;  %v7217_v43 = vld [vmem:[#allocation31_spill] sm:$0xff] }
 0x7b8   :  { %4671 = vmatpush1.bf16.msra.mxu0 %v5581_v32  ;;  %4735 = vmatpush1.bf16.msra.mxu1 %v5584_v40 }
 0x7b9   :  { %4673 = vmatprep.subr.bf16.mxu0 %v5588_v48  ;;  %4737 = vmatprep.subr.bf16.mxu1 %v5590_v49 }
 0x7bc   :  { %4675 = vmatpush1.bf16.msra.mxu0 %v5593_v59  ;;  %4739 = vmatpush1.bf16.msra.mxu1 %v7200_v5 }
 0x7bd   :  { %4677 = vmatprep.subr.bf16.mxu0 %v7201_v33  ;;  %4741 = vmatprep.subr.bf16.mxu1 %v7202_v1 }
 0x7c0   :  { %4679 = vmatpush1.bf16.msra.mxu0 %v7203_v11  ;;  %4743 = vmatpush1.bf16.msra.mxu1 %v7204_v58 }
 0x7c1   :  { %4681 = vmatprep.subr.bf16.mxu0 %v7205_v17  ;;  %4745 = vmatprep.subr.bf16.mxu1 %v7206_v10  ;;  %v7259_v10 = vld [vmem:[#allocation80_spill] sm:$0xff] }
 0x7c4   :  { %4683 = vmatpush1.bf16.msra.mxu0 %v7207_v4  ;;  %4747 = vmatpush1.bf16.msra.mxu1 %v7208_v61  ;;  %v7218_v4 = vld [vmem:[#allocation32_spill] sm:$0xff]  ;;  %v7219_v61 = vld [vmem:[#allocation33_spill] sm:$0xff] }
 0x7c5   :  { %4685 = vmatprep.subr.bf16.mxu0 %v7209_v54  ;;  %4749 = vmatprep.subr.bf16.mxu1 %v7210_v39  ;;  %v7220_v54 = vld [vmem:[#allocation34_spill] sm:$0xff]  ;;  %v7221_v39 = vld [vmem:[#allocation35_spill] sm:$0xff] }
 0x7c8   :  { %4687 = vmatpush1.bf16.msra.mxu0 %v7211_v27  ;;  %4751 = vmatpush1.bf16.msra.mxu1 %v7212_v57  ;;  %v7222_v27 = vld [vmem:[#allocation36_spill] sm:$0xff]  ;;  %v7223_v57 = vld [vmem:[#allocation37_spill] sm:$0xff] }
 0x7c9   :  { %4689 = vmatprep.subr.bf16.mxu0 %v7213_v22  ;;  %4753 = vmatprep.subr.bf16.mxu1 %v7214_v25  ;;  %v7224_v22 = vld [vmem:[#allocation38_spill] sm:$0xff]  ;;  %v7225_v25 = vld [vmem:[#allocation39_spill] sm:$0xff] }
 0x7cc   :  { %4691 = vmatpush1.bf16.msra.mxu0 %v7215_v18  ;;  %4755 = vmatpush1.bf16.msra.mxu1 %v7216_v0  ;;  %v7226_v18 = vld [vmem:[#allocation40_spill] sm:$0xff]  ;;  %v7227_v0 = vld [vmem:[#allocation41_spill] sm:$0xff] }
 0x7cd   :  { %4693 = vmatprep.subr.bf16.mxu0 %v7217_v43  ;;  %4757 = vmatprep.subr.bf16.mxu1 %v7218_v4  ;;  %v7228_v43 = vld [vmem:[#allocation42_spill] sm:$0xff]  ;;  %v7229_v4 = vld [vmem:[#allocation43_spill] sm:$0xff] }
 0x7d0   :  { %4695 = vmatpush1.bf16.msra.mxu0 %v7219_v61  ;;  %4759 = vmatpush1.bf16.msra.mxu1 %v7220_v54  ;;  %v7230_v61 = vld [vmem:[#allocation44_spill] sm:$0xff]  ;;  %v7231_v54 = vld [vmem:[#allocation45_spill] sm:$0xff] }
 0x7d1   :  { %4697 = vmatprep.subr.bf16.mxu0 %v7221_v39  ;;  %4761 = vmatprep.subr.bf16.mxu1 %v7222_v27  ;;  %v7232_v39 = vld [vmem:[#allocation46_spill] sm:$0xff]  ;;  %v7233_v27 = vld [vmem:[#allocation47_spill] sm:$0xff] }
 0x7d4   :  { %4699 = vmatpush1.bf16.msra.mxu0 %v7223_v57  ;;  %4763 = vmatpush1.bf16.msra.mxu1 %v7224_v22  ;;  %v7234_v57 = vld [vmem:[#allocation48_spill] sm:$0xff]  ;;  %v7235_v22 = vld [vmem:[#allocation49_spill] sm:$0xff] }
 0x7d5   :  { %4701 = vmatprep.subr.bf16.mxu0 %v7225_v25  ;;  %4765 = vmatprep.subr.bf16.mxu1 %v7226_v18  ;;  %v7236_v25 = vld [vmem:[#allocation50_spill] sm:$0xff]  ;;  %v7237_v18 = vld [vmem:[#allocation51_spill] sm:$0xff] }
 0x7d8   :  { %4703 = vmatpush1.bf16.msra.mxu0 %v7227_v0  ;;  %4767 = vmatpush1.bf16.msra.mxu1 %v7228_v43  ;;  %v7238_v0 = vld [vmem:[#allocation52_spill] sm:$0xff]  ;;  %v7239_v43 = vld [vmem:[#allocation53_spill] sm:$0xff] }
 0x7d9   :  { %4705 = vmatprep.subr.bf16.mxu0 %v7229_v4  ;;  %4769 = vmatprep.subr.bf16.mxu1 %v7230_v61  ;;  %v7240_v4 = vld [vmem:[#allocation54_spill] sm:$0xff]  ;;  %v7241_v61 = vld [vmem:[#allocation55_spill] sm:$0xff] }
 0x7dc   :  { %4707 = vmatpush1.bf16.msra.mxu0 %v7231_v54  ;;  %4771 = vmatpush1.bf16.msra.mxu1 %v7232_v39  ;;  %v7242_v54 = vld [vmem:[#allocation56_spill] sm:$0xff]  ;;  %v7243_v39 = vld [vmem:[#allocation57_spill] sm:$0xff] }
 0x7dd   :  { %4709 = vmatprep.subr.bf16.mxu0 %v7233_v27  ;;  %4773 = vmatprep.subr.bf16.mxu1 %v7234_v57  ;;  %v7244_v27 = vld [vmem:[#allocation58_spill] sm:$0xff]  ;;  %v7245_v57 = vld [vmem:[#allocation59_spill] sm:$0xff] }
 0x7e0   :  { %4711 = vmatpush1.bf16.msra.mxu0 %v7235_v22  ;;  %4775 = vmatpush1.bf16.msra.mxu1 %v7236_v25  ;;  %v7246_v22 = vld [vmem:[#allocation60_spill] sm:$0xff]  ;;  %v7247_v25 = vld [vmem:[#allocation61_spill] sm:$0xff] }
 0x7e1   :  { %4713 = vmatprep.subr.bf16.mxu0 %v7237_v18  ;;  %4777 = vmatprep.subr.bf16.mxu1 %v7238_v0  ;;  %v7248_v18 = vld [vmem:[#allocation62_spill] sm:$0xff]  ;;  %v7249_v0 = vld [vmem:[#allocation63_spill] sm:$0xff] }
 0x7e4   :  { %4715 = vmatpush1.bf16.msra.mxu0 %v7239_v43  ;;  %4779 = vmatpush1.bf16.msra.mxu1 %v7240_v4  ;;  %v7250_v43 = vld [vmem:[#allocation64_spill] sm:$0xff]  ;;  %v7251_v4 = vld [vmem:[#allocation65_spill] sm:$0xff] }
 0x7e5   :  { %4717 = vmatprep.subr.bf16.mxu0 %v7241_v61  ;;  %4781 = vmatprep.subr.bf16.mxu1 %v7242_v54  ;;  %v7252_v61 = vld [vmem:[#allocation66_spill] sm:$0xff]  ;;  %v7253_v54 = vld [vmem:[#allocation67_spill] sm:$0xff] }
 0x7e8   :  { %4719 = vmatpush1.bf16.msra.mxu0 %v7243_v39  ;;  %4783 = vmatpush1.bf16.msra.mxu1 %v7244_v27  ;;  %v7254_v39 = vld [vmem:[#allocation68_spill] sm:$0xff]  ;;  %v7255_v27 = vld [vmem:[#allocation69_spill] sm:$0xff] }
 0x7e9   :  { %4721 = vmatprep.subr.bf16.mxu0 %v7245_v57  ;;  %4785 = vmatprep.subr.bf16.mxu1 %v7246_v22  ;;  %v7256_v57 = vld [vmem:[#allocation70_spill] sm:$0xff]  ;;  %v7257_v22 = vld [vmem:[#allocation12_spill] sm:$0xff] }
 0x7ec   :  { %4723 = vmatpush1.bf16.msra.mxu0 %v7247_v25  ;;  %4787 = vmatpush1.bf16.msra.mxu1 %v7248_v18  ;;  %v7258_v25 = vld [vmem:[#allocation13_spill] sm:$0xff] }
 0x7ed   :  { %4725 = vmatprep.subr.bf16.mxu0 %v7249_v0  ;;  %4789 = vmatprep.subr.bf16.mxu1 %v7250_v43 }
 0x7f0   :  { %4727 = vmatpush1.bf16.msra.mxu0 %v7251_v4  ;;  %4791 = vmatpush1.bf16.msra.mxu1 %v7252_v61 }
 0x7f1   :  { %4729 = vmatprep.subr.bf16.mxu0 %v7253_v54  ;;  %4793 = vmatprep.subr.bf16.mxu1 %v7254_v39 }
 0x7f4   :  { %4731 = vmatpush1.bf16.msra.mxu0 %v7255_v27  ;;  %4795 = vmatpush1.bf16.msra.mxu1 %v7256_v57  ;;  %v7260_v57 = vld [vmem:[#allocation83_spill] sm:$0xff] }
 0x7f5   :  { %4797 = vmatprep.subr.bf16.mxu0 %v7257_v22  ;;  %4829 = vmatprep.subr.bf16.mxu1 %v7258_v25 }
 0x86a   :  { %v2525_v18 = vpop.f32.mrb[26].mxu0  ;;  %v2596_v0 = vpop.f32.mrb[26].mxu1 }
 0x86b   :  { %v2601_v43 = vadd.f32 %v2525_v18, %v7259_v10  ;;  %v2527_v17 = vpop.f32.mrb[27].mxu0  ;;  %v2598_v4 = vpop.f32.mrb[27].mxu1  ;;  %v2603_v11 = vadd.f32 %v2596_v0, %v7260_v57 }
 0x86c   :  { %v2602_v61 = vadd.f32 %v2527_v17, %v7197_v36  ;;  %v2604_v27 = vadd.f32 %v2598_v4, %v7198_v28  ;;  %v7261_v28 = vld [vmem:[#allocation76_spill] sm:$0xff] }
 0x86d   :  { %v3429_v58 = vmul.f32 -1.442695, %v2601_v43 }
 0x86e   :  { %v3430_v54 = vmul.f32 -1.442695, %v2602_v61  ;;  %v3431_v39 = vmul.f32 -1.442695, %v2604_v27 }
 0x86f   :  { %5174 = vpow2.f32 %v3429_v58 }
 0x870   :  { %5176 = vpow2.f32 %v3430_v54 }
 0x871   :  { %5178 = vpow2.f32 %v3431_v39 }
 0x872   :  { %5180 = vtanh.f32 %v2603_v11 }
 0x879   :  { %v5175_v22 = vpop.eup %5174 }
 0x87a   :  { %v5177_v1 = vpop.eup %5176  ;;  %v2608_v25 = vadd.f32 1.0, %v5175_v22 }
 0x87b   :  { %v2614_v33 = vadd.f32 1.0, %v5177_v1  ;;  %v5179_v18 = vpop.eup %5178 }
 0x87c   :  { %5182 = vrcp.f32 %v2608_v25  ;;  %v5181_v10 = vpop.eup %5180  ;;  %v2621_v58 = vadd.f32 1.0, %v5179_v18 }
 0x87d   :  { %5184 = vrcp.f32 %v2614_v33 }
 0x87e   :  { %5186 = vrcp.f32 %v2621_v58 }
 0x886   :  { %v5183_v17 = vpop.eup %5182 }
 0x887   :  { %v5185_v43 = vpop.eup %5184  ;;  %v2625_v61 = vmul.f32 %v5183_v17, %v5181_v10 }
 0x888   :  { %v2624_v54 = vmul.f32 %v5185_v43, %v6394_v41  ;;  %v5187_v58 = vpop.eup %5186 }
 0x88a   :  { %v6511_v4 = vadd.f32 %v2625_v61, %v2624_v54  ;;  %v2702_v27 = vpop.f32.mrb[28].mxu0  ;;  %v2773_v0 = vpop.f32.mrb[28].mxu1 }
 0x88b   :  { %v2782_v57 = vrot.slane %v2702_v27, 4  ;;  %v2784_v22 = vrot.slane %v2773_v0, 4  ;;  %v2704_v39 = vpop.f32.mrb[29].mxu0  ;;  %v2775_v11 = vpop.f32.mrb[29].mxu1 }
 0x88c   :  { %v2783_v1 = vrot.slane %v2704_v39, 4  ;;  %v2785_v25 = vrot.slane %v2775_v11, 4  ;;  %5188 = vtanh.f32 %v6511_v4  ;;  %v2633_v61 = vpop.permute.xlu1 %2632 }
 0x88d   :  { %v2790_v33 = vadd.f32 %v2782_v57, %v7134_v26  ;;  %v2792_v10 = vadd.f32 %v2784_v22, %v7261_v28  ;;  %vm2634_vm15 = vcmp.eq.s32.totalorder %v2633_v61, 1 }
 0x88e   :  { %v2791_v18 = vadd.f32 %v2783_v1, %v7136_v60  ;;  %v2793_v41 = vadd.f32 %v2785_v25, %v7137_v42 }
 0x88f   :  { %v3432_v17 = vmul.f32 -1.442695, %v2790_v33 }
 0x890   :  { %v3433_v43 = vmul.f32 -1.442695, %v2791_v18  ;;  %v3434_v0 = vmul.f32 -1.442695, %v2793_v41  ;;  %v2814_v41 = vrot.slane %v6405_v12, 6  ;;  %v7300_v12 = vld [vmem:[#allocation53_spill] sm:$0xff] }
 0x891   :  { %5190 = vpow2.f32 %v3432_v17 }
 0x892   :  { %5192 = vpow2.f32 %v3433_v43 }
 0x893   :  { %5194 = vpow2.f32 %v3434_v0 }
 0x894   :  { %5196 = vtanh.f32 %v2792_v10 }
 0x896   :  { %v5189_v54 = vpop.eup %5188 }
 0x897   :  { %v2628_v27 = vmul.f32 %v5189_v54, %v5187_v58 }
 0x899   :  { %v6519_v39 = vsel %vm2634_vm15, %v2628_v27, %v6402_v20  ;;  %v2822_v57 = vrot.slane %v2628_v27, 4 }
 0x89b   :  { %v5191_v11 = vpop.eup %5190  ;;  %v2825_v22 = vrot.slane %v2822_v57, 4  ;;  %v7302_v57 = vld [vmem:[#allocation55_spill] sm:$0xff] }
 0x89c   :  { %v5193_v28 = vpop.eup %5192  ;;  %v2797_v1 = vadd.f32 1.0, %v5191_v11  ;;  %v7303_v11 = vld [vmem:[#allocation56_spill] sm:$0xff] }
 0x89d   :  { %v2803_v25 = vadd.f32 1.0, %v5193_v28  ;;  %2892 = vmatprep.mubr.f32.mxu0 %v2825_v22  ;;  %2963 = vmatprep.mubr.f32.mxu1 %v2825_v22  ;;  %v5195_v33 = vpop.eup %5194  ;;  %v7304_v22 = vld [vmem:[#allocation57_spill] sm:$0xff] }
 0x89e   :  { %5198 = vrcp.f32 %v2797_v1  ;;  %v5197_v18 = vpop.eup %5196  ;;  %v2810_v61 = vadd.f32 1.0, %v5195_v33  ;;  %v7305_v1 = vld [vmem:[#allocation58_spill] sm:$0xff]  ;;  %v7307_v33 = vld [vmem:[#allocation60_spill] sm:$0xff] }
 0x89f   :  { %5200 = vrcp.f32 %v2803_v25  ;;  %v7306_v25 = vld [vmem:[#allocation59_spill] sm:$0xff] }
 0x8a0   :  { %5202 = vrcp.f32 %v2810_v61  ;;  %v7313_v61 = vld [vmem:[#allocation66_spill] sm:$0xff] }
 0x8a8   :  { %v5199_v17 = vpop.eup %5198 }
 0x8a9   :  { %v5201_v43 = vpop.eup %5200  ;;  %v2817_v20 = vmul.f32 %v5199_v17, %v5197_v18  ;;  %v7308_v18 = vld [vmem:[#allocation61_spill] sm:$0xff]  ;;  %v7309_v17 = vld [vmem:[#allocation62_spill] sm:$0xff] }
 0x8aa   :  { %v2816_v58 = vmul.f32 %v5201_v43, %v2814_v41  ;;  %v5203_v10 = vpop.eup %5202  ;;  %v7310_v41 = vld [vmem:[#allocation63_spill] sm:$0xff]  ;;  %v7311_v43 = vld [vmem:[#allocation64_spill] sm:$0xff] }
 0x8ac   :  { %v6522_v54 = vadd.f32 %v2817_v20, %v2816_v58  ;;  %v7312_v20 = vld [vmem:[#allocation65_spill] sm:$0xff]  ;;  %v7314_v58 = vld [vmem:[#allocation67_spill] sm:$0xff] }
 0x8ae   :  { %5204 = vtanh.f32 %v6522_v54 }
 0x8b8   :  { %v5205_v28 = vpop.eup %5204 }
 0x8b9   :  { %v2820_v27 = vmul.f32 %v5205_v28, %v5203_v10  ;;  %v7315_v10 = vld [vmem:[#allocation68_spill] sm:$0xff]  ;;  %v7316_v28 = vld [vmem:[#allocation69_spill] sm:$0xff] }
 0x8bb   :  { %v2824_v0 = vrot.slane %v2820_v27, 4  ;;  %v7317_v27 = vld [vmem:[#allocation70_spill] sm:$0xff] }
 0x8bd   :  { %2893 = vmatmul.mubr.f32.vlgmr.msra.gmra.mrb[30].mxu0 %v2824_v0  ;;  %2964 = vmatmul.mubr.f32.vlgmr.msra.gmra.mrb[30].mxu1 %v2824_v0 }
 0x8be   :  { %4799 = vmatpush1.bf16.msra.mxu0 %v5473_v37  ;;  %4831 = vmatpush1.bf16.msra.mxu1 %v5475_v38  ;;  %v7262_v37 = vld [vmem:[#allocation15_spill] sm:$0xff]  ;;  %v7263_v38 = vld [vmem:[#allocation16_spill] sm:$0xff] }
 0x8bf   :  { %4801 = vmatprep.subr.bf16.mxu0 %v5478_v45  ;;  %4833 = vmatprep.subr.bf16.mxu1 %v5480_v46  ;;  %v7264_v45 = vld [vmem:[#allocation17_spill] sm:$0xff]  ;;  %v7265_v46 = vld [vmem:[#allocation18_spill] sm:$0xff] }
 0x8c0   :  { %3069 = vmatprep.mubr.f32.mxu0 %v6883_v23  ;;  %3140 = vmatprep.mubr.f32.mxu1 %v6883_v23  ;;  %v7299_v23 = vld [vmem:[#allocation52_spill] sm:$0xff] }
 0x8c2   :  { %4803 = vmatpush1.bf16.msra.mxu0 %v5486_v51  ;;  %4835 = vmatpush1.bf16.msra.mxu1 %v5488_v52  ;;  %v7266_v51 = vld [vmem:[#allocation19_spill] sm:$0xff]  ;;  %v7267_v52 = vld [vmem:[#allocation20_spill] sm:$0xff] }
 0x8c3   :  { %4805 = vmatprep.subr.bf16.mxu0 %v5492_v55  ;;  %4837 = vmatprep.subr.bf16.mxu1 %v5494_v56  ;;  %v7268_v55 = vld [vmem:[#allocation21_spill] sm:$0xff]  ;;  %v7269_v56 = vld [vmem:[#allocation22_spill] sm:$0xff] }
 0x8c6   :  { %4807 = vmatpush1.bf16.msra.mxu0 %v5503_v2  ;;  %4839 = vmatpush1.bf16.msra.mxu1 %v5505_v3  ;;  %v7270_v2 = vld [vmem:[#allocation23_spill] sm:$0xff]  ;;  %v7271_v3 = vld [vmem:[#allocation24_spill] sm:$0xff] }
 0x8c7   :  { %4809 = vmatprep.subr.bf16.mxu0 %v5509_v7  ;;  %4841 = vmatprep.subr.bf16.mxu1 %v5511_v8  ;;  %v7272_v7 = vld [vmem:[#allocation25_spill] sm:$0xff]  ;;  %v7273_v8 = vld [vmem:[#allocation26_spill] sm:$0xff] }
 0x8ca   :  { %4811 = vmatpush1.bf16.msra.mxu0 %v5517_v15  ;;  %4843 = vmatpush1.bf16.msra.mxu1 %v5519_v16  ;;  %v7274_v15 = vld [vmem:[#allocation27_spill] sm:$0xff]  ;;  %v7275_v16 = vld [vmem:[#allocation28_spill] sm:$0xff] }
 0x8cb   :  { %4813 = vmatprep.subr.bf16.mxu0 %v5523_v19  ;;  %4845 = vmatprep.subr.bf16.mxu1 %v5525_v21  ;;  %v7276_v19 = vld [vmem:[#allocation29_spill] sm:$0xff]  ;;  %v7277_v21 = vld [vmem:[#allocation30_spill] sm:$0xff] }
 0x8ce   :  { %4815 = vmatpush1.bf16.msra.mxu0 %v5529_v30  ;;  %4847 = vmatpush1.bf16.msra.mxu1 %v5531_v31  ;;  %v7278_v30 = vld [vmem:[#allocation31_spill] sm:$0xff]  ;;  %v7279_v31 = vld [vmem:[#allocation32_spill] sm:$0xff] }
 0x8cf   :  { %4817 = vmatprep.subr.bf16.mxu0 %v5535_v34  ;;  %4849 = vmatprep.subr.bf16.mxu1 %v5537_v35  ;;  %v7280_v34 = vld [vmem:[#allocation33_spill] sm:$0xff]  ;;  %v7281_v35 = vld [vmem:[#allocation34_spill] sm:$0xff] }
 0x8d2   :  { %4819 = vmatpush1.bf16.msra.mxu0 %v5541_v44  ;;  %4851 = vmatpush1.bf16.msra.mxu1 %v5543_v47  ;;  %v7282_v44 = vld [vmem:[#allocation35_spill] sm:$0xff]  ;;  %v7283_v47 = vld [vmem:[#allocation36_spill] sm:$0xff] }
 0x8d3   :  { %4821 = vmatprep.subr.bf16.mxu0 %v5547_v50  ;;  %4853 = vmatprep.subr.bf16.mxu1 %v5549_v53  ;;  %v7284_v50 = vld [vmem:[#allocation37_spill] sm:$0xff]  ;;  %v7285_v53 = vld [vmem:[#allocation38_spill] sm:$0xff] }
 0x8d6   :  { %4823 = vmatpush1.bf16.msra.mxu0 %v5553_v62  ;;  %4855 = vmatpush1.bf16.msra.mxu1 %v5555_v63  ;;  %v7286_v62 = vld [vmem:[#allocation39_spill] sm:$0xff]  ;;  %v7287_v63 = vld [vmem:[#allocation40_spill] sm:$0xff] }
 0x8d7   :  { %4825 = vmatprep.subr.bf16.mxu0 %v5559_v6  ;;  %4857 = vmatprep.subr.bf16.mxu1 %v5561_v9  ;;  %v7288_v6 = vld [vmem:[#allocation41_spill] sm:$0xff]  ;;  %v7289_v9 = vld [vmem:[#allocation42_spill] sm:$0xff] }
 0x8da   :  { %4827 = vmatpush1.bf16.msra.mxu0 %v5565_v13  ;;  %4859 = vmatpush1.bf16.msra.mxu1 %v5567_v14  ;;  %v7290_v13 = vld [vmem:[#allocation43_spill] sm:$0xff]  ;;  %v7291_v14 = vld [vmem:[#allocation44_spill] sm:$0xff] }
 0x8db   :  { %4861 = vmatprep.subr.bf16.mxu0 %v5577_v24  ;;  %4925 = vmatprep.subr.bf16.mxu1 %v5579_v29  ;;  %v7292_v24 = vld [vmem:[#allocation45_spill] sm:$0xff]  ;;  %v7293_v29 = vld [vmem:[#allocation46_spill] sm:$0xff] }
 0x8dd   :  { %3070 = vmatmul.mubr.f32.vlgmr.msra.gmra.mrb[32].mxu0 %v2824_v0  ;;  %3141 = vmatmul.mubr.f32.vlgmr.msra.gmra.mrb[32].mxu1 %v2824_v0  ;;  %v7318_v0 = vld [vmem:[#allocation84_spill] sm:$0xff] }
 0x8de   :  { %4863 = vmatpush1.bf16.msra.mxu0 %v5581_v32  ;;  %4927 = vmatpush1.bf16.msra.mxu1 %v5584_v40  ;;  %v7294_v32 = vld [vmem:[#allocation47_spill] sm:$0xff]  ;;  %v7295_v40 = vld [vmem:[#allocation48_spill] sm:$0xff]  ;;  %vm3367_vm0 = vcmp.eq.s32.totalorder %v7318_v0, 7 }
 0x8df   :  { %4865 = vmatprep.subr.bf16.mxu0 %v5588_v48  ;;  %4929 = vmatprep.subr.bf16.mxu1 %v5590_v49  ;;  %v7296_v48 = vld [vmem:[#allocation49_spill] sm:$0xff]  ;;  %v7297_v49 = vld [vmem:[#allocation50_spill] sm:$0xff] }
 0x8e2   :  { %4867 = vmatpush1.bf16.msra.mxu0 %v5593_v59  ;;  %4931 = vmatpush1.bf16.msra.mxu1 %v7200_v5  ;;  %v7298_v59 = vld [vmem:[#allocation51_spill] sm:$0xff]  ;;  %v7301_v5 = vld [vmem:[#allocation54_spill] sm:$0xff] }
 0x8e3   :  { %4869 = vmatprep.subr.bf16.mxu0 %v7262_v37  ;;  %4933 = vmatprep.subr.bf16.mxu1 %v7263_v38  ;;  %v7319_v37 = vmov 0  }
 0x8e4   :  { %v3368_v38 = vsel %vm3367_vm0, 1, %v7319_v37 }
 0x8e5   :  { %3370 = vperm.xlu1 %4997, %v3368_v38  }
 0x8e6   :  { %4871 = vmatpush1.bf16.msra.mxu0 %v7264_v45  ;;  %4935 = vmatpush1.bf16.msra.mxu1 %v7265_v46 }
 0x8e7   :  { %4873 = vmatprep.subr.bf16.mxu0 %v7266_v51  ;;  %4937 = vmatprep.subr.bf16.mxu1 %v7267_v52  ;;  %v7320_v51 = vld [vmem:[#allocation80_spill] sm:$0xff] }
 0x8ea   :  { %4875 = vmatpush1.bf16.msra.mxu0 %v7268_v55  ;;  %4939 = vmatpush1.bf16.msra.mxu1 %v7269_v56 }
 0x8eb   :  { %4877 = vmatprep.subr.bf16.mxu0 %v7270_v2  ;;  %4941 = vmatprep.subr.bf16.mxu1 %v7271_v3 }
 0x8ee   :  { %4879 = vmatpush1.bf16.msra.mxu0 %v7272_v7  ;;  %4943 = vmatpush1.bf16.msra.mxu1 %v7273_v8  ;;  %v7321_v8 = vld [vmem:[#allocation82_spill] sm:$0xff] }
 0x8ef   :  { %4881 = vmatprep.subr.bf16.mxu0 %v7274_v15  ;;  %4945 = vmatprep.subr.bf16.mxu1 %v7275_v16 }
 0x8f2   :  { %4883 = vmatpush1.bf16.msra.mxu0 %v7276_v19  ;;  %4947 = vmatpush1.bf16.msra.mxu1 %v7277_v21  ;;  %v7322_v19 = vld [vmem:[#allocation83_spill] sm:$0xff] }
 0x8f3   :  { %4885 = vmatprep.subr.bf16.mxu0 %v7278_v30  ;;  %4949 = vmatprep.subr.bf16.mxu1 %v7279_v31 }
 0x8f6   :  { %4887 = vmatpush1.bf16.msra.mxu0 %v7280_v34  ;;  %4951 = vmatpush1.bf16.msra.mxu1 %v7281_v35 }
 0x8f7   :  { %4889 = vmatprep.subr.bf16.mxu0 %v7282_v44  ;;  %4953 = vmatprep.subr.bf16.mxu1 %v7283_v47 }
 0x8fa   :  { %4891 = vmatpush1.bf16.msra.mxu0 %v7284_v50  ;;  %4955 = vmatpush1.bf16.msra.mxu1 %v7285_v53 }
 0x8fb   :  { %4893 = vmatprep.subr.bf16.mxu0 %v7286_v62  ;;  %4957 = vmatprep.subr.bf16.mxu1 %v7287_v63 }
 0x8fe   :  { %4895 = vmatpush1.bf16.msra.mxu0 %v7288_v6  ;;  %4959 = vmatpush1.bf16.msra.mxu1 %v7289_v9 }
 0x8ff   :  { %4897 = vmatprep.subr.bf16.mxu0 %v7290_v13  ;;  %4961 = vmatprep.subr.bf16.mxu1 %v7291_v14 }
 0x902   :  { %4899 = vmatpush1.bf16.msra.mxu0 %v7292_v24  ;;  %4963 = vmatpush1.bf16.msra.mxu1 %v7293_v29 }
 0x903   :  { %4901 = vmatprep.subr.bf16.mxu0 %v7294_v32  ;;  %4965 = vmatprep.subr.bf16.mxu1 %v7295_v40 }
 0x906   :  { %4903 = vmatpush1.bf16.msra.mxu0 %v7296_v48  ;;  %4967 = vmatpush1.bf16.msra.mxu1 %v7297_v49 }
 0x907   :  { %4905 = vmatprep.subr.bf16.mxu0 %v7298_v59  ;;  %4969 = vmatprep.subr.bf16.mxu1 %v7299_v23  ;;  %v7323_v23 = vld [vmem:[#allocation76_spill] sm:$0xff] }
 0x90a   :  { %4907 = vmatpush1.bf16.msra.mxu0 %v7300_v12  ;;  %4971 = vmatpush1.bf16.msra.mxu1 %v7301_v5 }
 0x90b   :  { %4909 = vmatprep.subr.bf16.mxu0 %v7302_v57  ;;  %4973 = vmatprep.subr.bf16.mxu1 %v7303_v11 }
 0x90e   :  { %4911 = vmatpush1.bf16.msra.mxu0 %v7304_v22  ;;  %4975 = vmatpush1.bf16.msra.mxu1 %v7305_v1  ;;  %v3002_v1 = vpop.permute.xlu0 %3001 }
 0x90f   :  { %4913 = vmatprep.subr.bf16.mxu0 %v7306_v25  ;;  %4977 = vmatprep.subr.bf16.mxu1 %v7307_v33  ;;  %vm3003_vm1 = vcmp.eq.s32.totalorder %v3002_v1, 1 }
 0x912   :  { %4915 = vmatpush1.bf16.msra.mxu0 %v7308_v18  ;;  %4979 = vmatpush1.bf16.msra.mxu1 %v7309_v17 }
 0x913   :  { %4917 = vmatprep.subr.bf16.mxu0 %v7310_v41  ;;  %4981 = vmatprep.subr.bf16.mxu1 %v7311_v43 }
 0x916   :  { %4919 = vmatpush1.bf16.msra.mxu0 %v7312_v20  ;;  %4983 = vmatpush1.bf16.msra.mxu1 %v7313_v61 }
 0x917   :  { %4921 = vmatprep.subr.bf16.mxu0 %v7314_v58  ;;  %4985 = vmatprep.subr.bf16.mxu1 %v7315_v10 }
 0x91a   :  { %4923 = vmatpush1.bf16.msra.mxu0 %v7316_v28  ;;  %4987 = vmatpush1.bf16.msra.mxu1 %v7317_v27  ;;  %v3183_v28 = vrot.slane %v6522_v54, 6 }
 0x990   :  { %v2894_v45 = vpop.f32.mrb[30].mxu0  ;;  %v2965_v46 = vpop.f32.mrb[30].mxu1 }
 0x991   :  { %v2970_v52 = vadd.f32 %v2894_v45, %v7320_v51  ;;  %v2896_v55 = vpop.f32.mrb[31].mxu0  ;;  %v2967_v56 = vpop.f32.mrb[31].mxu1  ;;  %v2972_v21 = vadd.f32 %v2965_v46, %v7322_v19 }
 0x992   :  { %v2971_v2 = vadd.f32 %v2896_v55, %v7197_v36  ;;  %v2973_v15 = vadd.f32 %v2967_v56, %v7321_v8 }
 0x993   :  { %v3435_v3 = vmul.f32 -1.442695, %v2970_v52 }
 0x994   :  { %v3436_v7 = vmul.f32 -1.442695, %v2971_v2  ;;  %v3437_v16 = vmul.f32 -1.442695, %v2973_v15 }
 0x995   :  { %5206 = vpow2.f32 %v3435_v3 }
 0x996   :  { %5208 = vpow2.f32 %v3436_v7 }
 0x997   :  { %5210 = vpow2.f32 %v3437_v16 }
 0x998   :  { %5212 = vtanh.f32 %v2972_v21 }
 0x99f   :  { %v5207_v30 = vpop.eup %5206 }
 0x9a0   :  { %v5209_v31 = vpop.eup %5208  ;;  %v2977_v34 = vadd.f32 1.0, %v5207_v30 }
 0x9a1   :  { %v2983_v35 = vadd.f32 1.0, %v5209_v31  ;;  %v5211_v44 = vpop.eup %5210 }
 0x9a2   :  { %5214 = vrcp.f32 %v2977_v34  ;;  %v5213_v47 = vpop.eup %5212  ;;  %v2990_v63 = vadd.f32 1.0, %v5211_v44 }
 0x9a3   :  { %5216 = vrcp.f32 %v2983_v35 }
 0x9a4   :  { %5218 = vrcp.f32 %v2990_v63 }
 0x9ac   :  { %v5215_v50 = vpop.eup %5214 }
 0x9ad   :  { %v5217_v53 = vpop.eup %5216  ;;  %v2994_v62 = vmul.f32 %v5215_v50, %v5213_v47 }
 0x9ae   :  { %v2993_v6 = vmul.f32 %v5217_v53, %v6511_v4  ;;  %v5219_v22 = vpop.eup %5218 }
 0x9b0   :  { %v6628_v9 = vadd.f32 %v2994_v62, %v2993_v6  ;;  %v3071_v13 = vpop.f32.mrb[32].mxu0  ;;  %v3142_v14 = vpop.f32.mrb[32].mxu1 }
 0x9b1   :  { %v3151_v24 = vrot.slane %v3071_v13, 2  ;;  %v3153_v29 = vrot.slane %v3142_v14, 2  ;;  %v3073_v32 = vpop.f32.mrb[33].mxu0  ;;  %v3144_v40 = vpop.f32.mrb[33].mxu1 }
 0x9b2   :  { %v3152_v48 = vrot.slane %v3073_v32, 2  ;;  %v3154_v49 = vrot.slane %v3144_v40, 2  ;;  %5220 = vtanh.f32 %v6628_v9  ;;  %v3371_v14 = vpop.permute.xlu1 %3370 }
 0x9b3   :  { %v3159_v59 = vadd.f32 %v3151_v24, %v7134_v26  ;;  %v3161_v12 = vadd.f32 %v3153_v29, %v7323_v23  ;;  %vm3372_vm3 = vcmp.eq.s32.totalorder %v3371_v14, 1 }
 0x9b4   :  { %v3160_v5 = vadd.f32 %v3152_v48, %v7136_v60  ;;  %v3162_v4 = vadd.f32 %v3154_v49, %v7137_v42 }
 0x9b5   :  { %v3438_v57 = vmul.f32 -1.442695, %v3159_v59 }
 0x9b6   :  { %v3439_v11 = vmul.f32 -1.442695, %v3160_v5  ;;  %v3440_v18 = vmul.f32 -1.442695, %v3162_v4 }
 0x9b7   :  { %5222 = vpow2.f32 %v3438_v57 }
 0x9b8   :  { %5224 = vpow2.f32 %v3439_v11 }
 0x9b9   :  { %5226 = vpow2.f32 %v3440_v18 }
 0x9ba   :  { %5228 = vtanh.f32 %v3161_v12 }
 0x9bc   :  { %v5221_v25 = vpop.eup %5220 }
 0x9bd   :  { %v2997_v33 = vmul.f32 %v5221_v25, %v5219_v22 }
 0x9bf   :  { %v3191_v17 = vrot.slane %v2997_v33, 2  ;;  %v6636_v41 = vsel %vm3003_vm1, %v2997_v33, %v6519_v39 }
 0x9c1   :  { %v5223_v26 = vpop.eup %5222  ;;  %v3194_v43 = vrot.slane %v3191_v17, 6 }
 0x9c2   :  { %v5225_v20 = vpop.eup %5224  ;;  %v3166_v60 = vadd.f32 1.0, %v5223_v26 }
 0x9c3   :  { %v3172_v42 = vadd.f32 1.0, %v5225_v20  ;;  %3261 = vmatprep.mubr.f32.mxu0 %v3194_v43  ;;  %3332 = vmatprep.mubr.f32.mxu1 %v3194_v43  ;;  %v5227_v61 = vpop.eup %5226 }
 0x9c4   :  { %5230 = vrcp.f32 %v3166_v60  ;;  %v5229_v58 = vpop.eup %5228  ;;  %v3179_v39 = vadd.f32 1.0, %v5227_v61 }
 0x9c5   :  { %5232 = vrcp.f32 %v3172_v42 }
 0x9c6   :  { %5234 = vrcp.f32 %v3179_v39 }
 0x9ce   :  { %v5231_v10 = vpop.eup %5230 }
 0x9cf   :  { %v5233_v27 = vpop.eup %5232  ;;  %v3186_v0 = vmul.f32 %v5231_v10, %v5229_v58 }
 0x9d0   :  { %v3185_v37 = vmul.f32 %v5233_v27, %v3183_v28  ;;  %v5235_v45 = vpop.eup %5234 }
 0x9d2   :  { %v3187_v38 = vadd.f32 %v3186_v0, %v3185_v37 }
 0x9d4   :  { %5236 = vtanh.f32 %v3187_v38 }
 0x9de   :  { %v5237_v46 = vpop.eup %5236 }
 0x9df   :  { %v3189_v52 = vmul.f32 %v5237_v46, %v5235_v45 }
 0x9e1   :  { %v3193_v55 = vrot.slane %v3189_v52, 6 }
 0x9e3   :  { %3262 = vmatmul.mubr.f32.vlgmr.msra.gmra.mrb[34].mxu0 %v3193_v55  ;;  %3333 = vmatmul.mubr.f32.vlgmr.msra.gmra.mrb[34].mxu1 %v3193_v55 }
 0xab6   :  { %v3263_v56 = vpop.f32.mrb[34].mxu0  ;;  %v3334_v2 = vpop.f32.mrb[34].mxu1 }
 0xab7   :  { %v3339_v3 = vadd.f32 %v3263_v56, %v7320_v51  ;;  %v3265_v7 = vpop.f32.mrb[35].mxu0  ;;  %v3336_v15 = vpop.f32.mrb[35].mxu1  ;;  %v3341_v34 = vadd.f32 %v3334_v2, %v7322_v19 }
 0xab8   :  { %v3340_v54 = vadd.f32 %v3265_v7, %v7197_v36  ;;  %v3342_v30 = vadd.f32 %v3336_v15, %v7321_v8 }
 0xab9   :  { %v3441_v16 = vmul.f32 -1.442695, %v3339_v3 }
 0xaba   :  { %v3442_v21 = vmul.f32 -1.442695, %v3340_v54  ;;  %v3443_v31 = vmul.f32 -1.442695, %v3342_v30 }
 0xabb   :  { %5238 = vpow2.f32 %v3441_v16 }
 0xabc   :  { %5240 = vpow2.f32 %v3442_v21 }
 0xabd   :  { %5242 = vpow2.f32 %v3443_v31 }
 0xabe   :  { %5244 = vtanh.f32 %v3341_v34 }
 0xac5   :  { %v5239_v35 = vpop.eup %5238 }
 0xac6   :  { %v5241_v44 = vpop.eup %5240  ;;  %v3346_v47 = vadd.f32 1.0, %v5239_v35 }
 0xac7   :  { %v3352_v50 = vadd.f32 1.0, %v5241_v44  ;;  %v5243_v51 = vpop.eup %5242 }
 0xac8   :  { %5246 = vrcp.f32 %v3346_v47  ;;  %v5245_v53 = vpop.eup %5244  ;;  %v3359_v6 = vadd.f32 1.0, %v5243_v51 }
 0xac9   :  { %5248 = vrcp.f32 %v3352_v50 }
 0xaca   :  { %5250 = vrcp.f32 %v3359_v6 }
 0xad2   :  { %v5247_v36 = vpop.eup %5246 }
 0xad3   :  { %v5249_v62 = vpop.eup %5248  ;;  %v3363_v63 = vmul.f32 %v5247_v36, %v5245_v53 }
 0xad4   :  { %v3362_v13 = vmul.f32 %v5249_v62, %v6628_v9  ;;  %v5251_v19 = vpop.eup %5250 }
 0xad6   :  { %v3364_v8 = vadd.f32 %v3363_v63, %v3362_v13 }
 0xad8   :  { %5252 = vtanh.f32 %v3364_v8 }
 0xae2   :  { %v5253_v24 = vpop.eup %5252 }
 0xae3   :  { %v3366_v29 = vmul.f32 %v5253_v24, %v5251_v19 }
 0xae5   :  { %v3373_v32 = vsel %vm3372_vm3, %v3366_v29, %v6636_v41 }
 0xae6   :  { %3375 = vst.msk [vmem:[#allocation8] sm:$0x3] %vm3374_vm2, %v3373_v32 }
 0xae7   :  { %5333 = shalt.err (!%p5330_p0)
}
 0xae8   :  { %s5334_s21 = scalar_lea.hbm %s6663_s6, 32 }
 0xae9   :  { %p5335_p1 = scmp.ne.s32.totalorder %s6663_s6, %s5334_s21  ;;  %p5338_p2 = scmp.lt.u32.totalorder %s5334_s21, %s6663_s6 }
 0xaeb   :  { %p5340_p3 = pnand %p5338_p2, %p5335_p1 }
 0xaed   :  { %5343 = shalt.err (!%p5340_p3)
}
 0xaee   :  { %3385 = dma.vmem_to_hbm [thread:$0]  %s3383_s18, 32, %s6663_s6, [#allocation4]  }
 0xaef   :  { %5348 = dma.done.wait [#allocation4], 32  }
 0xaf0   :  { %5349 = vsyncadd [#allocation4], 4294967264 }
 0xaf1   :  { %3389 = vsyncpa [#allocation3], 1 }
 0xaf2   :  { %3390 = vsyncpa [#allocation6], 1 }
 0xaf3   :  { %3391 = vsyncpa [#allocation4], 1 }

</bundles_post_ra>
